<compile_context>
chip_gen: v7x
topology: tpu7x:2x2x1
jax: 0.10.0
libtpu: 0.0.40
codegen_flags: <defaults>
</compile_context>

<pallas_src>
import numpy as np
import jax
import jax.numpy as jnp
from jax.experimental import pallas as pl
from jax.experimental.pallas import tpu as pltpu


# ----------------------------------------------------------------------------
# Bilinear x2 upsample (align_corners=True), NCHW -> NCHW, one grid step / image
# ----------------------------------------------------------------------------
def _interp_matrix(in_size, out_size):
    """Row-stochastic matrix M (out, in) s.t. M @ v == 1-D linear interp,
    PyTorch align_corners=True semantics."""
    m = np.zeros((out_size, in_size), np.float32)
    if in_size == 1:
        m[:, 0] = 1.0
        return jnp.asarray(m)
    scale = (in_size - 1) / (out_size - 1)
    for o in range(out_size):
        src = o * scale
        i0 = min(int(np.floor(src)), in_size - 2)
        f = src - i0
        m[o, i0] += 1.0 - f
        m[o, i0 + 1] += f
    return jnp.asarray(m)


def _bilinear_up_kernel(x_ref, mh_ref, mwt_ref, o_ref):
    # x_ref:   (1, C*Hl, Wl) f32   NCHW x1 with (C, Hl) merged (free reshape)
    # mh_ref:  (2*Hl, Hl)    f32   row-interp matrix
    # mwt_ref: (Wl, 2*Wl)    f32   col-interp matrix (transposed)
    # o_ref:   (1, C, 2*Hl, 2*Wl)  bf16
    C, H2, W2 = o_ref.shape[1], o_ref.shape[2], o_ref.shape[3]
    Hl = mh_ref.shape[1]
    # W-direction: one lane-dense matmul over all channels / rows at once.
    xw = jnp.dot(x_ref[0], mwt_ref[...], preferred_element_type=jnp.float32)  # (C*Hl, 2W)
    # H-direction: batched matmul over channels (batch=C, M=2H, K=Hl, N=2W).
    xw3 = xw.reshape(C, Hl, W2)                       # split leading dim (layout-safe)
    mh_b = jnp.broadcast_to(mh_ref[...], (C, H2, Hl))
    up = jax.lax.dot_general(
        mh_b, xw3,
        dimension_numbers=(((2,), (1,)), ((0,), (0,))),
        preferred_element_type=jnp.float32)           # (C, 2H, 2W)
    o_ref[0] = up.astype(o_ref.dtype)


def bilinear_upsample_x2(x1):
    # x1: (N, C, Hl, Wl) f32  ->  (N, C, 2Hl, 2Wl) bf16
    N, C, Hl, Wl = x1.shape
    mh = _interp_matrix(Hl, 2 * Hl)            # (2Hl, Hl)
    mwt = _interp_matrix(Wl, 2 * Wl).T         # (Wl, 2Wl)
    x1r = x1.reshape(N, C * Hl, Wl)            # free row-major reshape
    return pl.pallas_call(
        _bilinear_up_kernel,
        out_shape=jax.ShapeDtypeStruct((N, C, 2 * Hl, 2 * Wl), jnp.bfloat16),
        grid=(N,),
        in_specs=[
            pl.BlockSpec((1, C * Hl, Wl), lambda n: (n, 0, 0)),
            pl.BlockSpec((2 * Hl, Hl), lambda n: (0, 0)),
            pl.BlockSpec((Wl, 2 * Wl), lambda n: (0, 0)),
        ],
        out_specs=pl.BlockSpec((1, C, 2 * Hl, 2 * Wl), lambda n: (n, 0, 0, 0)),
        compiler_params=pltpu.CompilerParams(dimension_semantics=("parallel",)),
    )(x1r, mh, mwt)


# ----------------------------------------------------------------------------
# Fused: in-kernel concat + zero-pad + [conv3x3 -> BN -> ReLU] x 2, NHWC,
# row-tiled over H, intermediate h kept in VMEM.
# ----------------------------------------------------------------------------
def _fused_doubleconv_kernel(x2_ref, x1_ref, w1_ref, s1_ref, b1_ref,
                             w2_ref, s2_ref, b2_ref, o_ref, xpad_ref, h_ref):
    # x2_ref:   (1, H, W, C2)  bf16   skip connection, NHWC
    # x1_ref:   (1, H, W, C1)  bf16   upsampled x1, NHWC
    # w1_ref:   (9*Cin, Cmid)  bf16   im2col conv1 weight (tap-major, ch-minor)
    # s1/b1:    (1, Cmid)      f32    folded BN scale / shift
    # w2_ref:   (9*Cmid, Cout) bf16
    # s2/b2:    (1, Cout)      f32
    # o_ref:    (1, TH, W, Cout)
    # xpad_ref: (H+4, W+2, Cin) bf16  persistent: padded concat input (per image)
    # h_ref:    (TH+2, W+2, Cmid) bf16 per-tile intermediate (with zero halo)
    t = pl.program_id(1)
    _, H, W, C2 = x2_ref.shape
    TH = o_ref.shape[1]

    # Build the zero-padded, channel-concatenated input once per image.
    # (2-row halo top/bottom so each tile's slice is always in bounds,
    #  1-column halo left/right = the conv padding.)
    @pl.when(t == 0)
    def _build_xpad():
        xpad_ref[...] = jnp.zeros_like(xpad_ref)
        xcat = jnp.concatenate([x2_ref[0], x1_ref[0]], axis=-1)      # (H, W, Cin)
        xpad_ref[2:H + 2, 1:W + 1, :] = xcat.astype(xpad_ref.dtype)

    # ---------------- conv1 + BN + ReLU on TH+2 rows of h (+/-1 halo for conv2)
    r0 = pl.multiple_of(t * TH, TH)
    xwin = xpad_ref[pl.ds(r0, TH + 4), :, :]                         # (TH+4, W+2, Cin)
    slab1 = jnp.concatenate(
        [xwin[dy:dy + TH + 2, dx:dx + W, :] for dy in range(3) for dx in range(3)],
        axis=-1)                                                     # (TH+2, W, 9*Cin)
    h = jnp.dot(slab1, w1_ref[...], preferred_element_type=jnp.float32)  # (TH+2, W, Cmid)
    h = jnp.maximum(h * s1_ref[...] + b1_ref[...], 0.0)
    # h rows that fall outside the image are conv2's zero padding, not conv1 outputs
    row = r0 - 1 + jax.lax.broadcasted_iota(jnp.int32, (TH + 2, 1, 1), 0)
    h = jnp.where((row >= 0) & (row < H), h, 0.0)
    h_ref[...] = jnp.zeros_like(h_ref)                               # zero column halo
    h_ref[:, 1:W + 1, :] = h.astype(h_ref.dtype)

    # ---------------- conv2 + BN + ReLU on the TH output rows of this tile
    slab2 = jnp.concatenate(
        [h_ref[dy:dy + TH, dx:dx + W, :] for dy in range(3) for dx in range(3)],
        axis=-1)                                                     # (TH, W, 9*Cmid)
    y = jnp.dot(slab2, w2_ref[...], preferred_element_type=jnp.float32)  # (TH, W, Cout)
    y = jnp.maximum(y * s2_ref[...] + b2_ref[...], 0.0)
    o_ref[0] = y.astype(o_ref.dtype)


def fused_double_conv(x2n, x1u, params, *, block_h):
    # x2n: (N, H, W, C2) bf16, x1u: (N, H, W, C1) bf16, NHWC.
    N, H, W, C2 = x2n.shape
    C1 = x1u.shape[-1]
    Cin = C1 + C2
    Cmid = params["w1"].shape[-1]
    Cout = params["w2"].shape[-1]
    assert H % block_h == 0, (H, block_h)
    T = H // block_h

    # HWIO (3,3,Cin,Cout) -> im2col GEMM weight (9*Cin, Cout); tap order (dy, dx)
    # matches the slab concatenation order inside the kernel.
    w1g = params["w1"].reshape(9 * Cin, Cmid).astype(jnp.bfloat16)
    w2g = params["w2"].reshape(9 * Cmid, Cout).astype(jnp.bfloat16)
    s1 = params["s1"].reshape(1, Cmid).astype(jnp.float32)
    b1 = params["b1"].reshape(1, Cmid).astype(jnp.float32)
    s2 = params["s2"].reshape(1, Cout).astype(jnp.float32)
    b2 = params["b2"].reshape(1, Cout).astype(jnp.float32)

    return pl.pallas_call(
        _fused_doubleconv_kernel,
        out_shape=jax.ShapeDtypeStruct((N, H, W, Cout), jnp.float32),
        grid=(N, T),
        in_specs=[
            pl.BlockSpec((1, H, W, C2), lambda n, t: (n, 0, 0, 0)),
            pl.BlockSpec((1, H, W, C1), lambda n, t: (n, 0, 0, 0)),
            pl.BlockSpec((9 * Cin, Cmid), lambda n, t: (0, 0)),
            pl.BlockSpec((1, Cmid), lambda n, t: (0, 0)),
            pl.BlockSpec((1, Cmid), lambda n, t: (0, 0)),
            pl.BlockSpec((9 * Cmid, Cout), lambda n, t: (0, 0)),
            pl.BlockSpec((1, Cout), lambda n, t: (0, 0)),
            pl.BlockSpec((1, Cout), lambda n, t: (0, 0)),
        ],
        out_specs=pl.BlockSpec((1, block_h, W, Cout), lambda n, t: (n, t, 0, 0)),
        scratch_shapes=[
            pltpu.VMEM((H + 4, W + 2, Cin), jnp.bfloat16),
            pltpu.VMEM((block_h + 2, W + 2, Cmid), jnp.bfloat16),
        ],
        compiler_params=pltpu.CompilerParams(
            dimension_semantics=("parallel", "arbitrary"),
            vmem_limit_bytes=48 * 1024 * 1024),
    )(x2n, x1u, w1g, s1, b1, w2g, s2, b2)


# ----------------------------------------------------------------------------
# UpBlock forward (bilinear=True branch), PyTorch NCHW convention at the boundary
# ----------------------------------------------------------------------------
def upblock_forward(params, x1, x2, *, block_h=None):
    # x1: (N, C/2, Hl, Wl), x2: (N, C/2, 2Hl, 2Wl) -- NCHW.
    N, C1, Hl, Wl = x1.shape
    _, C2, H, W = x2.shape
    assert H == 2 * Hl and W == 2 * Wl, (x1.shape, x2.shape)
    if block_h is None:
        block_h = next(c for c in (64, 32, 16, 8, 4, 2, 1) if H % c == 0)

    x1u_nchw = bilinear_upsample_x2(x1)                        # (N, C1, H, W) bf16
    # NCHW <-> NHWC boundary conversion only (no concat/pad/h round trips).
    x1u = jnp.transpose(x1u_nchw, (0, 2, 3, 1))                # (N, H, W, C1)
    x2n = jnp.transpose(x2.astype(jnp.bfloat16), (0, 2, 3, 1)) # (N, H, W, C2)
    y = fused_double_conv(x2n, x1u, params, block_h=block_h)   # (N, H, W, Cout) f32
    return jnp.transpose(y, (0, 3, 1, 2))                      # back to NCHW


def make_params(key, in_channels, out_channels):
    mid = in_channels // 2
    k1, k2 = jax.random.split(key, 2)
    # HWIO conv weights (PyTorch OIHW weights would be transposed to this form).
    w1 = jax.random.normal(k1, (3, 3, in_channels, mid), jnp.float32) * 0.1
    w2 = jax.random.normal(k2, (3, 3, mid, out_channels), jnp.float32) * 0.1
    eps = 1e-5
    # BatchNorm2d (eval) with default init: gamma=1, beta=0, mean=0, var=1
    s1 = jnp.full((mid,), 1.0 / np.sqrt(1.0 + eps), jnp.float32)
    b1 = jnp.zeros((mid,), jnp.float32)
    s2 = jnp.full((out_channels,), 1.0 / np.sqrt(1.0 + eps), jnp.float32)
    b2 = jnp.zeros((out_channels,), jnp.float32)
    return dict(w1=w1, s1=s1, b1=b1, w2=w2, s2=s2, b2=b2)


# ----------------------------------------------------------------------------
# Pure-JAX reference (f32, HIGHEST precision) for self-validation
# ----------------------------------------------------------------------------
def upblock_reference(params, x1, x2):
    N, C1, Hl, Wl = x1.shape
    mh = _interp_matrix(Hl, 2 * Hl)
    mw = _interp_matrix(Wl, 2 * Wl)
    x1u = jnp.einsum('ih,nchw,jw->ncij', mh, x1, mw,
                     precision=jax.lax.Precision.HIGHEST)
    x = jnp.concatenate([x2, x1u], axis=1)

    def conv_bn_relu(x, w, s, b):
        y = jax.lax.conv_general_dilated(
            x, w, window_strides=(1, 1), padding='SAME',
            dimension_numbers=('NCHW', 'HWIO', 'NCHW'),
            precision=jax.lax.Precision.HIGHEST)
        y = y * s[None, :, None, None] + b[None, :, None, None]
        return jnp.maximum(y, 0.0)

    h = conv_bn_relu(x, params['w1'], params['s1'], params['b1'])
    return conv_bn_relu(h, params['w2'], params['s2'], params['b2'])


if __name__ == "__main__":
    key = jax.random.PRNGKey(0)
    kx1, kx2, kp = jax.random.split(key, 3)

    N = 2
    in_channels = 8          # channel count after concat
    out_channels = 8
    Hl = Wl = 8              # low-resolution spatial size of x1

    # x1 comes from the deeper level (in_channels//2 channels, half resolution);
    # x2 is the skip connection (in_channels//2 channels, full resolution).
    x1 = jax.random.normal(kx1, (N, in_channels // 2, Hl, Wl), jnp.float32)
    x2 = jax.random.normal(kx2, (N, in_channels // 2, 2 * Hl, 2 * Wl), jnp.float32)

    params = make_params(kp, in_channels, out_channels)

    fwd = jax.jit(upblock_forward, static_argnames=("block_h",))
    out = fwd(params, x1, x2, block_h=8)   # block_h=8 -> 2 row tiles per image
    jax.block_until_ready(out)
    assert out.shape == (N, out_channels, 2 * Hl, 2 * Wl), out.shape

    ref = upblock_reference(params, x1, x2)
    np.testing.assert_allclose(np.asarray(out), np.asarray(ref),
                               rtol=5e-2, atol=5e-2)   # bf16-matmul tolerance
    print("KERNEL_OK")
</pallas_src>

<mosaic_0001>
module attributes {stable_mosaic.version = 11 : i64} {
  func.func @_bilinear_up_kernel(%arg0: i32, %arg1: memref<1x32x8xf32, #tpu.memory_space<vmem>>, %arg2: memref<16x8xf32, #tpu.memory_space<vmem>>, %arg3: memref<8x16xf32, #tpu.memory_space<vmem>>, %arg4: memref<1x4x16x16xbf16, #tpu.memory_space<vmem>>) attributes {dimension_semantics = [#tpu.dimension_semantics<parallel>], iteration_bounds = array<i64: 2>, scalar_prefetch = 0 : i64, scratch_operands = 0 : i64, tpu.core_type = #tpu.core_type<tc>, window_params = [{transform_indices = @transform_0, window_bounds = array<i64: 1, 32, 8>}, {pipeline_mode = #tpu.pipeline_mode<synchronous>, transform_indices = @transform_1, window_bounds = array<i64: 16, 8>}, {pipeline_mode = #tpu.pipeline_mode<synchronous>, transform_indices = @transform_2, window_bounds = array<i64: 8, 16>}, {transform_indices = @transform_3, window_bounds = array<i64: 1, 4, 16, 16>}]} {
    %c0 = arith.constant 0 : index
    %c0_0 = arith.constant 0 : index
    %c0_1 = arith.constant 0 : index
    %0 = vector.load %arg1[%c0, %c0_0, %c0_1] : memref<1x32x8xf32, #tpu.memory_space<vmem>>, vector<1x32x8xf32>
    %1 = vector.shape_cast %0 : vector<1x32x8xf32> to vector<32x8xf32>
    %c0_2 = arith.constant 0 : index
    %c0_3 = arith.constant 0 : index
    %2 = vector.load %arg3[%c0_2, %c0_3] : memref<8x16xf32, #tpu.memory_space<vmem>>, vector<8x16xf32>
    %cst = arith.constant dense<0.000000e+00> : vector<32x16xf32>
    %3 = tpu.matmul %1, %2, %cst {dimension_numbers = #tpu.dot_dimension_numbers<[1], [0], [0], [1], [0, 0, 1, 1], [], []>} : vector<32x8xf32>, vector<8x16xf32>, vector<32x16xf32> -> vector<32x16xf32>
    %4 = vector.shape_cast %3 : vector<32x16xf32> to vector<4x8x16xf32>
    %c0_4 = arith.constant 0 : index
    %c0_5 = arith.constant 0 : index
    %5 = vector.load %arg2[%c0_4, %c0_5] : memref<16x8xf32, #tpu.memory_space<vmem>>, vector<16x8xf32>
    %6 = vector.shape_cast %5 : vector<16x8xf32> to vector<1x16x8xf32>
    %7 = vector.broadcast %6 : vector<1x16x8xf32> to vector<4x16x8xf32>
    %cst_6 = arith.constant dense<0.000000e+00> : vector<4x16x16xf32>
    %8 = tpu.matmul %7, %4, %cst_6 {dimension_numbers = #tpu.dot_dimension_numbers<[2], [1], [1], [2], [0, 0, 0, 1, 1, 2], [0], [0]>} : vector<4x16x8xf32>, vector<4x8x16xf32>, vector<4x16x16xf32> -> vector<4x16x16xf32>
    %9 = arith.truncf %8 : vector<4x16x16xf32> to vector<4x16x16xbf16>
    %c0_7 = arith.constant 0 : index
    %c0_8 = arith.constant 0 : index
    %c0_9 = arith.constant 0 : index
    %c0_10 = arith.constant 0 : index
    %10 = vector.load %arg4[%c0_7, %c0_8, %c0_9, %c0_10] : memref<1x4x16x16xbf16, #tpu.memory_space<vmem>>, vector<1x4x16x16xbf16>
    %11 = vector.shape_cast %10 : vector<1x4x16x16xbf16> to vector<4x16x16xbf16>
    %12 = vector.shape_cast %9 : vector<4x16x16xbf16> to vector<1x4x16x16xbf16>
    tpu.vector_store %arg4[%c0_7, %c0_8, %c0_9, %c0_10], %12 {strides = array<i32>} : memref<1x4x16x16xbf16, #tpu.memory_space<vmem>>, vector<1x4x16x16xbf16>,
    return
  }
  func.func @transform_0(%arg0: i32) -> (i32, i32, i32) {
    %c0_i32 = arith.constant 0 : i32
    %c0_i32_0 = arith.constant 0 : i32
    %c0_i32_1 = arith.constant 0 : i32
    return %arg0, %c0_i32, %c0_i32_0 : i32, i32, i32
  }
  func.func @transform_1(%arg0: i32) -> (i32, i32) {
    %c0_i32 = arith.constant 0 : i32
    %c0_i32_0 = arith.constant 0 : i32
    %c0_i32_1 = arith.constant 0 : i32
    return %c0_i32, %c0_i32_0 : i32, i32
  }
  func.func @transform_2(%arg0: i32) -> (i32, i32) {
    %c0_i32 = arith.constant 0 : i32
    %c0_i32_0 = arith.constant 0 : i32
    %c0_i32_1 = arith.constant 0 : i32
    return %c0_i32, %c0_i32_0 : i32, i32
  }
  func.func @transform_3(%arg0: i32) -> (i32, i32, i32, i32) {
    %c0_i32 = arith.constant 0 : i32
    %c0_i32_0 = arith.constant 0 : i32
    %c0_i32_1 = arith.constant 0 : i32
    %c0_i32_2 = arith.constant 0 : i32
    return %arg0, %c0_i32, %c0_i32_0, %c0_i32_1 : i32, i32, i32, i32
  }
}

module attributes {stable_mosaic.version = 11 : i64} {
  func.func @_fused_doubleconv_kernel(%arg0: i32, %arg1: i32, %arg2: memref<1x16x16x4xbf16, #tpu.memory_space<vmem>>, %arg3: memref<1x16x16x4xbf16, #tpu.memory_space<vmem>>, %arg4: memref<72x4xbf16, #tpu.memory_space<vmem>>, %arg5: memref<1x4xf32, #tpu.memory_space<vmem>>, %arg6: memref<1x4xf32, #tpu.memory_space<vmem>>, %arg7: memref<36x8xbf16, #tpu.memory_space<vmem>>, %arg8: memref<1x8xf32, #tpu.memory_space<vmem>>, %arg9: memref<1x8xf32, #tpu.memory_space<vmem>>, %arg10: memref<1x8x16x8xf32, #tpu.memory_space<vmem>>, %arg11: memref<20x18x8xbf16, #tpu.memory_space<vmem>>, %arg12: memref<10x18x4xbf16, #tpu.memory_space<vmem>>) attributes {dimension_semantics = [#tpu.dimension_semantics<parallel>, #tpu.dimension_semantics<arbitrary>], iteration_bounds = array<i64: 2, 2>, scalar_prefetch = 0 : i64, scratch_operands = 2 : i64, tpu.core_type = #tpu.core_type<tc>, window_params = [{transform_indices = @transform_0, window_bounds = array<i64: 1, 16, 16, 4>}, {transform_indices = @transform_1, window_bounds = array<i64: 1, 16, 16, 4>}, {pipeline_mode = #tpu.pipeline_mode<synchronous>, transform_indices = @transform_2, window_bounds = array<i64: 72, 4>}, {pipeline_mode = #tpu.pipeline_mode<synchronous>, transform_indices = @transform_3, window_bounds = array<i64: 1, 4>}, {pipeline_mode = #tpu.pipeline_mode<synchronous>, transform_indices = @transform_4, window_bounds = array<i64: 1, 4>}, {pipeline_mode = #tpu.pipeline_mode<synchronous>, transform_indices = @transform_5, window_bounds = array<i64: 36, 8>}, {pipeline_mode = #tpu.pipeline_mode<synchronous>, transform_indices = @transform_6, window_bounds = array<i64: 1, 8>}, {pipeline_mode = #tpu.pipeline_mode<synchronous>, transform_indices = @transform_7, window_bounds = array<i64: 1, 8>}, {transform_indices = @transform_8, window_bounds = array<i64: 1, 8, 16, 8>}]} {
    %c0_i32 = arith.constant 0 : i32
    %0 = arith.cmpi eq, %arg1, %c0_i32 : i32
    %1 = arith.extui %0 : i1 to i32
    %c0_i32_0 = arith.constant 0 : i32
    %2 = arith.cmpi ne, %1, %c0_i32_0 : i32
    scf.if %2 {
      %cst_55 = arith.constant 0.000000e+00 : bf16
      %71 = vector.broadcast %cst_55 : bf16 to vector<20x18x8xbf16>
      %c0_56 = arith.constant 0 : index
      %c0_57 = arith.constant 0 : index
      %c0_58 = arith.constant 0 : index
      %72 = vector.load %arg11[%c0_56, %c0_57, %c0_58] : memref<20x18x8xbf16, #tpu.memory_space<vmem>>, vector<20x18x8xbf16>
      tpu.vector_store %arg11[%c0_56, %c0_57, %c0_58], %71 {strides = array<i32>} : memref<20x18x8xbf16, #tpu.memory_space<vmem>>, vector<20x18x8xbf16>,
      %c0_59 = arith.constant 0 : index
      %c0_60 = arith.constant 0 : index
      %c0_61 = arith.constant 0 : index
      %c0_62 = arith.constant 0 : index
      %73 = vector.load %arg2[%c0_59, %c0_60, %c0_61, %c0_62] : memref<1x16x16x4xbf16, #tpu.memory_space<vmem>>, vector<1x16x16x4xbf16>
      %74 = vector.shape_cast %73 : vector<1x16x16x4xbf16> to vector<16x16x4xbf16>
      %c0_63 = arith.constant 0 : index
      %c0_64 = arith.constant 0 : index
      %c0_65 = arith.constant 0 : index
      %c0_66 = arith.constant 0 : index
      %75 = vector.load %arg3[%c0_63, %c0_64, %c0_65, %c0_66] : memref<1x16x16x4xbf16, #tpu.memory_space<vmem>>, vector<1x16x16x4xbf16>
      %76 = vector.shape_cast %75 : vector<1x16x16x4xbf16> to vector<16x16x4xbf16>
      %77 = tpu.concatenate %74, %76 in 2 : vector<16x16x4xbf16>, vector<16x16x4xbf16> -> vector<16x16x8xbf16>
      %c2_67 = arith.constant 2 : index
      %c1_68 = arith.constant 1 : index
      %c0_69 = arith.constant 0 : index
      %78 = vector.load %arg11[%c2_67, %c1_68, %c0_69] : memref<20x18x8xbf16, #tpu.memory_space<vmem>>, vector<16x16x8xbf16>
      tpu.vector_store %arg11[%c2_67, %c1_68, %c0_69], %77 {strides = array<i32>} : memref<20x18x8xbf16, #tpu.memory_space<vmem>>, vector<16x16x8xbf16>,
    } else {
    }
    %c8_i32 = arith.constant 8 : i32
    %3 = arith.muli %arg1, %c8_i32 : i32
    %4 = tpu.assume_multiple %3, 8 : i32
    %5 = arith.index_cast %4 : i32 to index
    %c0 = arith.constant 0 : index
    %c0_1 = arith.constant 0 : index
    %6 = vector.load %arg11[%5, %c0, %c0_1] : memref<20x18x8xbf16, #tpu.memory_space<vmem>>, vector<12x18x8xbf16>
    %7 = vector.extract_strided_slice %6 {offsets = [0, 0, 0], sizes = [10, 16, 8], strides = [1, 1, 1]} : vector<12x18x8xbf16> to vector<10x16x8xbf16>
    %8 = vector.extract_strided_slice %6 {offsets = [0, 1, 0], sizes = [10, 16, 8], strides = [1, 1, 1]} : vector<12x18x8xbf16> to vector<10x16x8xbf16>
    %9 = vector.extract_strided_slice %6 {offsets = [0, 2, 0], sizes = [10, 16, 8], strides = [1, 1, 1]} : vector<12x18x8xbf16> to vector<10x16x8xbf16>
    %10 = vector.extract_strided_slice %6 {offsets = [1, 0, 0], sizes = [10, 16, 8], strides = [1, 1, 1]} : vector<12x18x8xbf16> to vector<10x16x8xbf16>
    %11 = vector.extract_strided_slice %6 {offsets = [1, 1, 0], sizes = [10, 16, 8], strides = [1, 1, 1]} : vector<12x18x8xbf16> to vector<10x16x8xbf16>
    %12 = vector.extract_strided_slice %6 {offsets = [1, 2, 0], sizes = [10, 16, 8], strides = [1, 1, 1]} : vector<12x18x8xbf16> to vector<10x16x8xbf16>
    %13 = vector.extract_strided_slice %6 {offsets = [2, 0, 0], sizes = [10, 16, 8], strides = [1, 1, 1]} : vector<12x18x8xbf16> to vector<10x16x8xbf16>
    %14 = vector.extract_strided_slice %6 {offsets = [2, 1, 0], sizes = [10, 16, 8], strides = [1, 1, 1]} : vector<12x18x8xbf16> to vector<10x16x8xbf16>
    %15 = vector.extract_strided_slice %6 {offsets = [2, 2, 0], sizes = [10, 16, 8], strides = [1, 1, 1]} : vector<12x18x8xbf16> to vector<10x16x8xbf16>
    %16 = tpu.concatenate %7, %8, %9, %10, %11, %12, %13, %14, %15 in 2 : vector<10x16x8xbf16>, vector<10x16x8xbf16>, vector<10x16x8xbf16>, vector<10x16x8xbf16>, vector<10x16x8xbf16>, vector<10x16x8xbf16>, vector<10x16x8xbf16>, vector<10x16x8xbf16>, vector<10x16x8xbf16> -> vector<10x16x72xbf16>
    %c0_2 = arith.constant 0 : index
    %c0_3 = arith.constant 0 : index
    %17 = vector.load %arg4[%c0_2, %c0_3] : memref<72x4xbf16, #tpu.memory_space<vmem>>, vector<72x4xbf16>
    %cst = arith.constant dense<0.000000e+00> : vector<10x16x4xf32>
    %18 = tpu.matmul %16, %17, %cst {dimension_numbers = #tpu.dot_dimension_numbers<[2], [0], [0, 1], [1], [0, 0, 0, 1, 1, 1], [], []>} : vector<10x16x72xbf16>, vector<72x4xbf16>, vector<10x16x4xf32> -> vector<10x16x4xf32>
    %c0_4 = arith.constant 0 : index
    %c0_5 = arith.constant 0 : index
    %19 = vector.load %arg5[%c0_4, %c0_5] : memref<1x4xf32, #tpu.memory_space<vmem>>, vector<1x4xf32>
    %20 = vector.shape_cast %19 : vector<1x4xf32> to vector<1x1x4xf32>
    %21 = vector.broadcast %20 : vector<1x1x4xf32> to vector<10x16x4xf32>
    %22 = arith.mulf %18, %21 : vector<10x16x4xf32>
    %c0_6 = arith.constant 0 : index
    %c0_7 = arith.constant 0 : index
    %23 = vector.load %arg6[%c0_6, %c0_7] : memref<1x4xf32, #tpu.memory_space<vmem>>, vector<1x4xf32>
    %24 = vector.shape_cast %23 : vector<1x4xf32> to vector<1x1x4xf32>
    %25 = vector.broadcast %24 : vector<1x1x4xf32> to vector<10x16x4xf32>
    %26 = arith.addf %22, %25 : vector<10x16x4xf32>
    %cst_8 = arith.constant 0.000000e+00 : f32
    %27 = vector.broadcast %cst_8 : f32 to vector<10x16x4xf32>
    %28 = arith.maximumf %26, %27 : vector<10x16x4xf32>
    %c1_i32 = arith.constant 1 : i32
    %29 = arith.subi %4, %c1_i32 : i32
    %30 = tpu.iota {dimensions = array<i32: 0>} : vector<10x1x1xi32>
    %31 = vector.broadcast %29 : i32 to vector<10x1x1xi32>
    %32 = arith.addi %31, %30 : vector<10x1x1xi32>
    %c0_i32_9 = arith.constant 0 : i32
    %33 = vector.broadcast %c0_i32_9 : i32 to vector<10x1x1xi32>
    %34 = arith.cmpi sge, %32, %33 : vector<10x1x1xi32>
    %c16_i32 = arith.constant 16 : i32
    %35 = vector.broadcast %c16_i32 : i32 to vector<10x1x1xi32>
    %36 = arith.cmpi slt, %32, %35 : vector<10x1x1xi32>
    %37 = arith.andi %34, %36 : vector<10x1x1xi1>
    %cst_10 = arith.constant 0.000000e+00 : f32
    %38 = vector.shape_cast %37 : vector<10x1x1xi1> to vector<10x1x1xi1>
    %39 = vector.broadcast %38 : vector<10x1x1xi1> to vector<10x16x4xi1>
    %40 = vector.broadcast %cst_10 : f32 to vector<10x16x4xf32>
    %41 = arith.select %39, %28, %40 : vector<10x16x4xi1>, vector<10x16x4xf32>
    %cst_11 = arith.constant 0.000000e+00 : bf16
    %42 = vector.broadcast %cst_11 : bf16 to vector<10x18x4xbf16>
    %c0_12 = arith.constant 0 : index
    %c0_13 = arith.constant 0 : index
    %c0_14 = arith.constant 0 : index
    %43 = vector.load %arg12[%c0_12, %c0_13, %c0_14] : memref<10x18x4xbf16, #tpu.memory_space<vmem>>, vector<10x18x4xbf16>
    tpu.vector_store %arg12[%c0_12, %c0_13, %c0_14], %42 {strides = array<i32>} : memref<10x18x4xbf16, #tpu.memory_space<vmem>>, vector<10x18x4xbf16>,
    %44 = arith.truncf %41 : vector<10x16x4xf32> to vector<10x16x4xbf16>
    %c0_15 = arith.constant 0 : index
    %c1 = arith.constant 1 : index
    %c0_16 = arith.constant 0 : index
    %45 = vector.load %arg12[%c0_15, %c1, %c0_16] : memref<10x18x4xbf16, #tpu.memory_space<vmem>>, vector<10x16x4xbf16>
    tpu.vector_store %arg12[%c0_15, %c1, %c0_16], %44 {strides = array<i32>} : memref<10x18x4xbf16, #tpu.memory_space<vmem>>, vector<10x16x4xbf16>,
    %c0_17 = arith.constant 0 : index
    %c0_18 = arith.constant 0 : index
    %c0_19 = arith.constant 0 : index
    %46 = vector.load %arg12[%c0_17, %c0_18, %c0_19] : memref<10x18x4xbf16, #tpu.memory_space<vmem>>, vector<8x16x4xbf16>
    %c0_20 = arith.constant 0 : index
    %c1_21 = arith.constant 1 : index
    %c0_22 = arith.constant 0 : index
    %47 = vector.load %arg12[%c0_20, %c1_21, %c0_22] : memref<10x18x4xbf16, #tpu.memory_space<vmem>>, vector<8x16x4xbf16>
    %c0_23 = arith.constant 0 : index
    %c2 = arith.constant 2 : index
    %c0_24 = arith.constant 0 : index
    %48 = vector.load %arg12[%c0_23, %c2, %c0_24] : memref<10x18x4xbf16, #tpu.memory_space<vmem>>, vector<8x16x4xbf16>
    %c1_25 = arith.constant 1 : index
    %c0_26 = arith.constant 0 : index
    %c0_27 = arith.constant 0 : index
    %49 = vector.load %arg12[%c1_25, %c0_26, %c0_27] : memref<10x18x4xbf16, #tpu.memory_space<vmem>>, vector<8x16x4xbf16>
    %c1_28 = arith.constant 1 : index
    %c1_29 = arith.constant 1 : index
    %c0_30 = arith.constant 0 : index
    %50 = vector.load %arg12[%c1_28, %c1_29, %c0_30] : memref<10x18x4xbf16, #tpu.memory_space<vmem>>, vector<8x16x4xbf16>
    %c1_31 = arith.constant 1 : index
    %c2_32 = arith.constant 2 : index
    %c0_33 = arith.constant 0 : index
    %51 = vector.load %arg12[%c1_31, %c2_32, %c0_33] : memref<10x18x4xbf16, #tpu.memory_space<vmem>>, vector<8x16x4xbf16>
    %c2_34 = arith.constant 2 : index
    %c0_35 = arith.constant 0 : index
    %c0_36 = arith.constant 0 : index
    %52 = vector.load %arg12[%c2_34, %c0_35, %c0_36] : memref<10x18x4xbf16, #tpu.memory_space<vmem>>, vector<8x16x4xbf16>
    %c2_37 = arith.constant 2 : index
    %c1_38 = arith.constant 1 : index
    %c0_39 = arith.constant 0 : index
    %53 = vector.load %arg12[%c2_37, %c1_38, %c0_39] : memref<10x18x4xbf16, #tpu.memory_space<vmem>>, vector<8x16x4xbf16>
    %c2_40 = arith.constant 2 : index
    %c2_41 = arith.constant 2 : index
    %c0_42 = arith.constant 0 : index
    %54 = vector.load %arg12[%c2_40, %c2_41, %c0_42] : memref<10x18x4xbf16, #tpu.memory_space<vmem>>, vector<8x16x4xbf16>
    %55 = tpu.concatenate %46, %47, %48, %49, %50, %51, %52, %53, %54 in 2 : vector<8x16x4xbf16>, vector<8x16x4xbf16>, vector<8x16x4xbf16>, vector<8x16x4xbf16>, vector<8x16x4xbf16>, vector<8x16x4xbf16>, vector<8x16x4xbf16>, vector<8x16x4xbf16>, vector<8x16x4xbf16> -> vector<8x16x36xbf16>
    %c0_43 = arith.constant 0 : index
    %c0_44 = arith.constant 0 : index
    %56 = vector.load %arg7[%c0_43, %c0_44] : memref<36x8xbf16, #tpu.memory_space<vmem>>, vector<36x8xbf16>
    %cst_45 = arith.constant dense<0.000000e+00> : vector<8x16x8xf32>
    %57 = tpu.matmul %55, %56, %cst_45 {dimension_numbers = #tpu.dot_dimension_numbers<[2], [0], [0, 1], [1], [0, 0, 0, 1, 1, 1], [], []>} : vector<8x16x36xbf16>, vector<36x8xbf16>, vector<8x16x8xf32> -> vector<8x16x8xf32>
    %c0_46 = arith.constant 0 : index
    %c0_47 = arith.constant 0 : index
    %58 = vector.load %arg8[%c0_46, %c0_47] : memref<1x8xf32, #tpu.memory_space<vmem>>, vector<1x8xf32>
    %59 = vector.shape_cast %58 : vector<1x8xf32> to vector<1x1x8xf32>
    %60 = vector.broadcast %59 : vector<1x1x8xf32> to vector<8x16x8xf32>
    %61 = arith.mulf %57, %60 : vector<8x16x8xf32>
    %c0_48 = arith.constant 0 : index
    %c0_49 = arith.constant 0 : index
    %62 = vector.load %arg9[%c0_48, %c0_49] : memref<1x8xf32, #tpu.memory_space<vmem>>, vector<1x8xf32>
    %63 = vector.shape_cast %62 : vector<1x8xf32> to vector<1x1x8xf32>
    %64 = vector.broadcast %63 : vector<1x1x8xf32> to vector<8x16x8xf32>
    %65 = arith.addf %61, %64 : vector<8x16x8xf32>
    %cst_50 = arith.constant 0.000000e+00 : f32
    %66 = vector.broadcast %cst_50 : f32 to vector<8x16x8xf32>
    %67 = arith.maximumf %65, %66 : vector<8x16x8xf32>
    %c0_51 = arith.constant 0 : index
    %c0_52 = arith.constant 0 : index
    %c0_53 = arith.constant 0 : index
    %c0_54 = arith.constant 0 : index
    %68 = vector.load %arg10[%c0_51, %c0_52, %c0_53, %c0_54] : memref<1x8x16x8xf32, #tpu.memory_space<vmem>>, vector<1x8x16x8xf32>
    %69 = vector.shape_cast %68 : vector<1x8x16x8xf32> to vector<8x16x8xf32>
    %70 = vector.shape_cast %67 : vector<8x16x8xf32> to vector<1x8x16x8xf32>
    tpu.vector_store %arg10[%c0_51, %c0_52, %c0_53, %c0_54], %70 {strides = array<i32>} : memref<1x8x16x8xf32, #tpu.memory_space<vmem>>, vector<1x8x16x8xf32>,
    return
  }
  func.func @transform_0(%arg0: i32, %arg1: i32) -> (i32, i32, i32, i32) {
    %c0_i32 = arith.constant 0 : i32
    %c0_i32_0 = arith.constant 0 : i32
    %c0_i32_1 = arith.constant 0 : i32
    %c0_i32_2 = arith.constant 0 : i32
    return %arg0, %c0_i32, %c0_i32_0, %c0_i32_1 : i32, i32, i32, i32
  }
  func.func @transform_1(%arg0: i32, %arg1: i32) -> (i32, i32, i32, i32) {
    %c0_i32 = arith.constant 0 : i32
    %c0_i32_0 = arith.constant 0 : i32
    %c0_i32_1 = arith.constant 0 : i32
    %c0_i32_2 = arith.constant 0 : i32
    return %arg0, %c0_i32, %c0_i32_0, %c0_i32_1 : i32, i32, i32, i32
  }
  func.func @transform_2(%arg0: i32, %arg1: i32) -> (i32, i32) {
    %c0_i32 = arith.constant 0 : i32
    %c0_i32_0 = arith.constant 0 : i32
    %c0_i32_1 = arith.constant 0 : i32
    return %c0_i32, %c0_i32_0 : i32, i32
  }
  func.func @transform_3(%arg0: i32, %arg1: i32) -> (i32, i32) {
    %c0_i32 = arith.constant 0 : i32
    %c0_i32_0 = arith.constant 0 : i32
    %c0_i32_1 = arith.constant 0 : i32
    return %c0_i32, %c0_i32_0 : i32, i32
  }
  func.func @transform_4(%arg0: i32, %arg1: i32) -> (i32, i32) {
    %c0_i32 = arith.constant 0 : i32
    %c0_i32_0 = arith.constant 0 : i32
    %c0_i32_1 = arith.constant 0 : i32
    return %c0_i32, %c0_i32_0 : i32, i32
  }
  func.func @transform_5(%arg0: i32, %arg1: i32) -> (i32, i32) {
    %c0_i32 = arith.constant 0 : i32
    %c0_i32_0 = arith.constant 0 : i32
    %c0_i32_1 = arith.constant 0 : i32
    return %c0_i32, %c0_i32_0 : i32, i32
  }
  func.func @transform_6(%arg0: i32, %arg1: i32) -> (i32, i32) {
    %c0_i32 = arith.constant 0 : i32
    %c0_i32_0 = arith.constant 0 : i32
    %c0_i32_1 = arith.constant 0 : i32
    return %c0_i32, %c0_i32_0 : i32, i32
  }
  func.func @transform_7(%arg0: i32, %arg1: i32) -> (i32, i32) {
    %c0_i32 = arith.constant 0 : i32
    %c0_i32_0 = arith.constant 0 : i32
    %c0_i32_1 = arith.constant 0 : i32
    return %c0_i32, %c0_i32_0 : i32, i32
  }
  func.func @transform_8(%arg0: i32, %arg1: i32) -> (i32, i32, i32, i32) {
    %c0_i32 = arith.constant 0 : i32
    %c0_i32_0 = arith.constant 0 : i32
    %c0_i32_1 = arith.constant 0 : i32
    return %arg0, %arg1, %c0_i32, %c0_i32_0 : i32, i32, i32, i32
  }
}

</mosaic_0001>

<bundles_post_ra>
// kernel: upblock_forward.2
= control target key start
LH: loop header
LB: loop body
LE: loop exit
PB: predicated region body
PF: predicated region fallthrough
CT: control target
= control target key end

     0   :  { %s800_s12 = smov 0   ;;  %s853_s0 = inlined_call_operand.vmem [shape: f32[2,32,8], index: 0, kind: input, shape index: {}]   ;;  %s854_s1 = inlined_call_operand.vmem [shape: f32[16,8], index: 1, kind: input, shape index: {}]   ;;  %s855_s2 = inlined_call_operand.vmem [shape: f32[8,16], index: 2, kind: input, shape index: {}]   ;;  %s856_s3 = inlined_call_operand.vmem [shape: bf16[2,4,16,16], index: 3, kind: output, shape index: {}]  }
   0x1 LB: > { %s678_s13 = sadd.s32 4294967295, %s778_s12   ;;  %p682_p0 = scmp.ge.s32.totalorder %s778_s12, 1  ;;  %s778_s12 = sphi %s800_s12, %s13_s12  }
   0x2   : > { %p137_p1 = scmp.lt.s32.totalorder %s778_s12, 3 }
   0x4   : > { %p138_p2 = pnand %p682_p0, %p137_p1 }
   0x5   : > { %v175_v0 = vld [vmem:[%s855_s2] sm:$0xff] (!%p138_p2)  ;;  %p161_p3 = scmp.lt.s32.totalorder (!%p138_p2), %s678_s13, 1  ;;  %vm176_vm0 = vcmask (!%p138_p2), 64512   ;;  %v275_v8 = vld [vmem:[%s854_s1 + $0x8] sm:$0xff] (!%p138_p2)  ;;  %vm614_vm1 = vcmask (!%p138_p2), 125952  }
   0x6   : > { %141 = sbr.rel (%p138_p2) target bundleno = 457 (0x1c9), region = 32  ;;  %736 = vmatprep.subr.mxu0 (!%p138_p2), %v175_v0  ;;  %v274_v5 = vld [vmem:[%s854_s1] sm:$0xff] (!%p138_p2) }
   0x7   : > { %737 = vmatpush3.msra.mxu0 (!%p138_p2), %v175_v0  ;;  %746 = vmatprep.mubr.msk.f32.mxu1 (!%p138_p2), %vm176_vm0, %v274_v5 }
   0xd   : > { %s858_s13 = smov (!%p161_p3, %s678_s13), 1 }
   0xe   : > { %s709_s16 = sshll.u32 %s858_s13, 5 }
   0xf   : > { %s165_s19 = scalar_lea.vmem %s853_s0, %s709_s16  ;;  %s170_s26 = scalar_lea.vmem %s856_s3, %s709_s16 }
  0x10   : > { %v171_v1 = vld [vmem:[%s165_s19] sm:$0xff]  ;;  %v172_v2 = vld [vmem:[%s165_s19 + $0x8] sm:$0xff]  ;;  %v173_v3 = vld [vmem:[%s165_s19 + $0x10] sm:$0xff] }
  0x11   : > { %738 = vmatprep.mubr.msk.f32.mxu0 %vm176_vm0, %v171_v1  ;;  %v174_v4 = vld [vmem:[%s165_s19 + $0x18] sm:$0xff] }
  0x12   : > { %739 = vmatmul.mubr.msk.f32.vlgmr.msra.gmra.mrb[0].mxu0 %vm176_vm0, %v172_v2 }
  0x13   : > { %741 = vmatprep.mubr.msk.f32.mxu0 %vm176_vm0, %v173_v3 }
  0x16   : > { %742 = vmatmul.mubr.msk.f32.gmra.mrb[2].mxu0 %vm176_vm0, %v174_v4 }
  0x17   : > { %756 = vmatprep.mubr.msk.f32.mxu0 %vm176_vm0, %v274_v5 }
  0xe5   : > { %v740_v6 = vpop.f32.mrb[0].mxu0 }
  0xe6   : > { %v255_v7 = vpop.f32.mrb[1].mxu0 }
  0xe7   : > { %744 = vmatprep.subr.mxu1 %v255_v7 }
  0xe8   : > { %745 = vmatpush3.msra.mxu1 %v255_v7 }
  0xe9   : > { %v743_v9 = vpop.f32.mrb[2].mxu0  ;;  %747 = vmatmul.mubr.msk.f32.vlgmr.msra.gmra.mrb[0].mxu1 %vm176_vm0, %v275_v8  ;;  %749 = vmatprep.subr.mxu1 %v740_v6 }
  0xea   : > { %v265_v10 = vpop.f32.mrb[3].mxu0  ;;  %750 = vmatpush3.msra.mxu1 %v740_v6  ;;  %751 = vmatprep.mubr.msk.f32.mxu1 %vm176_vm0, %v274_v5 }
  0xeb   : > { %754 = vmatprep.subr.mxu0 %v265_v10  ;;  %759 = vmatprep.subr.mxu1 %v743_v9 }
  0xec   : > { %755 = vmatpush3.msra.mxu0 %v265_v10 }
  0xed   : > { %752 = vmatmul.mubr.msk.f32.vlgmr.msra.gmra.mrb[2].mxu1 %vm176_vm0, %v275_v8  ;;  %757 = vmatmul.mubr.msk.f32.vlgmr.msra.gmra.mrb[4].mxu0 %vm176_vm0, %v275_v8 }
  0xee   : > { %760 = vmatpush3.msra.mxu1 %v743_v9  ;;  %761 = vmatprep.mubr.msk.f32.mxu1 %vm176_vm0, %v274_v5 }
  0xf1   : > { %762 = vmatmul.mubr.msk.f32.vlgmr.msra.gmra.mrb[4].mxu1 %vm176_vm0, %v275_v8 }
 0x1bc   : > { %v748_v11 = vpop.f32.mrb[0].mxu1 }
 0x1bd   : > { %v712_v12 = vpack.c.bf16 %v748_v11, %v748_v11  ;;  %v348_v13 = vpop.f32.mrb[1].mxu1 }
 0x1be   : > { %v711_v14 = vpack.c.bf16 %v348_v13, %v348_v13 }
 0x1bf   : > { %616 = vst.msk [vmem:[%s170_s26 + $0x4] sm:$0xf] %vm614_vm1, %v712_v12 }
 0x1c0   : > { %615 = vst.msk [vmem:[%s170_s26] sm:$0xf] %vm614_vm1, %v711_v14  ;;  %v753_v15 = vpop.f32.mrb[2].mxu1  ;;  %v758_v16 = vpop.f32.mrb[4].mxu0 }
 0x1c1   : > { %v714_v17 = vpack.c.bf16 %v753_v15, %v753_v15  ;;  %v423_v18 = vpop.f32.mrb[3].mxu1  ;;  %v716_v19 = vpack.c.bf16 %v758_v16, %v758_v16  ;;  %v498_v20 = vpop.f32.mrb[5].mxu0 }
 0x1c2   : > { %v713_v21 = vpack.c.bf16 %v423_v18, %v423_v18  ;;  %v715_v22 = vpack.c.bf16 %v498_v20, %v498_v20 }
 0x1c3   : > { %618 = vst.msk [vmem:[%s170_s26 + $0xc] sm:$0xf] %vm614_vm1, %v714_v17  ;;  %620 = vst.msk [vmem:[%s170_s26 + $0x14] sm:$0xf] %vm614_vm1, %v716_v19 }
 0x1c4   : > { %617 = vst.msk [vmem:[%s170_s26 + $0x8] sm:$0xf] %vm614_vm1, %v713_v21  ;;  %v763_v23 = vpop.f32.mrb[4].mxu1  ;;  %619 = vst.msk [vmem:[%s170_s26 + $0x10] sm:$0xf] %vm614_vm1, %v715_v22 }
 0x1c5   : > { %v718_v24 = vpack.c.bf16 %v763_v23, %v763_v23  ;;  %v573_v25 = vpop.f32.mrb[5].mxu1 }
 0x1c6   : > { %v717_v26 = vpack.c.bf16 %v573_v25, %v573_v25 }
 0x1c7   : > { %622 = vst.msk [vmem:[%s170_s26 + $0x1c] sm:$0xf] %vm614_vm1, %v718_v24 }
 0x1c8   : > { %621 = vst.msk [vmem:[%s170_s26 + $0x18] sm:$0xf] %vm614_vm1, %v717_v26 }
 0x1c9 PF: > { %s13_s12 = sadd.s32 1, %s778_s12  }
 0x1ca   : > { %p10_p4 = scmp.ge.s32.totalorder %s13_s12, 4  }
 0x1cc   :  { %12 = sbr.rel (!%p10_p4) target bundleno = 1 (0x1), region = 62 }

// kernel: upblock_forward.3
= control target key start
LH: loop header
LB: loop body
LE: loop exit
PB: predicated region body
PF: predicated region fallthrough
CT: control target
= control target key end

     0   :  { %s4511_s27 = smov 0   ;;  %s4513_s28 = smov 0   ;;  %s5933_s0 = inlined_call_operand.vmem [shape: bf16[2,16,16,4], index: 0, kind: input, shape index: {}]   ;;  %s5934_s1 = inlined_call_operand.vmem [shape: bf16[2,16,16,4], index: 1, kind: input, shape index: {}]   ;;  %s5935_s2 = inlined_call_operand.vmem [shape: bf16[72,4], index: 2, kind: input, shape index: {}]   ;;  %s5936_s3 = inlined_call_operand.vmem [shape: f32[1,4], index: 3, kind: input, shape index: {}]   ;;  %s5937_s4 = inlined_call_operand.vmem [shape: f32[1,4], index: 4, kind: input, shape index: {}]   ;;  %s5938_s5 = inlined_call_operand.vmem [shape: bf16[36,8], index: 5, kind: input, shape index: {}]   ;;  %s5939_s6 = inlined_call_operand.vmem [shape: f32[1,8], index: 6, kind: input, shape index: {}]   ;;  %s5940_s7 = inlined_call_operand.vmem [shape: f32[1,8], index: 7, kind: input, shape index: {}]   ;;  %s5941_s8 = inlined_call_operand.vmem [shape: f32[2,16,16,8], index: 8, kind: output, shape index: {}]  }
   0x1   :  { %s4515_s29 = smov 0   ;;  %s4517_s30 = smov 0  }
   0x2   :  { %s4519_s9 = smov 0  }
   0x3 LB: > { %s27_s10 = sadd.s32 1, %s4441_s29  ;;  %s30_s11 = sadd.s32 1, %s4445_s30  ;;  %s4449_s9 = sphi %s4519_s9, %s18_s9   ;;  %s4445_s30 = sphi %s4517_s30, %s5975_s30   ;;  %s4441_s29 = sphi %s4515_s29, %s5974_s29   ;;  %s4437_s28 = sphi %s4513_s28, %s5973_s28   ;;  %s4433_s27 = sphi %s4511_s27, %s5972_s27  }
   0x4   : > { %p28_p0 = scmp.ge.s32.totalorder %s27_s10, 2  ;;  %p3895_p1 = scmp.ge.s32.totalorder %s4449_s9, 1 }
   0x5   : > { %p286_p2 = scmp.lt.s32.totalorder %s4449_s9, 5 }
   0x6   : > { %s5977_s10 = smov (%p28_p0, %s27_s10), 0  ;;  %s5979_s11 = smov (!%p28_p0, %s30_s11), %s4445_s30 }
   0x7   : > { %p287_p3 = pnand %p3895_p1, %p286_p2  ;;  %p32_p4 = scmp.ge.s32.totalorder %s5979_s11, 2 }
   0x8   : > { %p330_p5 = scmp.lt.s32.totalorder (!%p287_p3), %s4437_s28, 1  ;;  %s4544_s12 = sshll.u32 (!%p287_p3), %s4433_s27, 3 }
   0x9   : > { %s5981_s11 = smov (%p32_p4, %s5979_s11), 0  ;;  %290 = sbr.rel (%p287_p3) target bundleno = 1100 (0x44c), region = 52 }
   0xa   : > { %5942 = sst [smem:[#allocation4_spill]] %s5981_s11  ;;  %p343_p6 = scmp.lt.s32.totalorder (!%p287_p3), %s4544_s12, 15 }
   0xb   : > { %p3904_p7 = scmp.ne.s32.totalorder (!%p287_p3), %s4433_s27, 0 }
  0x10   : > { %s5983_s28 = smov (!%p330_p5, %s4437_s28), 1  ;;  %vm356_vm0 = vcmask (!%p3904_p7), 60416   ;;  %vm359_vm1 = vcmask (!%p3904_p7), 57344   ;;  %v4452_v4 = vmov (!%p3904_p7), 0   ;;  %vm674_vm2 = vcmask (!%p3904_p7), 31744  }
  0x11   : > { %s344_s13 = scalar_select %p343_p6, %s4544_s12, 15 }
  0x12   : > { %s4121_s14 = sshll.u32 %s5983_s28, 7  ;;  %s3902_s15 = sshll.u32 %s5983_s28, 5  ;;  %370 = vst.msk [vmem:[#allocation2 + $0x30] sm:$0xf] (!%p3904_p7), %vm356_vm0, %v4452_v4  ;;  %371 = vst.msk [vmem:[#allocation2 + $0x34] sm:$0xf] (!%p3904_p7), %vm356_vm0, %v4452_v4 }
  0x13   : > { %s4551_s18 = scalar_lea.vmem %s5933_s0, %s4121_s14  ;;  %s4556_s21 = scalar_lea.vmem %s5934_s1, %s4121_s14  ;;  %357 = vst.msk [vmem:[#allocation2] sm:$0xf] (!%p3904_p7), %vm356_vm0, %v4452_v4  ;;  %358 = vst.msk [vmem:[#allocation2 + $0x4] sm:$0xf] (!%p3904_p7), %vm356_vm0, %v4452_v4  ;;  %vm803_vm3 = vsmask.f32 (!%p3904_p7), 256 }
  0x14   : > { %s3901_s22 = sshll.u32 %s344_s13, 1  ;;  %355 = sbr.rel (%p3904_p7) target bundleno = 207 (0xcf), region = 56  ;;  %v4279_v0 = vld [vmem:[%s4556_s21 + $0x10] sm:$0xff] (!%p3904_p7)   ;;  %v4280_v1 = vld [vmem:[%s4556_s21] sm:$0xff] (!%p3904_p7)   ;;  %v4568_v2 = vld [vmem:[%s4556_s21 + $0x18] sm:$0xff] (!%p3904_p7)  }
  0x15   : > { %s347_s23 = sadd.s32 %s3902_s15, %s3901_s22  ;;  %s4451_s28 = smov (!%p3904_p7), 4   ;;  %v4572_v3 = vld [vmem:[%s4556_s21 + $0x8] sm:$0xff] (!%p3904_p7)   ;;  %361 = vst.msk [vmem:[#allocation2 + $0xc] sm:$0xf] (!%p3904_p7), %vm356_vm0, %v4452_v4  ;;  %362 = vst.msk [vmem:[#allocation2 + $0x10] sm:$0xf] (!%p3904_p7), %vm356_vm0, %v4452_v4 }
  0x16   : > { %s3903_s24 = sshll.u32 %s347_s23, 3  ;;  %646 = vrot.lane.b32.xlu1 (!%p3904_p7), %v4279_v0, %s4451_s28  ;;  %642 = vrot.lane.b32.xlu0 (!%p3904_p7), %v4280_v1, %s4451_s28  ;;  %364 = vst.msk [vmem:[#allocation2 + $0x18] sm:$0xf] (!%p3904_p7), %vm356_vm0, %v4452_v4  ;;  %365 = vst.msk [vmem:[#allocation2 + $0x1c] sm:$0xf] (!%p3904_p7), %vm356_vm0, %v4452_v4  ;;  %v4283_v5 = vld [vmem:[%s4556_s21 + $0x28] sm:$0xff] (!%p3904_p7)  }
  0x17   : > { %s4561_s11 = scalar_lea.vmem %s5941_s8, %s3903_s24  ;;  %367 = vst.msk [vmem:[#allocation2 + $0x24] sm:$0xf] (!%p3904_p7), %vm356_vm0, %v4452_v4  ;;  %368 = vst.msk [vmem:[#allocation2 + $0x28] sm:$0xf] (!%p3904_p7), %vm356_vm0, %v4452_v4  ;;  %v4284_v6 = vld [vmem:[%s4556_s21 + $0x20] sm:$0xff] (!%p3904_p7)   ;;  %v4285_v7 = vld [vmem:[%s4556_s21 + $0x38] sm:$0xff] (!%p3904_p7)  }
  0x18   : > { %373 = vst.msk [vmem:[#allocation2 + $0x3c] sm:$0xf] (!%p3904_p7), %vm356_vm0, %v4452_v4  ;;  %374 = vst.msk [vmem:[#allocation2 + $0x40] sm:$0xf] (!%p3904_p7), %vm356_vm0, %v4452_v4  ;;  %v4286_v8 = vld [vmem:[%s4556_s21 + $0x30] sm:$0xff] (!%p3904_p7)   ;;  %v4287_v9 = vld [vmem:[%s4556_s21 + $0x48] sm:$0xff] (!%p3904_p7)  }
  0x19   : > { %376 = vst.msk [vmem:[#allocation2 + $0x48] sm:$0xf] (!%p3904_p7), %vm356_vm0, %v4452_v4  ;;  %377 = vst.msk [vmem:[#allocation2 + $0x4c] sm:$0xf] (!%p3904_p7), %vm356_vm0, %v4452_v4  ;;  %v4288_v10 = vld [vmem:[%s4556_s21 + $0x40] sm:$0xff] (!%p3904_p7)   ;;  %v4289_v11 = vld [vmem:[%s4556_s21 + $0x58] sm:$0xff] (!%p3904_p7)  }
  0x1a   : > { %379 = vst.msk [vmem:[#allocation2 + $0x54] sm:$0xf] (!%p3904_p7), %vm356_vm0, %v4452_v4  ;;  %380 = vst.msk [vmem:[#allocation2 + $0x58] sm:$0xf] (!%p3904_p7), %vm356_vm0, %v4452_v4  ;;  %648 = vrot.lane.b32.xlu1 (!%p3904_p7), %v4568_v2, %s4451_s28  ;;  %644 = vrot.lane.b32.xlu0 (!%p3904_p7), %v4572_v3, %s4451_s28  ;;  %v4290_v12 = vld [vmem:[%s4556_s21 + $0x50] sm:$0xff] (!%p3904_p7)   ;;  %v4291_v13 = vld [vmem:[%s4556_s21 + $0x68] sm:$0xff] (!%p3904_p7)  }
  0x1b   : > { %382 = vst.msk [vmem:[#allocation2 + $0x60] sm:$0xf] %vm356_vm0, %v4452_v4  ;;  %383 = vst.msk [vmem:[#allocation2 + $0x64] sm:$0xf] %vm356_vm0, %v4452_v4  ;;  %v4292_v14 = vld [vmem:[%s4556_s21 + $0x60] sm:$0xff]   ;;  %v4293_v15 = vld [vmem:[%s4556_s21 + $0x78] sm:$0xff]  }
  0x1c   : > { %385 = vst.msk [vmem:[#allocation2 + $0x6c] sm:$0xf] %vm356_vm0, %v4452_v4  ;;  %386 = vst.msk [vmem:[#allocation2 + $0x70] sm:$0xf] %vm356_vm0, %v4452_v4  ;;  %v4294_v16 = vld [vmem:[%s4556_s21 + $0x70] sm:$0xff]   ;;  %v4296_v18 = vld [vmem:[%s4551_s18] sm:$0xff]  }
  0x1d   : > { %388 = vst.msk [vmem:[#allocation2 + $0x78] sm:$0xf] %vm356_vm0, %v4452_v4  ;;  %389 = vst.msk [vmem:[#allocation2 + $0x7c] sm:$0xf] %vm356_vm0, %v4452_v4  ;;  %v4295_v17 = vld [vmem:[%s4551_s18 + $0x10] sm:$0xff]   ;;  %v4297_v25 = vld [vmem:[%s4551_s18 + $0x18] sm:$0xff]  }
  0x1e   : > { %391 = vst.msk [vmem:[#allocation2 + $0x84] sm:$0xf] %vm356_vm0, %v4452_v4  ;;  %392 = vst.msk [vmem:[#allocation2 + $0x88] sm:$0xf] %vm356_vm0, %v4452_v4  ;;  %652 = vrot.lane.b32.xlu1 %v4283_v5, %s4451_s28  ;;  %650 = vrot.lane.b32.xlu0 %v4284_v6, %s4451_s28  ;;  %vm804_vm4 = vsmask.f32 4368 }
  0x1f   : > { %394 = vst.msk [vmem:[#allocation2 + $0x90] sm:$0xf] %vm356_vm0, %v4452_v4  ;;  %395 = vst.msk [vmem:[#allocation2 + $0x94] sm:$0xf] %vm356_vm0, %v4452_v4  ;;  %v4298_v26 = vld [vmem:[%s4551_s18 + $0x8] sm:$0xff]   ;;  %v4300_v0 = vld [vmem:[%s4551_s18 + $0x20] sm:$0xff]  }
  0x20   : > { %397 = vst.msk [vmem:[#allocation2 + $0x9c] sm:$0xf] %vm356_vm0, %v4452_v4  ;;  %398 = vst.msk [vmem:[#allocation2 + $0xa0] sm:$0xf] %vm356_vm0, %v4452_v4  ;;  %vm1128_vm5 = vsmask.f32 7938 }
  0x21   : > { %400 = vst.msk [vmem:[#allocation2 + $0xa8] sm:$0xf] %vm356_vm0, %v4452_v4  ;;  %401 = vst.msk [vmem:[#allocation2 + $0xac] sm:$0xf] %vm356_vm0, %v4452_v4  ;;  %v1146_v46 = vld [vmem:[#allocation2 + $0x30] sm:$0xf] }
  0x22   : > { %403 = vst.msk [vmem:[#allocation2 + $0xb4] sm:$0xf] %vm356_vm0, %v4452_v4  ;;  %404 = vst.msk [vmem:[#allocation2 + $0xb8] sm:$0xf] %vm356_vm0, %v4452_v4  ;;  %656 = vrot.lane.b32.xlu1 %v4285_v7, %s4451_s28  ;;  %654 = vrot.lane.b32.xlu0 %v4286_v8, %s4451_s28  ;;  %v1130_v56 = vld [vmem:[#allocation2 + $0x18] sm:$0xf] }
  0x23   : > { %406 = vst.msk [vmem:[#allocation2 + $0xc0] sm:$0xf] %vm356_vm0, %v4452_v4  ;;  %407 = vst.msk [vmem:[#allocation2 + $0xc4] sm:$0xf] %vm356_vm0, %v4452_v4  ;;  %v4299_v63 = vld [vmem:[%s4551_s18 + $0x28] sm:$0xff]   ;;  %v4301_v1 = vld [vmem:[%s4551_s18 + $0x38] sm:$0xff]  }
  0x24   : > { %409 = vst.msk [vmem:[#allocation2 + $0xcc] sm:$0xf] %vm356_vm0, %v4452_v4  ;;  %410 = vst.msk [vmem:[#allocation2 + $0xd0] sm:$0xf] %vm356_vm0, %v4452_v4 }
  0x25   : > { %412 = vst.msk [vmem:[#allocation2 + $0xd8] sm:$0xf] %vm356_vm0, %v4452_v4  ;;  %413 = vst.msk [vmem:[#allocation2 + $0xdc] sm:$0xf] %vm356_vm0, %v4452_v4 }
  0x26   : > { %415 = vst.msk [vmem:[#allocation2 + $0xe4] sm:$0xf] %vm356_vm0, %v4452_v4  ;;  %416 = vst.msk [vmem:[#allocation2 + $0xe8] sm:$0xf] %vm356_vm0, %v4452_v4  ;;  %660 = vrot.lane.b32.xlu1 %v4287_v9, %s4451_s28  ;;  %658 = vrot.lane.b32.xlu0 %v4288_v10, %s4451_s28 }
  0x27   : > { %372 = vst.msk [vmem:[#allocation2 + $0x38] sm:$0x1] %vm359_vm1, %v4452_v4  ;;  %360 = vst.msk [vmem:[#allocation2 + $0x8] sm:$0x1] %vm359_vm1, %v4452_v4 }
  0x28   : > { %363 = vst.msk [vmem:[#allocation2 + $0x14] sm:$0x1] %vm359_vm1, %v4452_v4  ;;  %366 = vst.msk [vmem:[#allocation2 + $0x20] sm:$0x1] %vm359_vm1, %v4452_v4 }
  0x29   : > { %369 = vst.msk [vmem:[#allocation2 + $0x2c] sm:$0x1] %vm359_vm1, %v4452_v4  ;;  %375 = vst.msk [vmem:[#allocation2 + $0x44] sm:$0x1] %vm359_vm1, %v4452_v4 }
  0x2a   : > { %378 = vst.msk [vmem:[#allocation2 + $0x50] sm:$0x1] %vm359_vm1, %v4452_v4  ;;  %381 = vst.msk [vmem:[#allocation2 + $0x5c] sm:$0x1] %vm359_vm1, %v4452_v4  ;;  %664 = vrot.lane.b32.xlu1 %v4289_v11, %s4451_s28  ;;  %662 = vrot.lane.b32.xlu0 %v4290_v12, %s4451_s28 }
  0x2b   : > { %384 = vst.msk [vmem:[#allocation2 + $0x68] sm:$0x1] %vm359_vm1, %v4452_v4  ;;  %387 = vst.msk [vmem:[#allocation2 + $0x74] sm:$0x1] %vm359_vm1, %v4452_v4 }
  0x2c   : > { %390 = vst.msk [vmem:[#allocation2 + $0x80] sm:$0x1] %vm359_vm1, %v4452_v4  ;;  %393 = vst.msk [vmem:[#allocation2 + $0x8c] sm:$0x1] %vm359_vm1, %v4452_v4 }
  0x2d   : > { %396 = vst.msk [vmem:[#allocation2 + $0x98] sm:$0x1] %vm359_vm1, %v4452_v4  ;;  %399 = vst.msk [vmem:[#allocation2 + $0xa4] sm:$0x1] %vm359_vm1, %v4452_v4 }
  0x2e   : > { %402 = vst.msk [vmem:[#allocation2 + $0xb0] sm:$0x1] %vm359_vm1, %v4452_v4  ;;  %405 = vst.msk [vmem:[#allocation2 + $0xbc] sm:$0x1] %vm359_vm1, %v4452_v4  ;;  %668 = vrot.lane.b32.xlu1 %v4291_v13, %s4451_s28  ;;  %666 = vrot.lane.b32.xlu0 %v4292_v14, %s4451_s28  ;;  %v1150_v47 = vld [vmem:[#allocation2 + $0x38] sm:$0x1] }
  0x2f   : > { %408 = vst.msk [vmem:[#allocation2 + $0xc8] sm:$0x1] %vm359_vm1, %v4452_v4  ;;  %411 = vst.msk [vmem:[#allocation2 + $0xd4] sm:$0x1] %vm359_vm1, %v4452_v4  ;;  %v1136_v57 = vld [vmem:[#allocation2 + $0x20] sm:$0x1] }
  0x30   : > { %414 = vst.msk [vmem:[#allocation2 + $0xe0] sm:$0x1] %vm359_vm1, %v4452_v4  ;;  %417 = vst.msk [vmem:[#allocation2 + $0xec] sm:$0x1] %vm359_vm1, %v4452_v4 }
  0x31   : > { %vm4669_vm6 = vmor %vm803_vm3, %vm804_vm4 }
  0x32   : > { %672 = vrot.lane.b32.xlu1 %v4293_v15, %s4451_s28  ;;  %670 = vrot.lane.b32.xlu0 %v4294_v16, %s4451_s28  ;;  %vm4675_vm7 = vmand %vm356_vm0, %vm1128_vm5  ;;  %v1153_v16 = vld [vmem:[#allocation2 + $0x3c] sm:$0xf] }
  0x33   : > { %vm4683_vm8 = vmand %vm359_vm1, %vm803_vm3 }
  0x88   : > { %v647_v19 = vpop.permute.xlu1 %646  ;;  %v643_v21 = vpop.permute.xlu0 %642 }
  0x89   : > { %v683_v20 = vsel %vm674_vm2, %v4295_v17, %v647_v19  ;;  %v677_v24 = vsel %vm674_vm2, %v4296_v18, %v643_v21 }
  0x8a   : > { %v3941_v22 = vcombine.low %v683_v20, %v683_v20  ;;  %v3942_v23 = vcombine.high %v683_v20, %v683_v20  ;;  %v3937_v27 = vcombine.low %v677_v24, %v677_v24  ;;  %v3938_v28 = vcombine.high %v677_v24, %v677_v24 }
  0x8c   : > { %v841_v29 = vshrl.u32 %v3941_v22, 16  ;;  %v844_v30 = vshll.u32 %v3941_v22, 16  ;;  %v849_v31 = vshrl.u32 %v3942_v23, 16  ;;  %v852_v32 = vshll.u32 %v3942_v23, 16  ;;  %v649_v33 = vpop.permute.xlu1 %648  ;;  %v645_v39 = vpop.permute.xlu0 %644 }
  0x8d   : > { %v807_v35 = vshrl.u32 %v3937_v27, 16  ;;  %v810_v36 = vshll.u32 %v3937_v27, 16  ;;  %v815_v37 = vshrl.u32 %v3938_v28, 16  ;;  %v818_v38 = vshll.u32 %v3938_v28, 16 }
  0x8e   : > { %v843_v40 = vrot.slane %v841_v29, 7  ;;  %v851_v41 = vrot.slane %v849_v31, 7  ;;  %v686_v43 = vsel %vm674_vm2, %v4297_v25, %v649_v33  ;;  %v680_v44 = vsel %vm674_vm2, %v4298_v26, %v645_v39  ;;  %v1157_v25 = vld [vmem:[#allocation2 + $0x44] sm:$0x1] }
  0x8f   : > { %v809_v48 = vrot.slane %v807_v35, 7  ;;  %v817_v49 = vrot.slane %v815_v37, 7  ;;  %v3943_v50 = vcombine.low %v686_v43, %v686_v43  ;;  %v3944_v51 = vcombine.high %v686_v43, %v686_v43 }
  0x90   : > { %v846_v52 = vor.u32 %v844_v30, %v843_v40  ;;  %v847_v53 = vrot.slane %v843_v40, 4  ;;  %v854_v54 = vor.u32 %v852_v32, %v851_v41  ;;  %v856_v55 = vrot.slane %v851_v41, 4  ;;  %v653_v58 = vpop.permute.xlu1 %652  ;;  %v651_v6 = vpop.permute.xlu0 %650 }
  0x91   : > { %v812_v59 = vor.u32 %v810_v36, %v809_v48  ;;  %v813_v60 = vrot.slane %v809_v48, 4  ;;  %v820_v61 = vor.u32 %v818_v38, %v817_v49  ;;  %v822_v62 = vrot.slane %v817_v49, 4  ;;  %v1139_v36 = vld [vmem:[#allocation2 + $0x24] sm:$0xf] }
  0x92   : > { %v855_v2 = vsel %vm4669_vm6, %v847_v53, %v854_v54  ;;  %v1147_v3 = vsel %vm4675_vm7, %v846_v52, %v1146_v46  ;;  %v1151_v4 = vsel %vm4683_vm8, %v856_v55, %v1150_v47  ;;  %v858_v5 = vshrl.u32 %v3943_v50, 16  ;;  %v1143_v46 = vld [vmem:[#allocation2 + $0x2c] sm:$0x1]  ;;  %v1167_v54 = vld [vmem:[#allocation2 + $0x54] sm:$0xf] }
  0x93   : > { %1148 = vst [vmem:[#allocation2 + $0x30] sm:$0xf] %v1147_v3  ;;  %1149 = vst.msk [vmem:[#allocation2 + $0x34] sm:$0xf] %vm356_vm0, %v855_v2  ;;  %v821_v7 = vsel %vm4669_vm6, %v813_v60, %v820_v61  ;;  %v1131_v8 = vsel %vm4675_vm7, %v812_v59, %v1130_v56  ;;  %v1137_v9 = vsel %vm4683_vm8, %v822_v62, %v1136_v57  ;;  %v861_v10 = vshll.u32 %v3943_v50, 16 }
  0x94   : > { %1152 = vst [vmem:[#allocation2 + $0x38] sm:$0x1] %v1151_v4  ;;  %1132 = vst [vmem:[#allocation2 + $0x18] sm:$0xf] %v1131_v8  ;;  %v860_v11 = vrot.slane %v858_v5, 7  ;;  %v866_v12 = vshrl.u32 %v3944_v51, 16  ;;  %v3939_v14 = vcombine.low %v680_v44, %v680_v44  ;;  %v657_v15 = vpop.permute.xlu1 %656  ;;  %v3940_v17 = vcombine.high %v680_v44, %v680_v44 }
  0x95   : > { %1133 = vst.msk [vmem:[#allocation2 + $0x1c] sm:$0xf] %vm356_vm0, %v821_v7  ;;  %1138 = vst [vmem:[#allocation2 + $0x20] sm:$0x1] %v1137_v9  ;;  %v869_v13 = vshll.u32 %v3944_v51, 16  ;;  %v692_v18 = vsel %vm674_vm2, %v4299_v63, %v653_v58  ;;  %v689_v19 = vsel %vm674_vm2, %v4300_v0, %v651_v6  ;;  %v698_v20 = vsel %vm674_vm2, %v4301_v1, %v657_v15  ;;  %v655_v51 = vpop.permute.xlu0 %654 }
  0x96   : > { %v863_v21 = vor.u32 %v861_v10, %v860_v11  ;;  %v864_v22 = vrot.slane %v860_v11, 4  ;;  %v868_v23 = vrot.slane %v866_v12, 7  ;;  %v824_v24 = vshrl.u32 %v3939_v14, 16  ;;  %v1171_v2 = vld [vmem:[#allocation2 + $0x5c] sm:$0x1]  ;;  %v4302_v10 = vld [vmem:[%s4551_s18 + $0x30] sm:$0xff]  }
  0x97   : > { %v827_v26 = vshll.u32 %v3939_v14, 16  ;;  %v832_v27 = vshrl.u32 %v3940_v17, 16  ;;  %v835_v28 = vshll.u32 %v3940_v17, 16  ;;  %v3947_v29 = vcombine.low %v692_v18, %v692_v18  ;;  %v4303_v11 = vld [vmem:[%s4551_s18 + $0x48] sm:$0xff]   ;;  %v4304_v12 = vld [vmem:[%s4551_s18 + $0x40] sm:$0xff]  }
  0x98   : > { %v871_v30 = vor.u32 %v869_v13, %v868_v23  ;;  %v873_v31 = vrot.slane %v868_v23, 4  ;;  %v1154_v32 = vsel %vm4675_vm7, %v863_v21, %v1153_v16  ;;  %v826_v33 = vrot.slane %v824_v24, 7  ;;  %v1160_v13 = vld [vmem:[#allocation2 + $0x48] sm:$0xf]  ;;  %v1164_v24 = vld [vmem:[#allocation2 + $0x50] sm:$0x1] }
  0x99   : > { %1155 = vst [vmem:[#allocation2 + $0x3c] sm:$0xf] %v1154_v32  ;;  %v834_v35 = vrot.slane %v832_v27, 7  ;;  %v3948_v37 = vcombine.high %v692_v18, %v692_v18  ;;  %v892_v38 = vshrl.u32 %v3947_v29, 16  ;;  %v895_v39 = vshll.u32 %v3947_v29, 16  ;;  %v661_v18 = vpop.permute.xlu1 %660 }
  0x9a   : > { %v872_v40 = vsel %vm4669_vm6, %v864_v22, %v871_v30  ;;  %v1158_v41 = vsel %vm4683_vm8, %v873_v31, %v1157_v25  ;;  %v829_v43 = vor.u32 %v827_v26, %v826_v33  ;;  %v830_v44 = vrot.slane %v826_v33, 4  ;;  %v1181_v30 = vld [vmem:[#allocation2 + $0x6c] sm:$0xf] }
  0x9b   : > { %1156 = vst.msk [vmem:[#allocation2 + $0x40] sm:$0xf] %vm356_vm0, %v872_v40  ;;  %1159 = vst [vmem:[#allocation2 + $0x44] sm:$0x1] %v1158_v41  ;;  %v837_v47 = vor.u32 %v835_v28, %v834_v35  ;;  %v839_v48 = vrot.slane %v834_v35, 4  ;;  %v894_v49 = vrot.slane %v892_v38, 7  ;;  %v3945_v55 = vcombine.low %v689_v19, %v689_v19 }
  0x9c   : > { %v900_v50 = vshrl.u32 %v3948_v37, 16  ;;  %v1140_v52 = vsel %vm4675_vm7, %v829_v43, %v1139_v36  ;;  %v903_v53 = vshll.u32 %v3948_v37, 16  ;;  %v3946_v56 = vcombine.high %v689_v19, %v689_v19  ;;  %v659_v19 = vpop.permute.xlu0 %658 }
  0x9d   : > { %v838_v57 = vsel %vm4669_vm6, %v830_v44, %v837_v47  ;;  %1141 = vst [vmem:[#allocation2 + $0x24] sm:$0xf] %v1140_v52  ;;  %v1144_v58 = vsel %vm4683_vm8, %v839_v48, %v1143_v46  ;;  %v897_v59 = vor.u32 %v895_v39, %v894_v49  ;;  %v898_v60 = vrot.slane %v894_v49, 4  ;;  %v1185_v39 = vld [vmem:[#allocation2 + $0x74] sm:$0x1] }
  0x9e   : > { %1142 = vst.msk [vmem:[#allocation2 + $0x28] sm:$0xf] %vm356_vm0, %v838_v57  ;;  %1145 = vst [vmem:[#allocation2 + $0x2c] sm:$0x1] %v1144_v58  ;;  %v902_v61 = vrot.slane %v900_v50, 7  ;;  %v875_v62 = vshrl.u32 %v3945_v55, 16  ;;  %v3951_v4 = vcombine.low %v698_v20, %v698_v20  ;;  %v3952_v5 = vcombine.high %v698_v20, %v698_v20 }
  0x9f   : > { %v878_v63 = vshll.u32 %v3945_v55, 16  ;;  %v883_v0 = vshrl.u32 %v3946_v56, 16  ;;  %v1168_v1 = vsel %vm4675_vm7, %v897_v59, %v1167_v54  ;;  %v886_v3 = vshll.u32 %v3946_v56, 16  ;;  %v1174_v59 = vld [vmem:[#allocation2 + $0x60] sm:$0xf] }
  0xa0   : > { %v905_v6 = vor.u32 %v903_v53, %v902_v61  ;;  %v907_v7 = vrot.slane %v902_v61, 4  ;;  %1169 = vst [vmem:[#allocation2 + $0x54] sm:$0xf] %v1168_v1  ;;  %v877_v8 = vrot.slane %v875_v62, 7  ;;  %v926_v14 = vshrl.u32 %v3951_v4, 16 }
  0xa1   : > { %v885_v9 = vrot.slane %v883_v0, 7  ;;  %v929_v15 = vshll.u32 %v3951_v4, 16  ;;  %v934_v16 = vshrl.u32 %v3952_v5, 16  ;;  %v937_v17 = vshll.u32 %v3952_v5, 16  ;;  %v1178_v1 = vld [vmem:[#allocation2 + $0x68] sm:$0x1] }
  0xa2   : > { %v906_v21 = vsel %vm4669_vm6, %v898_v60, %v905_v6  ;;  %v1172_v20 = vsel %vm4683_vm8, %v907_v7, %v1171_v2  ;;  %v880_v22 = vor.u32 %v878_v63, %v877_v8  ;;  %v881_v23 = vrot.slane %v877_v8, 4  ;;  %v665_v63 = vpop.permute.xlu1 %664  ;;  %v1195_v8 = vld [vmem:[#allocation2 + $0x84] sm:$0xf] }
  0xa3   : > { %1170 = vst.msk [vmem:[#allocation2 + $0x58] sm:$0xf] %vm356_vm0, %v906_v21  ;;  %1173 = vst [vmem:[#allocation2 + $0x5c] sm:$0x1] %v1172_v20  ;;  %v888_v25 = vor.u32 %v886_v3, %v885_v9  ;;  %v890_v26 = vrot.slane %v885_v9, 4  ;;  %v928_v27 = vrot.slane %v926_v14, 7  ;;  %v695_v31 = vsel %vm674_vm2, %v4302_v10, %v655_v51  ;;  %v663_v20 = vpop.permute.xlu0 %662 }
  0xa4   : > { %v936_v28 = vrot.slane %v934_v16, 7  ;;  %v1161_v29 = vsel %vm4675_vm7, %v880_v22, %v1160_v13  ;;  %v704_v32 = vsel %vm674_vm2, %v4303_v11, %v661_v18  ;;  %v701_v33 = vsel %vm674_vm2, %v4304_v12, %v659_v19  ;;  %v1199_v14 = vld [vmem:[#allocation2 + $0x8c] sm:$0x1]  ;;  %v4306_v16 = vld [vmem:[%s4551_s18 + $0x50] sm:$0xff]  }
  0xa5   : > { %v889_v35 = vsel %vm4669_vm6, %v881_v23, %v888_v25  ;;  %1162 = vst [vmem:[#allocation2 + $0x48] sm:$0xf] %v1161_v29  ;;  %v1165_v36 = vsel %vm4683_vm8, %v890_v26, %v1164_v24  ;;  %v931_v37 = vor.u32 %v929_v15, %v928_v27  ;;  %v932_v38 = vrot.slane %v928_v27, 4  ;;  %v4305_v15 = vld [vmem:[%s4551_s18 + $0x58] sm:$0xff]   ;;  %v4307_v27 = vld [vmem:[%s4551_s18 + $0x68] sm:$0xff]  }
  0xa6   : > { %1163 = vst.msk [vmem:[#allocation2 + $0x4c] sm:$0xf] %vm356_vm0, %v889_v35  ;;  %1166 = vst [vmem:[#allocation2 + $0x50] sm:$0x1] %v1165_v36  ;;  %v939_v40 = vor.u32 %v937_v17, %v936_v28  ;;  %v941_v41 = vrot.slane %v936_v28, 4  ;;  %v3949_v43 = vcombine.low %v695_v31, %v695_v31  ;;  %v3950_v44 = vcombine.high %v695_v31, %v695_v31 }
  0xa7   : > { %v1182_v46 = vsel %vm4675_vm7, %v931_v37, %v1181_v30  ;;  %v3955_v47 = vcombine.low %v704_v32, %v704_v32  ;;  %v3956_v48 = vcombine.high %v704_v32, %v704_v32  ;;  %v3953_v49 = vcombine.low %v701_v33, %v701_v33  ;;  %v1188_v26 = vld [vmem:[#allocation2 + $0x78] sm:$0xf]  ;;  %v1192_v32 = vld [vmem:[#allocation2 + $0x80] sm:$0x1] }
  0xa8   : > { %v940_v50 = vsel %vm4669_vm6, %v932_v38, %v939_v40  ;;  %1183 = vst [vmem:[#allocation2 + $0x6c] sm:$0xf] %v1182_v46  ;;  %v1186_v51 = vsel %vm4683_vm8, %v941_v41, %v1185_v39  ;;  %v909_v52 = vshrl.u32 %v3949_v43, 16  ;;  %v912_v53 = vshll.u32 %v3949_v43, 16 }
  0xa9   : > { %1184 = vst.msk [vmem:[#allocation2 + $0x70] sm:$0xf] %vm356_vm0, %v940_v50  ;;  %1187 = vst [vmem:[#allocation2 + $0x74] sm:$0x1] %v1186_v51  ;;  %v917_v54 = vshrl.u32 %v3950_v44, 16  ;;  %v920_v55 = vshll.u32 %v3950_v44, 16  ;;  %v3954_v62 = vcombine.high %v701_v33, %v701_v33  ;;  %v669_v33 = vpop.permute.xlu1 %668  ;;  %v710_v37 = vsel %vm674_vm2, %v4305_v15, %v665_v63 }
  0xaa   : > { %v960_v56 = vshrl.u32 %v3955_v47, 16  ;;  %v963_v57 = vshll.u32 %v3955_v47, 16  ;;  %v911_v58 = vrot.slane %v909_v52, 7  ;;  %v968_v60 = vshrl.u32 %v3956_v48, 16  ;;  %v1209_v63 = vld [vmem:[#allocation2 + $0x9c] sm:$0xf] }
  0xab   : > { %v971_v61 = vshll.u32 %v3956_v48, 16  ;;  %v919_v0 = vrot.slane %v917_v54, 7  ;;  %v943_v3 = vshrl.u32 %v3953_v49, 16  ;;  %v946_v4 = vshll.u32 %v3953_v49, 16  ;;  %v4308_v49 = vld [vmem:[%s4551_s18 + $0x60] sm:$0xff]   ;;  %v667_v54 = vpop.permute.xlu0 %666  ;;  %v4309_v15 = vld [vmem:[%s4551_s18 + $0x78] sm:$0xff]  }
  0xac   : > { %v962_v2 = vrot.slane %v960_v56, 7  ;;  %v914_v5 = vor.u32 %v912_v53, %v911_v58  ;;  %v915_v6 = vrot.slane %v911_v58, 4  ;;  %v970_v7 = vrot.slane %v968_v60, 7 }
  0xad   : > { %v951_v9 = vshrl.u32 %v3954_v62, 16  ;;  %v922_v10 = vor.u32 %v920_v55, %v919_v0  ;;  %v924_v11 = vrot.slane %v919_v0, 4  ;;  %v945_v21 = vrot.slane %v943_v3, 7  ;;  %v1213_v0 = vld [vmem:[#allocation2 + $0xa4] sm:$0x1] }
  0xae   : > { %v965_v12 = vor.u32 %v963_v57, %v962_v2  ;;  %v966_v13 = vrot.slane %v962_v2, 4  ;;  %v1175_v17 = vsel %vm4675_vm7, %v914_v5, %v1174_v59  ;;  %v973_v18 = vor.u32 %v971_v61, %v970_v7 }
  0xaf   : > { %v975_v19 = vrot.slane %v970_v7, 4  ;;  %v923_v22 = vsel %vm4669_vm6, %v915_v6, %v922_v10  ;;  %1176 = vst [vmem:[#allocation2 + $0x60] sm:$0xf] %v1175_v17  ;;  %v1179_v23 = vsel %vm4683_vm8, %v924_v11, %v1178_v1  ;;  %v953_v25 = vrot.slane %v951_v9, 7  ;;  %v1202_v9 = vld [vmem:[#allocation2 + $0x90] sm:$0xf] }
  0xb0   : > { %v1196_v24 = vsel %vm4675_vm7, %v965_v12, %v1195_v8  ;;  %1177 = vst.msk [vmem:[#allocation2 + $0x64] sm:$0xf] %vm356_vm0, %v923_v22  ;;  %1180 = vst [vmem:[#allocation2 + $0x68] sm:$0x1] %v1179_v23  ;;  %v974_v28 = vsel %vm4669_vm6, %v966_v13, %v973_v18  ;;  %v948_v30 = vor.u32 %v946_v4, %v945_v21  ;;  %v949_v31 = vrot.slane %v945_v21, 4  ;;  %v671_v22 = vpop.permute.xlu0 %670 }
  0xb1   : > { %1197 = vst [vmem:[#allocation2 + $0x84] sm:$0xf] %v1196_v24  ;;  %v1200_v29 = vsel %vm4683_vm8, %v975_v19, %v1199_v14  ;;  %1198 = vst.msk [vmem:[#allocation2 + $0x88] sm:$0xf] %vm356_vm0, %v974_v28  ;;  %v954_v35 = vshll.u32 %v3954_v62, 16  ;;  %v958_v36 = vrot.slane %v953_v25, 4  ;;  %v707_v38 = vsel %vm674_vm2, %v4306_v16, %v663_v20  ;;  %v673_v20 = vpop.permute.xlu1 %672 }
  0xb2   : > { %1201 = vst [vmem:[#allocation2 + $0x8c] sm:$0x1] %v1200_v29  ;;  %v1189_v39 = vsel %vm4675_vm7, %v948_v30, %v1188_v26  ;;  %v3959_v40 = vcombine.low %v710_v37, %v710_v37  ;;  %v3960_v41 = vcombine.high %v710_v37, %v710_v37  ;;  %v3957_v43 = vcombine.low %v707_v38, %v707_v38  ;;  %v1206_v10 = vld [vmem:[#allocation2 + $0x98] sm:$0x1]  ;;  %v4310_v16 = vld [vmem:[%s4551_s18 + $0x70] sm:$0xff]  }
  0xb3   : > { %v956_v44 = vor.u32 %v954_v35, %v953_v25  ;;  %1190 = vst [vmem:[#allocation2 + $0x78] sm:$0xf] %v1189_v39  ;;  %v1193_v46 = vsel %vm4683_vm8, %v958_v36, %v1192_v32  ;;  %v3958_v47 = vcombine.high %v707_v38, %v707_v38  ;;  %v716_v48 = vsel %vm674_vm2, %v4307_v27, %v669_v33 }
  0xb4   : > { %1194 = vst [vmem:[#allocation2 + $0x80] sm:$0x1] %v1193_v46  ;;  %v994_v50 = vshrl.u32 %v3959_v40, 16  ;;  %v997_v51 = vshll.u32 %v3959_v40, 16  ;;  %v1002_v52 = vshrl.u32 %v3960_v41, 16  ;;  %v1005_v53 = vshll.u32 %v3960_v41, 16 }
  0xb5   : > { %v957_v55 = vsel %vm4669_vm6, %v949_v31, %v956_v44  ;;  %v977_v56 = vshrl.u32 %v3957_v43, 16  ;;  %v980_v57 = vshll.u32 %v3957_v43, 16  ;;  %v985_v58 = vshrl.u32 %v3958_v47, 16  ;;  %v1223_v31 = vld [vmem:[#allocation2 + $0xb4] sm:$0xf] }
  0xb6   : > { %1191 = vst.msk [vmem:[#allocation2 + $0x7c] sm:$0xf] %vm356_vm0, %v957_v55  ;;  %v996_v59 = vrot.slane %v994_v50, 7  ;;  %v1004_v60 = vrot.slane %v1002_v52, 7  ;;  %v988_v61 = vshll.u32 %v3958_v47, 16  ;;  %v3963_v62 = vcombine.low %v716_v48, %v716_v48 }
  0xb7   : > { %v979_v1 = vrot.slane %v977_v56, 7  ;;  %v987_v2 = vrot.slane %v985_v58, 7  ;;  %v3964_v3 = vcombine.high %v716_v48, %v716_v48  ;;  %v713_v4 = vsel %vm674_vm2, %v4308_v49, %v667_v54  ;;  %v1227_v40 = vld [vmem:[#allocation2 + $0xbc] sm:$0x1]  ;;  %v1216_v52 = vld [vmem:[#allocation2 + $0xa8] sm:$0xf] }
  0xb8   : > { %v999_v5 = vor.u32 %v997_v51, %v996_v59  ;;  %v1000_v6 = vrot.slane %v996_v59, 4  ;;  %v1007_v7 = vor.u32 %v1005_v53, %v1004_v60  ;;  %v1009_v8 = vrot.slane %v1004_v60, 4  ;;  %v1220_v60 = vld [vmem:[#allocation2 + $0xb0] sm:$0x1] }
  0xb9   : > { %v982_v11 = vor.u32 %v980_v57, %v979_v1  ;;  %v983_v12 = vrot.slane %v979_v1, 4  ;;  %v990_v13 = vor.u32 %v988_v61, %v987_v2  ;;  %v992_v14 = vrot.slane %v987_v2, 4  ;;  %v1237_v2 = vld [vmem:[#allocation2 + $0xcc] sm:$0xf] }
  0xba   : > { %v1008_v17 = vsel %vm4669_vm6, %v1000_v6, %v1007_v7  ;;  %v1210_v18 = vsel %vm4675_vm7, %v999_v5, %v1209_v63  ;;  %v1214_v19 = vsel %vm4683_vm8, %v1009_v8, %v1213_v0  ;;  %v1028_v21 = vshrl.u32 %v3963_v62, 16 }
  0xbb   : > { %1211 = vst [vmem:[#allocation2 + $0x9c] sm:$0xf] %v1210_v18  ;;  %1212 = vst.msk [vmem:[#allocation2 + $0xa0] sm:$0xf] %vm356_vm0, %v1008_v17  ;;  %v991_v23 = vsel %vm4669_vm6, %v983_v12, %v990_v13  ;;  %v1203_v24 = vsel %vm4675_vm7, %v982_v11, %v1202_v9  ;;  %v1207_v25 = vsel %vm4683_vm8, %v992_v14, %v1206_v10  ;;  %v1031_v27 = vshll.u32 %v3963_v62, 16 }
  0xbc   : > { %1215 = vst [vmem:[#allocation2 + $0xa4] sm:$0x1] %v1214_v19  ;;  %1204 = vst [vmem:[#allocation2 + $0x90] sm:$0xf] %v1203_v24  ;;  %v1030_v26 = vrot.slane %v1028_v21, 7  ;;  %v1036_v28 = vshrl.u32 %v3964_v3, 16  ;;  %v3961_v29 = vcombine.low %v713_v4, %v713_v4  ;;  %v3962_v32 = vcombine.high %v713_v4, %v713_v4 }
  0xbd   : > { %1205 = vst.msk [vmem:[#allocation2 + $0x94] sm:$0xf] %vm356_vm0, %v991_v23  ;;  %1208 = vst [vmem:[#allocation2 + $0x98] sm:$0x1] %v1207_v25  ;;  %v1039_v30 = vshll.u32 %v3964_v3, 16  ;;  %v722_v33 = vsel %vm674_vm2, %v4309_v15, %v673_v20  ;;  %v719_v35 = vsel %vm674_vm2, %v4310_v16, %v671_v22 }
  0xbe   : > { %v1033_v36 = vor.u32 %v1031_v27, %v1030_v26  ;;  %v1034_v37 = vrot.slane %v1030_v26, 4  ;;  %v1038_v38 = vrot.slane %v1036_v28, 7  ;;  %v1011_v39 = vshrl.u32 %v3961_v29, 16  ;;  %v1241_v14 = vld [vmem:[#allocation2 + $0xd4] sm:$0x1] }
  0xbf   : > { %v1014_v41 = vshll.u32 %v3961_v29, 16  ;;  %v1019_v43 = vshrl.u32 %v3962_v32, 16  ;;  %v1022_v44 = vshll.u32 %v3962_v32, 16  ;;  %v3967_v46 = vcombine.low %v722_v33, %v722_v33  ;;  %v1230_v20 = vld [vmem:[#allocation2 + $0xc0] sm:$0xf] }
  0xc0   : > { %v1041_v47 = vor.u32 %v1039_v30, %v1038_v38  ;;  %v1043_v48 = vrot.slane %v1038_v38, 4  ;;  %v1224_v49 = vsel %vm4675_vm7, %v1033_v36, %v1223_v31  ;;  %v1013_v50 = vrot.slane %v1011_v39, 7  ;;  %v1234_v26 = vld [vmem:[#allocation2 + $0xc8] sm:$0x1] }
  0xc1   : > { %1225 = vst [vmem:[#allocation2 + $0xb4] sm:$0xf] %v1224_v49  ;;  %v1021_v51 = vrot.slane %v1019_v43, 7  ;;  %v3968_v53 = vcombine.high %v722_v33, %v722_v33  ;;  %v1062_v54 = vshrl.u32 %v3967_v46, 16  ;;  %v1065_v55 = vshll.u32 %v3967_v46, 16 }
  0xc2   : > { %v1042_v56 = vsel %vm4669_vm6, %v1034_v37, %v1041_v47  ;;  %v1228_v57 = vsel %vm4683_vm8, %v1043_v48, %v1227_v40  ;;  %v1016_v58 = vor.u32 %v1014_v41, %v1013_v50  ;;  %v1017_v59 = vrot.slane %v1013_v50, 4 }
  0xc3   : > { %1226 = vst.msk [vmem:[#allocation2 + $0xb8] sm:$0xf] %vm356_vm0, %v1042_v56  ;;  %1229 = vst [vmem:[#allocation2 + $0xbc] sm:$0x1] %v1228_v57  ;;  %v1024_v61 = vor.u32 %v1022_v44, %v1021_v51  ;;  %v1026_v62 = vrot.slane %v1021_v51, 4  ;;  %v1064_v63 = vrot.slane %v1062_v54, 7  ;;  %v3965_v3 = vcombine.low %v719_v35, %v719_v35 }
  0xc4   : > { %v1070_v0 = vshrl.u32 %v3968_v53, 16  ;;  %v1217_v1 = vsel %vm4675_vm7, %v1016_v58, %v1216_v52  ;;  %v3966_v4 = vcombine.high %v719_v35, %v719_v35  ;;  %v1073_v8 = vshll.u32 %v3968_v53, 16 }
  0xc5   : > { %v1025_v5 = vsel %vm4669_vm6, %v1017_v59, %v1024_v61  ;;  %1218 = vst [vmem:[#allocation2 + $0xa8] sm:$0xf] %v1217_v1  ;;  %v1221_v6 = vsel %vm4683_vm8, %v1026_v62, %v1220_v60  ;;  %v1067_v7 = vor.u32 %v1065_v55, %v1064_v63  ;;  %v1068_v9 = vrot.slane %v1064_v63, 4 }
  0xc6   : > { %1219 = vst.msk [vmem:[#allocation2 + $0xac] sm:$0xf] %vm356_vm0, %v1025_v5  ;;  %1222 = vst [vmem:[#allocation2 + $0xb0] sm:$0x1] %v1221_v6  ;;  %v1072_v10 = vrot.slane %v1070_v0, 7  ;;  %v1045_v11 = vshrl.u32 %v3965_v3, 16 }
  0xc7   : > { %v1053_v12 = vshrl.u32 %v3966_v4, 16  ;;  %v1238_v13 = vsel %vm4675_vm7, %v1067_v7, %v1237_v2  ;;  %v1048_v15 = vshll.u32 %v3965_v3, 16  ;;  %v1056_v21 = vshll.u32 %v3966_v4, 16 }
  0xc8   : > { %v1075_v16 = vor.u32 %v1073_v8, %v1072_v10  ;;  %v1077_v17 = vrot.slane %v1072_v10, 4  ;;  %1239 = vst [vmem:[#allocation2 + $0xcc] sm:$0xf] %v1238_v13  ;;  %v1047_v18 = vrot.slane %v1045_v11, 7 }
  0xc9   : > { %v1055_v19 = vrot.slane %v1053_v12, 7 }
  0xca   : > { %v1076_v22 = vsel %vm4669_vm6, %v1068_v9, %v1075_v16  ;;  %v1242_v23 = vsel %vm4683_vm8, %v1077_v17, %v1241_v14  ;;  %v1050_v24 = vor.u32 %v1048_v15, %v1047_v18  ;;  %v1051_v25 = vrot.slane %v1047_v18, 4 }
  0xcb   : > { %1240 = vst.msk [vmem:[#allocation2 + $0xd0] sm:$0xf] %vm356_vm0, %v1076_v22  ;;  %1243 = vst [vmem:[#allocation2 + $0xd4] sm:$0x1] %v1242_v23  ;;  %v1058_v27 = vor.u32 %v1056_v21, %v1055_v19  ;;  %v1060_v28 = vrot.slane %v1055_v19, 4 }
  0xcc   : > { %v1231_v29 = vsel %vm4675_vm7, %v1050_v24, %v1230_v20 }
  0xcd   : > { %v1059_v30 = vsel %vm4669_vm6, %v1051_v25, %v1058_v27  ;;  %1232 = vst [vmem:[#allocation2 + $0xc0] sm:$0xf] %v1231_v29  ;;  %v1235_v31 = vsel %vm4683_vm8, %v1060_v28, %v1234_v26 }
  0xce   : > { %1233 = vst.msk [vmem:[#allocation2 + $0xc4] sm:$0xf] %vm356_vm0, %v1059_v30  ;;  %1236 = vst [vmem:[#allocation2 + $0xc8] sm:$0x1] %v1235_v31 }
  0xcf PF: > { %s4123_s13 = smul.u32 96, %s4433_s27  ;;  %vm1505_vm9 = vcmask 1046528   ;;  %s4453_s15 = smov 24   ;;  %vm1364_vm10 = vsmask.f32 7424  ;;  %v4331_v13 = vld [vmem:[%s5935_s2] sm:$0xff]  }
  0xd0   : > { %s4454_s27 = smov 16   ;;  %s4455_s16 = smov 8   ;;  %v4332_v15 = vld [vmem:[%s5935_s2 + $0x8] sm:$0xff]   ;;  %4170 = vmatprep.subr.bf16.mxu0 %v4331_v13  ;;  %v4334_v21 = vld [vmem:[%s5935_s2 + $0x10] sm:$0xff]   ;;  %v4336_v25 = vld [vmem:[%s5935_s2 + $0x18] sm:$0xff]   ;;  %vm1947_vm11 = vcmask 1043456  }
  0xd1   : > { %s4824_s14 = scalar_lea.vmem [#allocation2], %s4123_s13  ;;  %s4456_s17 = smov 32   ;;  %4171 = vmatpush3.bf16.msra.mxu0 %v4331_v13  ;;  %v4337_v26 = vld [vmem:[%s5935_s2 + $0x20] ss:$0 sps:$4 sm:$0xff]   ;;  %vm1722_vm12 = vcmask 64512   ;;  %vm1743_vm13 = vcmask 130048  }
  0xd2   : > { %s4457_s18 = smov 40   ;;  %s4458_s19 = smov 48   ;;  %4172 = vmatprep.subr.bf16.mxu0 %v4332_v15  ;;  %v1949_v30 = vsel %vm1947_vm11, %v4337_v26, 0  ;;  %vm1764_vm14 = vcmask 195584   ;;  %vm1785_vm15 = vcmask 261120   ;;  %vm1806_vm0 = vcmask 326656  }
  0xd3   : > { %s4459_s20 = smov 56   ;;  %s4460_s28 = smov 64   ;;  %vm1827_vm1 = vcmask 392192   ;;  %vm1869_vm2 = vcmask 523264   ;;  %vm1848_vm3 = vcmask 457728   ;;  %vm1926_vm4 = vcmask 588800  }
  0xd4   : > { %vm2219_vm5 = vcmask 27648   ;;  %vm2222_vm6 = vcmask 24576   ;;  %s4463_s25 = smov 20   ;;  %s4464_s26 = smov 4  }
  0xd5   : > { %v4827_v42 = vld [vmem:[%s4824_s14 + $0x18] sm:$0xff]   ;;  %v4830_v34 = vld [vmem:[%s4824_s14 + $0xc] sm:$0xff]   ;;  %v4837_v45 = vld [vmem:[%s4824_s14] sm:$0xff]   ;;  %4173 = vmatpush3.bf16.msra.mxu0 %v4332_v15  ;;  %s4465_s23 = smov 28  }
  0xd6   : > { %1563 = vrot.lane.b32.xlu1 %v4827_v42, %s4453_s15  ;;  %1561 = vrot.lane.b32.xlu0 %v4830_v34, %s4453_s15  ;;  %v4314_v32 = vld [vmem:[%s4824_s14 + $0x8] ss:$0 sps:$4 sm:$0x11]   ;;  %v4315_v33 = vld [vmem:[%s4824_s14 + $0x14] ss:$0 sps:$4 sm:$0x11]  }
  0xd7   : > { %v1509_v35 = vrot.slane %v4830_v34, 1  ;;  %v1378_v36 = vshrl.u32 %v4830_v34, 16  ;;  %v1380_v37 = vshll.u32 %v4830_v34, 16  ;;  %v1506_v38 = vrot.slane %v4837_v45, 1  ;;  %v4854_v60 = vld [vmem:[%s4824_s14 + $0x24] sm:$0xff]   ;;  %v4881_v14 = vld [vmem:[%s4824_s14 + $0x30] sm:$0xff]   ;;  %4174 = vmatprep.subr.bf16.mxu0 %v4334_v21 }
  0xd8   : > { %v1507_v39 = vrot.slane %v4314_v32, 1  ;;  %v1366_v40 = vshrl.u32 %v4837_v45, 16  ;;  %v1368_v41 = vshll.u32 %v4837_v45, 16  ;;  %v1373_v43 = vshll.u32 %v4314_v32, 16  ;;  %v4907_v29 = vld [vmem:[%s4824_s14 + $0x3c] sm:$0xff]  }
  0xd9   : > { %v1510_v44 = vrot.slane %v4315_v33, 1  ;;  %v1382_v46 = vrot.slane %v1380_v37, 1  ;;  %v1385_v47 = vshll.u32 %v4315_v33, 16  ;;  %v4316_v50 = vld [vmem:[%s4824_s14 + $0x20] ss:$0 sps:$4 sm:$0x11]   ;;  %4175 = vmatpush3.bf16.msra.mxu0 %v4334_v21 }
  0xda   : > { %v1508_v48 = vsel %vm1505_vm9, %v1506_v38, %v1507_v39  ;;  %v1370_v49 = vrot.slane %v1368_v41, 1  ;;  %v1390_v51 = vshrl.u32 %v4827_v42, 16  ;;  %v1392_v52 = vshll.u32 %v4827_v42, 16  ;;  %v4318_v4 = vld [vmem:[%s4824_s14 + $0x2c] ss:$0 sps:$4 sm:$0x11]   ;;  %4176 = vmatprep.subr.bf16.mxu0 %v4336_v25 }
  0xdb   : > { %1536 = vrot.lane.b32.xlu1 %v1508_v48, %s4454_s27  ;;  %v1375_v53 = vrot.slane %v1373_v43, 1  ;;  %v1511_v54 = vsel %vm1505_vm9, %v1509_v35, %v1510_v44  ;;  %v1383_v55 = vor.u32 %v1382_v46, %v1378_v36  ;;  %v1387_v57 = vrot.slane %v1385_v47, 1  ;;  %v4320_v16 = vld [vmem:[%s4824_s14 + $0x38] ss:$0 sps:$4 sm:$0x11]   ;;  %v4931_v46 = vld [vmem:[%s4824_s14 + $0x48] sm:$0xff]  }
  0xdc   : > { %v1371_v56 = vor.u32 %v1370_v49, %v1366_v40  ;;  %v1394_v58 = vrot.slane %v1392_v52, 1  ;;  %v1397_v59 = vshll.u32 %v4316_v50, 16  ;;  %v1512_v0 = vrot.slane %v4827_v42, 1  ;;  %v4322_v35 = vld [vmem:[%s4824_s14 + $0x44] ss:$0 sps:$4 sm:$0x11]  }
  0xdd   : > { %v1513_v1 = vrot.slane %v4316_v50, 1  ;;  %v1388_v2 = vsel %vm1364_vm10, %v1383_v55, %v1387_v57  ;;  %v1404_v5 = vshll.u32 %v4854_v60, 16  ;;  %v1402_v7 = vshrl.u32 %v4854_v60, 16  ;;  %4177 = vmatpush3.bf16.msra.mxu0 %v4336_v25  ;;  %v4324_v49 = vld [vmem:[%s4824_s14 + $0x50] ss:$0 sps:$4 sm:$0x11]  }
  0xde   : > { %v1376_v61 = vsel %vm1364_vm10, %v1371_v56, %v1375_v53  ;;  %v1395_v62 = vor.u32 %v1394_v58, %v1390_v51  ;;  %v1399_v63 = vrot.slane %v1397_v59, 1  ;;  %v1409_v9 = vshll.u32 %v4318_v4, 16  ;;  %4222 = vmatprep.subr.msk.bf16.mxu0 %vm1947_vm11, %v4337_v26  ;;  %v4945_v57 = vld [vmem:[%s4824_s14 + $0x54] sm:$0xff]  }
  0xdf   : > { %1485 = vrot.lane.b32.xlu0 %v1376_v61, %s4455_s16  ;;  %1538 = vrot.lane.b32.xlu1 %v1511_v54, %s4454_s27  ;;  %v1514_v6 = vsel %vm1505_vm9, %v1512_v0, %v1513_v1  ;;  %v1406_v8 = vrot.slane %v1404_v5, 1  ;;  %v1515_v17 = vrot.slane %v4854_v60, 1  ;;  %v1516_v18 = vrot.slane %v4318_v4, 1 }
  0xe0   : > { %v1400_v3 = vsel %vm1364_vm10, %v1395_v62, %v1399_v63  ;;  %v1411_v11 = vrot.slane %v1409_v9, 1  ;;  %v1416_v19 = vshll.u32 %v4881_v14, 16  ;;  %v1414_v22 = vshrl.u32 %v4881_v14, 16  ;;  %v4326_v62 = vld [vmem:[%s4824_s14 + $0x5c] ss:$0 sps:$4 sm:$0x11]  }
  0xe1   : > { %v1407_v10 = vor.u32 %v1406_v8, %v1402_v7  ;;  %v1517_v20 = vsel %vm1505_vm9, %v1515_v17, %v1516_v18  ;;  %v1421_v24 = vshll.u32 %v4320_v16, 16  ;;  %v1518_v32 = vrot.slane %v4881_v14, 1  ;;  %4179 = vmatpush3.bf16.msra.mxu0 %v1949_v30  ;;  %v4969_v7 = vld [vmem:[%s4824_s14 + $0x60] sm:$0xff]  }
  0xe2   : > { %v1418_v23 = vrot.slane %v1416_v19, 1  ;;  %v1519_v33 = vrot.slane %v4320_v16, 1  ;;  %v1428_v36 = vshll.u32 %v4907_v29, 16  ;;  %v1426_v38 = vshrl.u32 %v4907_v29, 16  ;;  %v4983_v19 = vld [vmem:[%s4824_s14 + $0x6c] sm:$0xff]  }
  0xe3   : > { %1487 = vrot.lane.b32.xlu0 %v1388_v2, %s4455_s16  ;;  %1598 = vrot.lane.b32.xlu1 %v1400_v3, %s4456_s17  ;;  %v1412_v12 = vsel %vm1364_vm10, %v1407_v10, %v1411_v11  ;;  %v1423_v28 = vrot.slane %v1421_v24, 1  ;;  %v1433_v40 = vshll.u32 %v4322_v35, 16  ;;  %v1521_v47 = vrot.slane %v4907_v29, 1  ;;  %v4328_v10 = vld [vmem:[%s4824_s14 + $0x68] ss:$0 sps:$4 sm:$0x11]  }
  0xe4   : > { %v1419_v27 = vor.u32 %v1418_v23, %v1414_v22  ;;  %v1520_v37 = vsel %vm1505_vm9, %v1518_v32, %v1519_v33  ;;  %v1430_v39 = vrot.slane %v1428_v36, 1  ;;  %v1522_v48 = vrot.slane %v4322_v35, 1  ;;  %v4330_v23 = vld [vmem:[%s4824_s14 + $0x74] ss:$0 sps:$4 sm:$0x11]  }
  0xe5   : > { %v1435_v43 = vrot.slane %v1433_v40, 1  ;;  %v1440_v50 = vshll.u32 %v4931_v46, 16  ;;  %v1438_v52 = vshrl.u32 %v4931_v46, 16  ;;  %v1524_v59 = vrot.slane %v4931_v46, 1 }
  0xe6   : > { %v1424_v31 = vsel %vm1364_vm10, %v1419_v27, %v1423_v28  ;;  %v1431_v41 = vor.u32 %v1430_v39, %v1426_v38  ;;  %v1523_v51 = vsel %vm1505_vm9, %v1521_v47, %v1522_v48  ;;  %v1525_v61 = vrot.slane %v4324_v49, 1 }
  0xe7   : > { %1596 = vrot.lane.b32.xlu0 %v1388_v2, %s4456_s17  ;;  %1621 = vrot.lane.b32.xlu1 %v1514_v6, %s4457_s18  ;;  %v1442_v53 = vrot.slane %v1440_v50, 1  ;;  %v1452_v63 = vshll.u32 %v4945_v57, 16  ;;  %v1450_v1 = vshrl.u32 %v4945_v57, 16  ;;  %v1527_v8 = vrot.slane %v4945_v57, 1 }
  0xe8   : > { %v1436_v44 = vsel %vm1364_vm10, %v1431_v41, %v1435_v43  ;;  %v1526_v0 = vsel %vm1505_vm9, %v1524_v59, %v1525_v61  ;;  %v1528_v9 = vrot.slane %v4326_v62, 1  ;;  %v1464_v11 = vshll.u32 %v4969_v7, 16  ;;  %v4335_v43 = vld [vmem:[%s4824_s14 + $0x80] ss:$0 sps:$4 sm:$0x11]   ;;  %v5021_v61 = vld [vmem:[%s4824_s14 + $0x84] sm:$0xff]  }
  0xe9   : > { %v1443_v55 = vor.u32 %v1442_v53, %v1438_v52  ;;  %v1454_v2 = vrot.slane %v1452_v63, 1  ;;  %v1462_v13 = vshrl.u32 %v4969_v7, 16  ;;  %v1469_v16 = vshll.u32 %v4328_v10, 16 }
  0xea   : > { %v1466_v15 = vrot.slane %v1464_v11, 1  ;;  %v1531_v22 = vrot.slane %v4328_v10, 1  ;;  %v1476_v24 = vshll.u32 %v4983_v19, 16  ;;  %v1474_v26 = vshrl.u32 %v4983_v19, 16 }
  0xeb   : > { %1619 = vrot.lane.b32.xlu0 %v1511_v54, %s4457_s18  ;;  %1646 = vrot.lane.b32.xlu1 %v4854_v60, %s4458_s19  ;;  %v1445_v54 = vshll.u32 %v4324_v49, 16  ;;  %v1455_v4 = vor.u32 %v1454_v2, %v1450_v1  ;;  %v1471_v18 = vrot.slane %v1469_v16, 1  ;;  %v1481_v28 = vshll.u32 %v4330_v23, 16 }
  0xec   : > { %v1467_v17 = vor.u32 %v1466_v15, %v1462_v13  ;;  %v1478_v27 = vrot.slane %v1476_v24, 1  ;;  %v1533_v40 = vrot.slane %v4983_v19, 1  ;;  %v1534_v41 = vrot.slane %v4330_v23, 1 }
  0xed   : > { %v1447_v56 = vrot.slane %v1445_v54, 1  ;;  %v1483_v32 = vrot.slane %v1481_v28, 1  ;;  %v1592_v52 = vshll.u32 %v4335_v43, 16  ;;  %v1617_v2 = vrot.slane %v4335_v43, 1 }
  0xee   : > { %v1472_v21 = vsel %vm1364_vm10, %v1467_v17, %v1471_v18  ;;  %v1535_v49 = vsel %vm1505_vm9, %v1533_v40, %v1534_v41 }
  0xef   : > { %1644 = vrot.lane.b32.xlu0 %v4827_v42, %s4458_s19  ;;  %1681 = vrot.lane.b32.xlu1 %v1412_v12, %s4459_s20  ;;  %v1448_v58 = vsel %vm1364_vm10, %v1443_v55, %v1447_v56  ;;  %v1594_v56 = vrot.slane %v1592_v52, 1 }
  0xf3   : > { %1679 = vrot.lane.b32.xlu0 %v1400_v3, %s4459_s20  ;;  %1489 = vrot.lane.b32.xlu1 %v1400_v3, %s4455_s16  ;;  %v1457_v3 = vshll.u32 %v4326_v62, 16 }
  0xf5   : > { %v1459_v5 = vrot.slane %v1457_v3, 1 }
  0xf7   : > { %1702 = vrot.lane.b32.xlu0 %v1514_v6, %s4460_s28  ;;  %1491 = vrot.lane.b32.xlu1 %v1412_v12, %s4455_s16 }
  0xfb   : > { %1704 = vrot.lane.b32.xlu0 %v1517_v20, %s4460_s28  ;;  %1542 = vrot.lane.b32.xlu1 %v1517_v20, %s4454_s27 }
  0xff   : > { %1540 = vrot.lane.b32.xlu0 %v1514_v6, %s4454_s27  ;;  %1567 = vrot.lane.b32.xlu1 %v4881_v14, %s4453_s15  ;;  %v1460_v6 = vsel %vm1364_vm10, %v1455_v4, %v1459_v5  ;;  %v4339_v5 = vld [vmem:[%s4824_s14 + $0x8c] ss:$0 sps:$4 sm:$0x11]  }
 0x100   : > { %v1675_v16 = vshll.u32 %v4339_v5, 16 }
 0x103   : > { %1565 = vrot.lane.b32.xlu0 %v4854_v60, %s4453_s15  ;;  %1602 = vrot.lane.b32.xlu1 %v1424_v31, %s4456_s17 }
 0x107   : > { %1600 = vrot.lane.b32.xlu0 %v1412_v12, %s4456_s17  ;;  %1625 = vrot.lane.b32.xlu1 %v1520_v37, %s4457_s18  ;;  %v1529_v12 = vsel %vm1505_vm9, %v1527_v8, %v1528_v9  ;;  %v1668_v9 = vshrl.u32 %v5021_v61, 16 }
 0x10b   : > { %1623 = vrot.lane.b32.xlu0 %v1517_v20, %s4457_s18  ;;  %1650 = vrot.lane.b32.xlu1 %v4907_v29, %s4458_s19  ;;  %v1530_v20 = vrot.slane %v4969_v7, 1 }
 0x10d   : > { %v1532_v25 = vsel %vm1505_vm9, %v1530_v20, %v1531_v22 }
 0x10f   : > { %1648 = vrot.lane.b32.xlu0 %v4881_v14, %s4458_s19  ;;  %1685 = vrot.lane.b32.xlu1 %v1436_v44, %s4459_s20 }
 0x113   : > { %1683 = vrot.lane.b32.xlu0 %v1424_v31, %s4459_s20  ;;  %1493 = vrot.lane.b32.xlu1 %v1424_v31, %s4455_s16  ;;  %v1479_v31 = vor.u32 %v1478_v27, %v1474_v26  ;;  %v1677_v26 = vrot.slane %v1675_v16, 1 }
 0x115   : > { %v1484_v35 = vsel %vm1364_vm10, %v1479_v31, %v1483_v32 }
 0x117   : > { %1706 = vrot.lane.b32.xlu0 %v1520_v37, %s4460_s28  ;;  %1495 = vrot.lane.b32.xlu1 %v1436_v44, %s4455_s16 }
 0x11b   : > { %1708 = vrot.lane.b32.xlu0 %v1523_v51, %s4460_s28  ;;  %1546 = vrot.lane.b32.xlu1 %v1523_v51, %s4454_s27 }
 0x11f   : > { %1544 = vrot.lane.b32.xlu0 %v1520_v37, %s4454_s27  ;;  %1571 = vrot.lane.b32.xlu1 %v4931_v46, %s4453_s15  ;;  %v5007_v37 = vld [vmem:[%s4824_s14 + $0x78] sm:$0xff]   ;;  %s4013_s14 = sadd.s32 4294967295, %s4544_s12  ;;  %s4462_s12 = smov 12  }
 0x120   : > { %v1585_v50 = vshrl.u32 %v5007_v37, 16  ;;  %v1616_v1 = vrot.slane %v5007_v37, 1 }
 0x123   : > { %1569 = vrot.lane.b32.xlu0 %v4907_v29, %s4453_s15  ;;  %1606 = vrot.lane.b32.xlu1 %v1448_v58, %s4456_s17 }
 0x127   : > { %1604 = vrot.lane.b32.xlu0 %v1436_v44, %s4456_s17  ;;  %1629 = vrot.lane.b32.xlu1 %v1526_v0, %s4457_s18  ;;  %v1587_v44 = vshll.u32 %v5007_v37, 16 }
 0x12b   : > { %1627 = vrot.lane.b32.xlu0 %v1523_v51, %s4457_s18  ;;  %1654 = vrot.lane.b32.xlu1 %v4945_v57, %s4458_s19  ;;  %v1589_v51 = vrot.slane %v1587_v44, 1 }
 0x12d   : > { %v1590_v55 = vor.u32 %v1589_v51, %v1585_v50 }
 0x12f   : > { %1652 = vrot.lane.b32.xlu0 %v4931_v46, %s4458_s19  ;;  %1689 = vrot.lane.b32.xlu1 %v1460_v6, %s4459_s20 }
 0x133   : > { %1687 = vrot.lane.b32.xlu0 %v1448_v58, %s4459_s20  ;;  %1497 = vrot.lane.b32.xlu1 %v1448_v58, %s4455_s16 }
 0x137   : > { %1710 = vrot.lane.b32.xlu0 %v1526_v0, %s4460_s28  ;;  %1499 = vrot.lane.b32.xlu1 %v1460_v6, %s4455_s16 }
 0x13b   : > { %1712 = vrot.lane.b32.xlu0 %v1529_v12, %s4460_s28  ;;  %1550 = vrot.lane.b32.xlu1 %v1529_v12, %s4454_s27 }
 0x13f   : > { %1548 = vrot.lane.b32.xlu0 %v1526_v0, %s4454_s27  ;;  %1575 = vrot.lane.b32.xlu1 %v4969_v7, %s4453_s15  ;;  %v1595_v0 = vsel %vm1364_vm10, %v1590_v55, %v1594_v56 }
 0x143   : > { %1573 = vrot.lane.b32.xlu0 %v4945_v57, %s4453_s15  ;;  %1610 = vrot.lane.b32.xlu1 %v1472_v21, %s4456_s17 }
 0x147   : > { %1608 = vrot.lane.b32.xlu0 %v1460_v6, %s4456_s17  ;;  %1633 = vrot.lane.b32.xlu1 %v1532_v25, %s4457_s18  ;;  %v1670_v6 = vshll.u32 %v5021_v61, 16 }
 0x148   : > { %v1564_v30 = vpop.permute.xlu1 %1563  ;;  %v1562_v33 = vpop.permute.xlu0 %1561 }
 0x149   : > { %v1672_v15 = vrot.slane %v1670_v6, 1 }
 0x14b   : > { %1631 = vrot.lane.b32.xlu0 %v1529_v12, %s4457_s18  ;;  %1658 = vrot.lane.b32.xlu1 %v4983_v19, %s4458_s19 }
 0x14d   : > { %v1537_v36 = vpop.permute.xlu1 %1536 }
 0x14f   : > { %1656 = vrot.lane.b32.xlu0 %v4969_v7, %s4458_s19  ;;  %1693 = vrot.lane.b32.xlu1 %v1484_v35, %s4459_s20 }
 0x151   : > { %v1486_v38 = vpop.permute.xlu0 %1485  ;;  %v1539_v39 = vpop.permute.xlu1 %1538 }
 0x152   : > { %v1724_v62 = vsel %vm1722_vm12, %v4837_v45, %v1486_v38  ;;  %v1700_v38 = vrot.slane %v4339_v5, 1 }
 0x153   : > { %1691 = vrot.lane.b32.xlu0 %v1472_v21, %s4459_s20  ;;  %1501 = vrot.lane.b32.xlu1 %v1472_v21, %s4455_s16  ;;  %v1745_v45 = vsel %vm1743_vm13, %v1724_v62, %v1537_v36  ;;  %v1699_v36 = vrot.slane %v5021_v61, 1 }
 0x154   : > { %v1766_v11 = vsel %vm1764_vm14, %v1745_v45, %v1562_v33 }
 0x155   : > { %v1488_v47 = vpop.permute.xlu0 %1487  ;;  %v1599_v48 = vpop.permute.xlu1 %1598  ;;  %v1701_v43 = vsel %vm1505_vm9, %v1699_v36, %v1700_v38 }
 0x156   : > { %v1726_v63 = vsel %vm1722_vm12, %v4830_v34, %v1488_v47  ;;  %v1618_v34 = vsel %vm1505_vm9, %v1616_v1, %v1617_v2 }
 0x157   : > { %1714 = vrot.lane.b32.xlu0 %v1532_v25, %s4460_s28  ;;  %1503 = vrot.lane.b32.xlu1 %v1484_v35, %s4455_s16  ;;  %v1747_v8 = vsel %vm1743_vm13, %v1726_v63, %v1539_v39 }
 0x158   : > { %v1768_v10 = vsel %vm1764_vm14, %v1747_v8, %v1564_v30 }
 0x159   : > { %v1597_v53 = vpop.permute.xlu0 %1596  ;;  %v1622_v54 = vpop.permute.xlu1 %1621  ;;  %v1789_v21 = vsel %vm1785_vm15, %v1768_v10, %v1599_v48 }
 0x15a   : > { %v1787_v17 = vsel %vm1785_vm15, %v1766_v11, %v1597_v53  ;;  %v1810_v28 = vsel %vm1806_vm0, %v1789_v21, %v1622_v54 }
 0x15b   : > { %1716 = vrot.lane.b32.xlu0 %v1535_v49, %s4460_s28  ;;  %1554 = vrot.lane.b32.xlu1 %v1535_v49, %s4454_s27 }
 0x15d   : > { %v1620_v58 = vpop.permute.xlu0 %1619  ;;  %v1647_v59 = vpop.permute.xlu1 %1646 }
 0x15e   : > { %v1808_v18 = vsel %vm1806_vm0, %v1787_v17, %v1620_v58  ;;  %v1831_v30 = vsel %vm1827_vm1, %v1810_v28, %v1647_v59 }
 0x15f   : > { %1552 = vrot.lane.b32.xlu0 %v1532_v25, %s4454_s27  ;;  %1579 = vrot.lane.b32.xlu1 %v5007_v37, %s4453_s15  ;;  %v1673_v25 = vor.u32 %v1672_v15, %v1668_v9 }
 0x161   : > { %v1645_v3 = vpop.permute.xlu0 %1644  ;;  %v1682_v4 = vpop.permute.xlu1 %1681 }
 0x162   : > { %v1829_v20 = vsel %vm1827_vm1, %v1808_v18, %v1645_v3  ;;  %v1852_v31 = vsel %vm1848_vm3, %v1831_v30, %v1682_v4 }
 0x163   : > { %1577 = vrot.lane.b32.xlu0 %v4983_v19, %s4453_s15  ;;  %1614 = vrot.lane.b32.xlu1 %v1595_v0, %s4456_s17 }
 0x165   : > { %v1680_v12 = vpop.permute.xlu0 %1679  ;;  %v1490_v13 = vpop.permute.xlu1 %1489 }
 0x166   : > { %v1850_v22 = vsel %vm1848_vm3, %v1829_v20, %v1680_v12  ;;  %v1728_v53 = vsel %vm1722_vm12, %v4827_v42, %v1490_v13 }
 0x167   : > { %1612 = vrot.lane.b32.xlu0 %v1484_v35, %s4456_s17  ;;  %1637 = vrot.lane.b32.xlu1 %v1618_v34, %s4457_s18  ;;  %v1678_v35 = vsel %vm1364_vm10, %v1673_v25, %v1677_v26 }
 0x169   : > { %v1703_v23 = vpop.permute.xlu0 %1702  ;;  %v1492_v24 = vpop.permute.xlu1 %1491 }
 0x16a   : > { %v1871_v27 = vsel %vm1869_vm2, %v1850_v22, %v1703_v23  ;;  %v1730_v54 = vsel %vm1722_vm12, %v4854_v60, %v1492_v24 }
 0x16b   : > { %1635 = vrot.lane.b32.xlu0 %v1535_v49, %s4457_s18  ;;  %4180 = vmatprep.mubr.msk.bf16.mxu0 %vm1926_vm4, %v1871_v27 }
 0x16c   : > { %1662 = vrot.lane.b32.xlu1 %v5021_v61, %s4458_s19 }
 0x16d   : > { %v1705_v32 = vpop.permute.xlu0 %1704  ;;  %v1543_v33 = vpop.permute.xlu1 %1542 }
 0x16e   : > { %v1873_v39 = vsel %vm1869_vm2, %v1852_v31, %v1705_v32  ;;  %v1751_v61 = vsel %vm1743_vm13, %v1730_v54, %v1543_v33 }
 0x16f   : > { %1660 = vrot.lane.b32.xlu0 %v5007_v37, %s4458_s19  ;;  %4181 = vmatmul.mubr.msk.bf16.vlgmr.msra.gmra.mrb[0].mxu0 %vm1926_vm4, %v1873_v39 }
 0x170   : > { %1697 = vrot.lane.b32.xlu1 %v1678_v35, %s4459_s20 }
 0x171   : > { %v1541_v40 = vpop.permute.xlu0 %1540  ;;  %v1568_v41 = vpop.permute.xlu1 %1567 }
 0x172   : > { %v1749_v55 = vsel %vm1743_vm13, %v1728_v53, %v1541_v40  ;;  %v1772_v1 = vsel %vm1764_vm14, %v1751_v61, %v1568_v41 }
 0x173   : > { %1695 = vrot.lane.b32.xlu0 %v1595_v0, %s4459_s20 }
 0x174   : > { %1720 = vrot.lane.b32.xlu1 %v1701_v43, %s4460_s28 }
 0x175   : > { %v1566_v44 = vpop.permute.xlu0 %1565  ;;  %v1603_v47 = vpop.permute.xlu1 %1602 }
 0x176   : > { %v1770_v56 = vsel %vm1764_vm14, %v1749_v55, %v1566_v44  ;;  %v1793_v3 = vsel %vm1785_vm15, %v1772_v1, %v1603_v47 }
 0x177   : > { %1718 = vrot.lane.b32.xlu0 %v1618_v34, %s4460_s28 }
 0x179   : > { %v1601_v48 = vpop.permute.xlu0 %1600  ;;  %v1626_v49 = vpop.permute.xlu1 %1625 }
 0x17a   : > { %v1791_v62 = vsel %vm1785_vm15, %v1770_v56, %v1601_v48  ;;  %v1814_v5 = vsel %vm1806_vm0, %v1793_v3, %v1626_v49 }
 0x17d   : > { %v1624_v50 = vpop.permute.xlu0 %1623  ;;  %v1651_v37 = vpop.permute.xlu1 %1650 }
 0x17e   : > { %v1812_v63 = vsel %vm1806_vm0, %v1791_v62, %v1624_v50  ;;  %v1835_v6 = vsel %vm1827_vm1, %v1814_v5, %v1651_v37 }
 0x181   : > { %v1649_v51 = vpop.permute.xlu0 %1648  ;;  %v1686_v52 = vpop.permute.xlu1 %1685 }
 0x182   : > { %v1833_v0 = vsel %vm1827_vm1, %v1812_v63, %v1649_v51  ;;  %v1856_v45 = vsel %vm1848_vm3, %v1835_v6, %v1686_v52 }
 0x185   : > { %v1684_v58 = vpop.permute.xlu0 %1683  ;;  %v1494_v59 = vpop.permute.xlu1 %1493 }
 0x186   : > { %v1854_v42 = vsel %vm1848_vm3, %v1833_v0, %v1684_v58  ;;  %v1732_v22 = vsel %vm1722_vm12, %v4881_v14, %v1494_v59 }
 0x189   : > { %v1707_v2 = vpop.permute.xlu0 %1706  ;;  %v1496_v60 = vpop.permute.xlu1 %1495 }
 0x18a   : > { %v1875_v4 = vsel %vm1869_vm2, %v1854_v42, %v1707_v2  ;;  %v1734_v23 = vsel %vm1722_vm12, %v4907_v29, %v1496_v60 }
 0x18b   : > { %4184 = vmatprep.mubr.msk.bf16.mxu0 %vm1926_vm4, %v1875_v4 }
 0x18d   : > { %v1709_v8 = vpop.permute.xlu0 %1708  ;;  %v1547_v34 = vpop.permute.xlu1 %1546 }
 0x18e   : > { %v1877_v9 = vsel %vm1869_vm2, %v1856_v45, %v1709_v8  ;;  %v1755_v28 = vsel %vm1743_vm13, %v1734_v23, %v1547_v34  ;;  %v4461_v45 = vmov 0  }
 0x18f   : > { %4185 = vmatmul.mubr.msk.bf16.gmra.mrb[4].mxu0 %vm1926_vm4, %v1877_v9  ;;  %2224 = vst.msk [vmem:[#allocation3 + $0xc] sm:$0xf] %vm2219_vm5, %v4461_v45  ;;  %2220 = vst.msk [vmem:[#allocation3] sm:$0xf] %vm2219_vm5, %v4461_v45 }
 0x190   : > { %2221 = vst.msk [vmem:[#allocation3 + $0x4] sm:$0xf] %vm2219_vm5, %v4461_v45  ;;  %2225 = vst.msk [vmem:[#allocation3 + $0x10] sm:$0xf] %vm2219_vm5, %v4461_v45 }
 0x191   : > { %v1545_v10 = vpop.permute.xlu0 %1544  ;;  %v1572_v11 = vpop.permute.xlu1 %1571  ;;  %2227 = vst.msk [vmem:[#allocation3 + $0x18] sm:$0xf] %vm2219_vm5, %v4461_v45  ;;  %2228 = vst.msk [vmem:[#allocation3 + $0x1c] sm:$0xf] %vm2219_vm5, %v4461_v45 }
 0x192   : > { %v1753_v24 = vsel %vm1743_vm13, %v1732_v22, %v1545_v10  ;;  %v1776_v33 = vsel %vm1764_vm14, %v1755_v28, %v1572_v11  ;;  %2230 = vst.msk [vmem:[#allocation3 + $0x24] sm:$0xf] %vm2219_vm5, %v4461_v45  ;;  %2231 = vst.msk [vmem:[#allocation3 + $0x28] sm:$0xf] %vm2219_vm5, %v4461_v45 }
 0x193   : > { %2233 = vst.msk [vmem:[#allocation3 + $0x30] sm:$0xf] %vm2219_vm5, %v4461_v45  ;;  %2234 = vst.msk [vmem:[#allocation3 + $0x34] sm:$0xf] %vm2219_vm5, %v4461_v45 }
 0x194   : > { %2236 = vst.msk [vmem:[#allocation3 + $0x3c] sm:$0xf] %vm2219_vm5, %v4461_v45  ;;  %2237 = vst.msk [vmem:[#allocation3 + $0x40] sm:$0xf] %vm2219_vm5, %v4461_v45 }
 0x195   : > { %v1570_v12 = vpop.permute.xlu0 %1569  ;;  %v1607_v13 = vpop.permute.xlu1 %1606  ;;  %2239 = vst.msk [vmem:[#allocation3 + $0x48] sm:$0xf] %vm2219_vm5, %v4461_v45  ;;  %2240 = vst.msk [vmem:[#allocation3 + $0x4c] sm:$0xf] %vm2219_vm5, %v4461_v45 }
 0x196   : > { %v1774_v25 = vsel %vm1764_vm14, %v1753_v24, %v1570_v12  ;;  %v1797_v36 = vsel %vm1785_vm15, %v1776_v33, %v1607_v13  ;;  %2242 = vst.msk [vmem:[#allocation3 + $0x54] sm:$0xf] %vm2219_vm5, %v4461_v45  ;;  %2243 = vst.msk [vmem:[#allocation3 + $0x58] sm:$0xf] %vm2219_vm5, %v4461_v45 }
 0x197   : > { %2245 = vst.msk [vmem:[#allocation3 + $0x60] sm:$0xf] %vm2219_vm5, %v4461_v45  ;;  %2246 = vst.msk [vmem:[#allocation3 + $0x64] sm:$0xf] %vm2219_vm5, %v4461_v45 }
 0x198   : > { %2248 = vst.msk [vmem:[#allocation3 + $0x6c] sm:$0xf] %vm2219_vm5, %v4461_v45  ;;  %2249 = vst.msk [vmem:[#allocation3 + $0x70] sm:$0xf] %vm2219_vm5, %v4461_v45 }
 0x199   : > { %v1605_v15 = vpop.permute.xlu0 %1604  ;;  %v1630_v16 = vpop.permute.xlu1 %1629  ;;  %2226 = vst.msk [vmem:[#allocation3 + $0x14] sm:$0x1] %vm2222_vm6, %v4461_v45  ;;  %2223 = vst.msk [vmem:[#allocation3 + $0x8] sm:$0x1] %vm2222_vm6, %v4461_v45 }
 0x19a   : > { %v1795_v30 = vsel %vm1785_vm15, %v1774_v25, %v1605_v15  ;;  %v1818_v39 = vsel %vm1806_vm0, %v1797_v36, %v1630_v16  ;;  %2229 = vst.msk [vmem:[#allocation3 + $0x20] sm:$0x1] %vm2222_vm6, %v4461_v45  ;;  %2232 = vst.msk [vmem:[#allocation3 + $0x2c] sm:$0x1] %vm2222_vm6, %v4461_v45 }
 0x19b   : > { %2235 = vst.msk [vmem:[#allocation3 + $0x38] sm:$0x1] %vm2222_vm6, %v4461_v45  ;;  %2238 = vst.msk [vmem:[#allocation3 + $0x44] sm:$0x1] %vm2222_vm6, %v4461_v45 }
 0x19c   : > { %2241 = vst.msk [vmem:[#allocation3 + $0x50] sm:$0x1] %vm2222_vm6, %v4461_v45  ;;  %2244 = vst.msk [vmem:[#allocation3 + $0x5c] sm:$0x1] %vm2222_vm6, %v4461_v45 }
 0x19d   : > { %v1628_v17 = vpop.permute.xlu0 %1627  ;;  %v1655_v18 = vpop.permute.xlu1 %1654  ;;  %2247 = vst.msk [vmem:[#allocation3 + $0x68] sm:$0x1] %vm2222_vm6, %v4461_v45  ;;  %2250 = vst.msk [vmem:[#allocation3 + $0x74] sm:$0x1] %vm2222_vm6, %v4461_v45 }
 0x19e   : > { %v1816_v31 = vsel %vm1806_vm0, %v1795_v30, %v1628_v17  ;;  %v1839_v40 = vsel %vm1827_vm1, %v1818_v39, %v1655_v18 }
 0x1a1   : > { %v1653_v21 = vpop.permute.xlu0 %1652  ;;  %v1690_v20 = vpop.permute.xlu1 %1689 }
 0x1a2   : > { %v1837_v32 = vsel %vm1827_vm1, %v1816_v31, %v1653_v21  ;;  %v1860_v41 = vsel %vm1848_vm3, %v1839_v40, %v1690_v20 }
 0x1a5   : > { %v1688_v26 = vpop.permute.xlu0 %1687  ;;  %v1498_v27 = vpop.permute.xlu1 %1497 }
 0x1a6   : > { %v1858_v14 = vsel %vm1848_vm3, %v1837_v32, %v1688_v26  ;;  %v1736_v58 = vsel %vm1722_vm12, %v4931_v46, %v1498_v27 }
 0x1a9   : > { %v1711_v35 = vpop.permute.xlu0 %1710  ;;  %v1500_v29 = vpop.permute.xlu1 %1499 }
 0x1aa   : > { %v1879_v38 = vsel %vm1869_vm2, %v1858_v14, %v1711_v35  ;;  %v1738_v59 = vsel %vm1722_vm12, %v4945_v57, %v1500_v29 }
 0x1ab   : > { %4188 = vmatprep.mubr.msk.bf16.mxu0 %vm1926_vm4, %v1879_v38 }
 0x1ad   : > { %v1713_v43 = vpop.permute.xlu0 %1712  ;;  %v1551_v44 = vpop.permute.xlu1 %1550 }
 0x1ae   : > { %v1881_v47 = vsel %vm1869_vm2, %v1860_v41, %v1713_v43  ;;  %v1759_v1 = vsel %vm1743_vm13, %v1738_v59, %v1551_v44  ;;  %v5183_v44 = vstv %s4013_s14 }
 0x1af   : > { %4189 = vmatmul.mubr.msk.bf16.gmra.mrb[8].mxu0 %vm1926_vm4, %v1881_v47  ;;  %v2140_v47 = vadd.s32 1, %v5183_v44  ;;  %vm2149_vm11 = vcmp.ge.s32.totalorder %v5183_v44, 0 }
 0x1b1   : > { %v1549_v48 = vpop.permute.xlu0 %1548  ;;  %v1576_v49 = vpop.permute.xlu1 %1575  ;;  %vm2150_vm7 = vcmp.ge.s32.totalorder %v2140_v47, 0  ;;  %vm2160_vm8 = vcmp.lt.s32.totalorder %v2140_v47, 16 }
 0x1b2   : > { %v1757_v61 = vsel %vm1743_vm13, %v1736_v58, %v1549_v48  ;;  %v1780_v46 = vsel %vm1764_vm14, %v1759_v1, %v1576_v49  ;;  %v5189_v48 = vld [vmem:[%s5936_s3] ss:$0 sm:$0xff] }
 0x1b5   : > { %v1574_v50 = vpop.permute.xlu0 %1573  ;;  %v1611_v37 = vpop.permute.xlu1 %1610 }
 0x1b6   : > { %v1778_v62 = vsel %vm1764_vm14, %v1757_v61, %v1574_v50  ;;  %v1801_v5 = vsel %vm1785_vm15, %v1780_v46, %v1611_v37  ;;  %v5194_v50 = vld [vmem:[%s5937_s4] ss:$0 sm:$0xff] }
 0x1b9   : > { %v1609_v51 = vpop.permute.xlu0 %1608  ;;  %v1634_v52 = vpop.permute.xlu1 %1633 }
 0x1ba   : > { %v1799_v42 = vsel %vm1785_vm15, %v1778_v62, %v1609_v51  ;;  %v1822_v8 = vsel %vm1806_vm0, %v1801_v5, %v1634_v52 }
 0x1bd   : > { %v1632_v53 = vpop.permute.xlu0 %1631  ;;  %v1659_v54 = vpop.permute.xlu1 %1658 }
 0x1be   : > { %v1820_v2 = vsel %vm1806_vm0, %v1799_v42, %v1632_v53  ;;  %v1843_v34 = vsel %vm1827_vm1, %v1822_v8, %v1659_v54 }
 0x1c1   : > { %v1657_v55 = vpop.permute.xlu0 %1656  ;;  %v1694_v56 = vpop.permute.xlu1 %1693 }
 0x1c2   : > { %v1841_v60 = vsel %vm1827_vm1, %v1820_v2, %v1657_v55  ;;  %v1864_v9 = vsel %vm1848_vm3, %v1843_v34, %v1694_v56 }
 0x1c5   : > { %v1692_v63 = vpop.permute.xlu0 %1691  ;;  %v5115_v0 = vpop.permute.xlu1 %1501 }
 0x1c6   : > { %v1862_v3 = vsel %vm1848_vm3, %v1841_v60, %v1692_v63  ;;  %v1740_v26 = vsel %vm1722_vm12, %v4969_v7, %v5115_v0 }
 0x1c9   : > { %v1715_v57 = vpop.permute.xlu0 %1714  ;;  %v1504_v4 = vpop.permute.xlu1 %1503 }
 0x1ca   : > { %v1883_v6 = vsel %vm1869_vm2, %v1862_v3, %v1715_v57  ;;  %v1742_v23 = vsel %vm1722_vm12, %v4983_v19, %v1504_v4 }
 0x1cb   : > { %4192 = vmatprep.mubr.msk.bf16.mxu0 %vm1926_vm4, %v1883_v6 }
 0x1cd   : > { %v1717_v10 = vpop.permute.xlu0 %1716  ;;  %v1555_v11 = vpop.permute.xlu1 %1554 }
 0x1ce   : > { %v1885_v12 = vsel %vm1869_vm2, %v1864_v9, %v1717_v10  ;;  %v1763_v27 = vsel %vm1743_vm13, %v1742_v23, %v1555_v11 }
 0x1cf   : > { %4193 = vmatmul.mubr.msk.bf16.gmra.mrb[12].mxu0 %vm1926_vm4, %v1885_v12  ;;  %v2526_v12 = vld [vmem:[#allocation3 + $0xc] sm:$0xf] }
 0x1d1   : > { %v1553_v13 = vpop.permute.xlu0 %1552  ;;  %v1580_v15 = vpop.permute.xlu1 %1579 }
 0x1d2   : > { %v1761_v28 = vsel %vm1743_vm13, %v1740_v26, %v1553_v13  ;;  %v1784_v32 = vsel %vm1764_vm14, %v1763_v27, %v1580_v15 }
 0x1d5   : > { %v1578_v16 = vpop.permute.xlu0 %1577  ;;  %v1615_v17 = vpop.permute.xlu1 %1614 }
 0x1d6   : > { %v1782_v30 = vsel %vm1764_vm14, %v1761_v28, %v1578_v16  ;;  %v1805_v19 = vsel %vm1785_vm15, %v1784_v32, %v1615_v17 }
 0x1d9   : > { %v1613_v18 = vpop.permute.xlu0 %1612  ;;  %v1638_v21 = vpop.permute.xlu1 %1637 }
 0x1da   : > { %v1803_v33 = vsel %vm1785_vm15, %v1782_v30, %v1613_v18  ;;  %v1826_v35 = vsel %vm1806_vm0, %v1805_v19, %v1638_v21  ;;  %v2517_v18 = vld [vmem:[#allocation3] sm:$0xf] }
 0x1dd   : > { %v1636_v20 = vpop.permute.xlu0 %1635 }
 0x1de   : > { %v1663_v22 = vpop.permute.xlu1 %1662  ;;  %v1824_v14 = vsel %vm1806_vm0, %v1803_v33, %v1636_v20  ;;  %vm2159_vm0 = vcmp.lt.s32.totalorder %v5183_v44, 16  ;;  %v2523_v33 = vld [vmem:[#allocation3 + $0x8] sm:$0x1] }
 0x1df   : > { %v1847_v36 = vsel %vm1827_vm1, %v1826_v35, %v1663_v22 }
 0x1e1   : > { %v1661_v24 = vpop.permute.xlu0 %1660 }
 0x1e2   : > { %v1698_v25 = vpop.permute.xlu1 %1697  ;;  %v1845_v7 = vsel %vm1827_vm1, %v1824_v14, %v1661_v24  ;;  %vm2170_vm1 = vmand %vm2150_vm7, %vm2160_vm8  ;;  %vm2312_vm7 = vsmask.f32 4368 }
 0x1e3   : > { %v1868_v40 = vsel %vm1848_vm3, %v1847_v36, %v1698_v25  ;;  %v2530_v25 = vld [vmem:[#allocation3 + $0x14] sm:$0x1] }
 0x1e5   : > { %v1696_v31 = vpop.permute.xlu0 %1695 }
 0x1e6   : > { %v1721_v29 = vpop.permute.xlu1 %1720  ;;  %v1866_v38 = vsel %vm1848_vm3, %v1845_v7, %v1696_v31  ;;  %vm2515_vm3 = vsmask.f32 7938 }
 0x1e7   : > { %v1889_v43 = vsel %vm1869_vm2, %v1868_v40, %v1721_v29  ;;  %vm5207_vm8 = vmand %vm2219_vm5, %vm2515_vm3  ;;  %v2142_v40 = vadd.s32 3, %v5183_v44 }
 0x1e9   : > { %v1719_v39 = vpop.permute.xlu0 %1718 }
 0x1ea   : > { %v1887_v41 = vsel %vm1869_vm2, %v1866_v38, %v1719_v39  ;;  %vm2169_vm2 = vmand %vm2149_vm11, %vm2159_vm0 }
 0x1eb   : > { %4196 = vmatprep.mubr.msk.bf16.mxu0 %vm1926_vm4, %v1887_v41 }
 0x1ec   : > { %4197 = vmatmul.mubr.msk.bf16.gmra.mrb[16].mxu0 %vm1926_vm4, %v1889_v43  ;;  %vm2311_vm4 = vsmask.f32 256  ;;  %v2141_v43 = vadd.s32 2, %v5183_v44 }
 0x1ed   : > { %vm5212_vm11 = vmor %vm2311_vm4, %vm2312_vm7 }
 0x1ee   : > { %vm5218_vm0 = vmand %vm2222_vm6, %vm2311_vm4  ;;  %vm2152_vm6 = vcmp.ge.s32.totalorder %v2142_v40, 0  ;;  %vm2161_vm3 = vcmp.lt.s32.totalorder %v2141_v43, 16 }
 0x242   : > { %v4182_v49 = vpop.f32.mrb[0].mxu0 }
 0x243   : > { %v2073_v37 = vmul.f32 %v4182_v49, %v5189_v48  ;;  %v1985_v51 = vpop.f32.mrb[1].mxu0 }
 0x244   : > { %v2071_v52 = vmul.f32 %v5189_v48, %v1985_v51  ;;  %v4183_v53 = vpop.f32.mrb[2].mxu0 }
 0x245   : > { %v2100_v54 = vadd.f32 %v5194_v50, %v2073_v37  ;;  %v2074_v55 = vmul.f32 %v4183_v53, %v5189_v48  ;;  %v1988_v56 = vpop.f32.mrb[3].mxu0 }
 0x246   : > { %v2098_v58 = vadd.f32 %v5194_v50, %v2071_v52  ;;  %v2072_v59 = vmul.f32 %v5189_v48, %v1988_v56 }
 0x247   : > { %v2120_v61 = vmax.f32 %v2100_v54, 0.0  ;;  %v2101_v62 = vadd.f32 %v5194_v50, %v2074_v55 }
 0x248   : > { %v2118_v63 = vmax.f32 %v2098_v58, 0.0  ;;  %v2099_v0 = vadd.f32 %v5194_v50, %v2072_v59 }
 0x249   : > { %v2201_v1 = vsel %vm2170_vm1, %v2120_v61, 0.0  ;;  %v2121_v42 = vmax.f32 %v2101_v62, 0.0 }
 0x24a   : > { %v4126_v2 = vpack.c.bf16 %v2201_v1, %v2201_v1  ;;  %v2199_v60 = vsel %vm2169_vm2, %v2118_v63, 0.0  ;;  %v2119_v46 = vmax.f32 %v2099_v0, 0.0 }
 0x24b   : > { %v4124_v3 = vpack.c.bf16 %v2199_v60, %v2199_v60  ;;  %v2202_v57 = vsel %vm2170_vm1, %v2121_v42, 0.0  ;;  %vm2162_vm1 = vcmp.lt.s32.totalorder %v2142_v40, 16 }
 0x24c   : > { %v2332_v4 = vshrl.u32 %v4126_v2, 16  ;;  %v4127_v5 = vpack.c.bf16 %v2202_v57, %v2202_v57  ;;  %v2200_v6 = vsel %vm2169_vm2, %v2119_v46, 0.0  ;;  %v2335_v9 = vshll.u32 %v4126_v2, 16  ;;  %vm5256_vm4 = vmand %vm2152_vm6, %vm2162_vm1 }
 0x24d   : > { %v2315_v45 = vshrl.u32 %v4124_v3, 16  ;;  %v4125_v8 = vpack.c.bf16 %v2200_v6, %v2200_v6  ;;  %v2318_v15 = vshll.u32 %v4124_v3, 16  ;;  %vm2151_vm2 = vcmp.ge.s32.totalorder %v2141_v43, 0 }
 0x24e   : > { %v2334_v34 = vrot.slane %v2332_v4, 7  ;;  %v2340_v10 = vshrl.u32 %v4127_v5, 16  ;;  %v2343_v22 = vshll.u32 %v4127_v5, 16  ;;  %vm5266_vm7 = vmand %vm2151_vm2, %vm2161_vm3 }
 0x24f   : > { %v2317_v13 = vrot.slane %v2315_v45, 7  ;;  %v2323_v16 = vshrl.u32 %v4125_v8, 16  ;;  %v2326_v27 = vshll.u32 %v4125_v8, 16 }
 0x250   : > { %v2337_v17 = vor.u32 %v2335_v9, %v2334_v34  ;;  %v2342_v20 = vrot.slane %v2340_v10, 7  ;;  %v2338_v28 = vrot.slane %v2334_v34, 4 }
 0x251   : > { %v2320_v23 = vor.u32 %v2318_v15, %v2317_v13  ;;  %v2325_v26 = vrot.slane %v2323_v16, 7  ;;  %v2321_v19 = vrot.slane %v2317_v13, 4 }
 0x252   : > { %v2527_v30 = vsel %vm5207_vm8, %v2337_v17, %v2526_v12  ;;  %v2345_v31 = vor.u32 %v2343_v22, %v2342_v20  ;;  %v2347_v32 = vrot.slane %v2342_v20, 4 }
 0x253   : > { %2528 = vst [vmem:[#allocation3 + $0xc] sm:$0xf] %v2527_v30  ;;  %v2518_v14 = vsel %vm5207_vm8, %v2320_v23, %v2517_v18  ;;  %v2328_v35 = vor.u32 %v2326_v27, %v2325_v26  ;;  %v2330_v7 = vrot.slane %v2325_v26, 4 }
 0x254   : > { %2519 = vst [vmem:[#allocation3] sm:$0xf] %v2518_v14  ;;  %v2346_v29 = vsel %vm5212_vm11, %v2338_v28, %v2345_v31  ;;  %v2531_v36 = vsel %vm5218_vm0, %v2347_v32, %v2530_v25 }
 0x255   : > { %2529 = vst.msk [vmem:[#allocation3 + $0x10] sm:$0xf] %vm2219_vm5, %v2346_v29  ;;  %2532 = vst [vmem:[#allocation3 + $0x14] sm:$0x1] %v2531_v36  ;;  %v2329_v38 = vsel %vm5212_vm11, %v2321_v19, %v2328_v35  ;;  %v2524_v39 = vsel %vm5218_vm0, %v2330_v7, %v2523_v33  ;;  %v5308_v29 = vadd.s32 7, %v5183_v44 }
 0x256   : > { %2520 = vst.msk [vmem:[#allocation3 + $0x4] sm:$0xf] %vm2219_vm5, %v2329_v38  ;;  %2525 = vst [vmem:[#allocation3 + $0x8] sm:$0x1] %v2524_v39 }
 0x25a   : > { %v2622_v41 = vld [vmem:[#allocation3 + $0xc] sm:$0xf] }
 0x25b   : > { %v2646_v47 = vld [vmem:[#allocation3 + $0xc] sm:$0xe]  ;;  %v2589_v61 = vld [vmem:[#allocation3] sm:$0xf] }
 0x25c   : > { %v2591_v49 = vld [vmem:[#allocation3 + $0xc] sm:$0xf]  ;;  %v2623_v51 = vld [vmem:[#allocation3 + $0x10] sm:$0xf]  ;;  %v2613_v3 = vld [vmem:[#allocation3] sm:$0xe] }
 0x25d   : > { %v2614_v37 = vld [vmem:[#allocation3 + $0xc] sm:$0xe]  ;;  %v2592_v52 = vld [vmem:[#allocation3 + $0x10] sm:$0xf]  ;;  %v4058_v53 = vcombine.low %v2622_v41, %v2623_v51  ;;  %v4074_v54 = vcombine.low %v2646_v47, %v2623_v51  ;;  %v2590_v62 = vld [vmem:[#allocation3 + $0x4] sm:$0xf] }
 0x25e   : > { %v4342_v55 = vld [vmem:[#allocation3 + $0x14] ss:$0 sps:$4 sm:$0x11]   ;;  %v4051_v56 = vcombine.low %v2614_v37, %v2592_v52  ;;  %v5238_v58 = vcombine.low %v2591_v49, %v2592_v52  ;;  %v4346_v5 = vld [vmem:[#allocation3 + $0x8] ss:$0 sps:$4 sm:$0x11]   ;;  %v4050_v6 = vcombine.low %v2613_v3, %v2590_v62  ;;  %v5244_v45 = vcombine.low %v2589_v61, %v2590_v62 }
 0x25f   : > { %v4345_v59 = vld [vmem:[#allocation3 + $0x14] ss:$0 sps:$4 sm:$0x11]   ;;  %2967 = vrot.lane.b32.xlu0 %v4058_v53, %s4462_s12  ;;  %v3010_v63 = vshll.u32 %v4058_v53, 16  ;;  %v2891_v1 = vrot.slane %v4342_v55, 1  ;;  %v3143_v42 = vrot.slane %v4074_v54, 1 }
 0x260   : > { %v2890_v0 = vrot.slane %v4051_v56, 1  ;;  %v3144_v2 = vrot.slane %v4345_v59, 1  ;;  %v2766_v60 = vshll.u32 %v5238_v58, 16  ;;  %v2771_v46 = vshll.u32 %v4342_v55, 16 }
 0x261   : > { %v2764_v4 = vshrl.u32 %v5238_v58, 16  ;;  %v3008_v10 = vshrl.u32 %v4058_v53, 16  ;;  %v3012_v12 = vrot.slane %v3010_v63, 1  ;;  %v2887_v16 = vrot.slane %v4050_v6, 1 }
 0x262   : > { %v2892_v57 = vsel %vm1505_vm9, %v2890_v0, %v2891_v1  ;;  %v4186_v8 = vpop.f32.mrb[4].mxu0  ;;  %v3145_v34 = vsel %vm1505_vm9, %v3143_v42, %v3144_v2  ;;  %v2768_v9 = vrot.slane %v2766_v60, 1  ;;  %v2888_v17 = vrot.slane %v4346_v5, 1 }
 0x263   : > { %2913 = vrot.lane.b32.xlu1 %v2892_v57, %s4455_s16  ;;  %v2077_v13 = vmul.f32 %v4186_v8, %v5189_v48  ;;  %3167 = vrot.lane.b32.xlu0 %v3145_v34, %s4463_s25  ;;  %v2001_v15 = vpop.f32.mrb[5].mxu0  ;;  %v3015_v18 = vshll.u32 %v4345_v59, 16  ;;  %v2773_v25 = vrot.slane %v2771_v46, 1  ;;  %v3013_v31 = vor.u32 %v3012_v12, %v3008_v10  ;;  %v2540_v57 = vld [vmem:[#allocation3 + $0x24] sm:$0xf] }
 0x264   : > { %v2075_v20 = vmul.f32 %v5189_v48, %v2001_v15  ;;  %v4187_v22 = vpop.f32.mrb[6].mxu0  ;;  %v2769_v23 = vor.u32 %v2768_v9, %v2764_v4  ;;  %v2889_v30 = vsel %vm1505_vm9, %v2887_v16, %v2888_v17  ;;  %v2754_v35 = vshll.u32 %v5244_v45, 16  ;;  %v2533_v34 = vld [vmem:[#allocation3 + $0x18] sm:$0xf] }
 0x265   : > { %v2104_v26 = vadd.f32 %v5194_v50, %v2077_v13  ;;  %v2078_v27 = vmul.f32 %v4187_v22, %v5189_v48  ;;  %v2004_v28 = vpop.f32.mrb[7].mxu0  ;;  %v3017_v38 = vrot.slane %v3015_v18, 1  ;;  %v2752_v39 = vshrl.u32 %v5244_v45, 16  ;;  %v2544_v13 = vld [vmem:[#allocation3 + $0x2c] sm:$0x1] }
 0x266   : > { %v2102_v33 = vadd.f32 %v5194_v50, %v2075_v20  ;;  %v2076_v19 = vmul.f32 %v5189_v48, %v2004_v28  ;;  %v2774_v14 = vsel %vm1364_vm10, %v2769_v23, %v2773_v25  ;;  %v2756_v47 = vrot.slane %v2754_v35, 1  ;;  %v2537_v23 = vld [vmem:[#allocation3 + $0x20] sm:$0x1] }
 0x267   : > { %v2124_v7 = vmax.f32 %v2104_v26, 0.0  ;;  %v2105_v36 = vadd.f32 %v5194_v50, %v2078_v27  ;;  %2849 = vrot.lane.b32.xlu1 %v2774_v14, %s4464_s26  ;;  %2911 = vrot.lane.b32.xlu0 %v2889_v30, %s4455_s16  ;;  %v2759_v49 = vshll.u32 %v4346_v5, 16  ;;  %v3018_v51 = vsel %vm1364_vm10, %v3013_v31, %v3017_v38 }
 0x268   : > { %v2122_v40 = vmax.f32 %v2102_v33, 0.0  ;;  %v2103_v41 = vadd.f32 %v5194_v50, %v2076_v19  ;;  %v2757_v55 = vor.u32 %v2756_v47, %v2752_v39  ;;  %v5302_v19 = vadd.s32 5, %v5183_v44 }
 0x269   : > { %v2205_v43 = vsel %vm5256_vm4, %v2124_v7, 0.0  ;;  %v2125_v37 = vmax.f32 %v2105_v36, 0.0  ;;  %v2761_v0 = vrot.slane %v2759_v49, 1  ;;  %v5305_v14 = vadd.s32 4, %v5183_v44 }
 0x26a   : > { %v4130_v52 = vpack.c.bf16 %v2205_v43, %v2205_v43  ;;  %v2203_v53 = vsel %vm5266_vm7, %v2122_v40, 0.0  ;;  %v2123_v54 = vmax.f32 %v2103_v41, 0.0  ;;  %vm2154_vm6 = vcmp.ge.s32.totalorder %v5302_v19, 0 }
 0x26b   : > { %v4128_v56 = vpack.c.bf16 %v2203_v53, %v2203_v53  ;;  %v2206_v59 = vsel %vm5256_vm4, %v2125_v37, 0.0  ;;  %3103 = vrot.lane.b32.xlu0 %v3018_v51, %s4454_s27  ;;  %v2762_v3 = vsel %vm1364_vm10, %v2757_v55, %v2761_v0  ;;  %vm2164_vm1 = vcmp.lt.s32.totalorder %v5302_v19, 16 }
 0x26c   : > { %v2366_v61 = vshrl.u32 %v4130_v52, 16  ;;  %v4131_v62 = vpack.c.bf16 %v2206_v59, %v2206_v59  ;;  %v2204_v63 = vsel %vm5266_vm7, %v2123_v54, 0.0  ;;  %v2369_v60 = vshll.u32 %v4130_v52, 16  ;;  %vm5360_vm4 = vmand %vm2154_vm6, %vm2164_vm1 }
 0x26d   : > { %v2349_v1 = vshrl.u32 %v4128_v56, 16  ;;  %v4129_v42 = vpack.c.bf16 %v2204_v63, %v2204_v63  ;;  %v2352_v5 = vshll.u32 %v4128_v56, 16  ;;  %vm2153_vm2 = vcmp.ge.s32.totalorder %v5305_v14, 0 }
 0x26e   : > { %v2368_v2 = vrot.slane %v2366_v61, 7  ;;  %v2374_v46 = vshrl.u32 %v4131_v62, 16  ;;  %v2377_v10 = vshll.u32 %v4131_v62, 16  ;;  %vm2163_vm3 = vcmp.lt.s32.totalorder %v5305_v14, 16 }
 0x26f   : > { %v2351_v4 = vrot.slane %v2349_v1, 7  ;;  %v2357_v6 = vshrl.u32 %v4129_v42, 16  ;;  %2847 = vrot.lane.b32.xlu0 %v2762_v3, %s4464_s26  ;;  %v2360_v16 = vshll.u32 %v4129_v42, 16  ;;  %vm5373_vm7 = vmand %vm2153_vm2, %vm2163_vm3  ;;  %vm3608_vm6 = vcmask 1041408  }
 0x270   : > { %v2371_v8 = vor.u32 %v2369_v60, %v2368_v2  ;;  %v2376_v9 = vrot.slane %v2374_v46, 7  ;;  %v2372_v17 = vrot.slane %v2368_v2, 4  ;;  %vm2156_vm1 = vcmp.ge.s32.totalorder %v5308_v29, 0 }
 0x271   : > { %v2354_v12 = vor.u32 %v2352_v5, %v2351_v4  ;;  %v2359_v15 = vrot.slane %v2357_v6, 7  ;;  %v2355_v25 = vrot.slane %v2351_v4, 4  ;;  %vm2166_vm2 = vcmp.lt.s32.totalorder %v5308_v29, 16 }
 0x272   : > { %v2541_v18 = vsel %vm5207_vm8, %v2371_v8, %v2540_v57  ;;  %v2379_v20 = vor.u32 %v2377_v10, %v2376_v9  ;;  %v2381_v22 = vrot.slane %v2376_v9, 4 }
 0x273   : > { %2542 = vst [vmem:[#allocation3 + $0x24] sm:$0xf] %v2541_v18  ;;  %v2534_v26 = vsel %vm5207_vm8, %v2354_v12, %v2533_v34  ;;  %v2362_v27 = vor.u32 %v2360_v16, %v2359_v15  ;;  %v2364_v28 = vrot.slane %v2359_v15, 4 }
 0x274   : > { %2535 = vst [vmem:[#allocation3 + $0x18] sm:$0xf] %v2534_v26  ;;  %v2380_v30 = vsel %vm5212_vm11, %v2372_v17, %v2379_v20  ;;  %v2545_v31 = vsel %vm5218_vm0, %v2381_v22, %v2544_v13 }
 0x275   : > { %2543 = vst.msk [vmem:[#allocation3 + $0x28] sm:$0xf] %vm2219_vm5, %v2380_v30  ;;  %2546 = vst [vmem:[#allocation3 + $0x2c] sm:$0x1] %v2545_v31  ;;  %v2363_v32 = vsel %vm5212_vm11, %v2355_v25, %v2362_v27  ;;  %v2538_v33 = vsel %vm5218_vm0, %v2364_v28, %v2537_v23 }
 0x276   : > { %2536 = vst.msk [vmem:[#allocation3 + $0x1c] sm:$0xf] %vm2219_vm5, %v2363_v32  ;;  %2539 = vst [vmem:[#allocation3 + $0x20] sm:$0x1] %v2538_v33 }
 0x27a   : > { %v2657_v35 = vld [vmem:[#allocation3 + $0x24] sm:$0xf] }
 0x27b   : > { %v2680_v7 = vld [vmem:[#allocation3 + $0x24] sm:$0xe]  ;;  %v2655_v39 = vld [vmem:[#allocation3 + $0x18] sm:$0xf] }
 0x27c   : > { %v2626_v36 = vld [vmem:[#allocation3 + $0x24] sm:$0xf]  ;;  %v2658_v40 = vld [vmem:[#allocation3 + $0x28] sm:$0xf]  ;;  %v2679_v47 = vld [vmem:[#allocation3 + $0x18] sm:$0xe] }
 0x27d   : > { %v2648_v38 = vld [vmem:[#allocation3 + $0x24] sm:$0xe]  ;;  %v2627_v41 = vld [vmem:[#allocation3 + $0x28] sm:$0xf]  ;;  %v5314_v49 = vcombine.low %v2657_v35, %v2658_v40  ;;  %v4099_v43 = vcombine.low %v2680_v7, %v2658_v40  ;;  %v2656_v51 = vld [vmem:[#allocation3 + $0x1c] sm:$0xf] }
 0x27e   : > { %v5316_v37 = vcombine.low %v2626_v36, %v2627_v41  ;;  %v2624_v52 = vld [vmem:[#allocation3 + $0x18] sm:$0xf]  ;;  %v2625_v53 = vld [vmem:[#allocation3 + $0x1c] sm:$0xf]  ;;  %v4076_v54 = vcombine.low %v2648_v38, %v2627_v41  ;;  %v5318_v55 = vcombine.low %v2655_v39, %v2656_v51  ;;  %v4098_v56 = vcombine.low %v2679_v47, %v2656_v51  ;;  %v2595_v3 = vld [vmem:[#allocation3 + $0x24] sm:$0xf] }
 0x27f   : > { %v5320_v59 = vcombine.low %v2624_v52, %v2625_v53  ;;  %v5322_v61 = vld [vmem:[#allocation3 + $0x2c] ss:$0 sps:$4 sm:$0x11]   ;;  %3225 = vrot.lane.b32.xlu1 %v5314_v49, %s4453_s15  ;;  %v3278_v62 = vshll.u32 %v5314_v49, 16  ;;  %v2647_v1 = vld [vmem:[#allocation3 + $0x18] sm:$0xe] }
 0x280   : > { %2971 = vrot.lane.b32.xlu0 %v5316_v37, %s4462_s12  ;;  %v3032_v63 = vshrl.u32 %v5316_v37, 16  ;;  %v3034_v0 = vshll.u32 %v5316_v37, 16  ;;  %v3402_v42 = vrot.slane %v4099_v43, 1  ;;  %v3399_v2 = vrot.slane %v4098_v56, 1  ;;  %v2596_v57 = vld [vmem:[#allocation3 + $0x28] sm:$0xf] }
 0x281   : > { %v3266_v60 = vshll.u32 %v5318_v55, 16  ;;  %v4075_v46 = vcombine.low %v2647_v1, %v2625_v53  ;;  %v3022_v4 = vshll.u32 %v5320_v59, 16  ;;  %v3403_v5 = vrot.slane %v5322_v61, 1  ;;  %v2616_v6 = vld [vmem:[#allocation3 + $0x24] sm:$0xe] }
 0x282   : > { %v5334_v8 = vrot.slane %v3034_v0, 1  ;;  %v4190_v34 = vpop.f32.mrb[8].mxu0  ;;  %v5336_v9 = vld [vmem:[#allocation3 + $0x2c] ss:$0 sps:$4 sm:$0x11]   ;;  %v4053_v10 = vcombine.low %v2616_v6, %v2596_v57  ;;  %v3149_v12 = vrot.slane %v4076_v54, 1  ;;  %v5344_v17 = vcombine.low %v2595_v3, %v2596_v57 }
 0x283   : > { %v2081_v13 = vmul.f32 %v4190_v34, %v5189_v48  ;;  %2969 = vrot.lane.b32.xlu1 %v5320_v59, %s4462_s12  ;;  %v2017_v15 = vpop.f32.mrb[9].mxu0  ;;  %v3404_v16 = vsel %vm1505_vm9, %v3402_v42, %v3403_v5  ;;  %v5346_v18 = vld [vmem:[#allocation3 + $0x2c] ss:$0 sps:$4 sm:$0x11]   ;;  %v2897_v25 = vrot.slane %v5336_v9, 1  ;;  %v3146_v26 = vrot.slane %v4075_v46, 1 }
 0x284   : > { %3223 = vrot.lane.b32.xlu0 %v5318_v55, %s4453_s15  ;;  %v2079_v20 = vmul.f32 %v5189_v48, %v2017_v15  ;;  %v4191_v22 = vpop.f32.mrb[10].mxu0  ;;  %v2896_v23 = vrot.slane %v4053_v10, 1  ;;  %v3150_v31 = vrot.slane %v5346_v18, 1  ;;  %v5353_v32 = vld [vmem:[#allocation3 + $0x20] ss:$0 sps:$4 sm:$0x11]  }
 0x285   : > { %v2108_v27 = vadd.f32 %v5194_v50, %v2081_v13  ;;  %v2082_v28 = vmul.f32 %v4191_v22, %v5189_v48  ;;  %v2020_v30 = vpop.f32.mrb[11].mxu0  ;;  %v3276_v33 = vshrl.u32 %v5314_v49, 16  ;;  %v5367_v39 = vld [vmem:[#allocation3 + $0x20] ss:$0 sps:$4 sm:$0x11]   ;;  %v3280_v40 = vrot.slane %v3278_v62, 1 }
 0x286   : > { %v2106_v7 = vadd.f32 %v5194_v50, %v2079_v20  ;;  %v2080_v36 = vmul.f32 %v5189_v48, %v2020_v30  ;;  %v2898_v38 = vsel %vm1505_vm9, %v2896_v23, %v2897_v25  ;;  %v3151_v49 = vsel %vm1505_vm9, %v3149_v12, %v3150_v31  ;;  %v4406_v57 = vld [vmem:[%s5938_s5] sm:$0xff]   ;;  %v4407_v5 = vld [vmem:[%s5938_s5 + $0x8] sm:$0xff]  }
 0x287   : > { %v2128_v41 = vmax.f32 %v2108_v27, 0.0  ;;  %v2109_v47 = vadd.f32 %v5194_v50, %v2082_v28  ;;  %2917 = vrot.lane.b32.xlu1 %v2898_v38, %s4455_s16  ;;  %v3147_v43 = vrot.slane %v5353_v32, 1  ;;  %v3400_v53 = vrot.slane %v5367_v39, 1  ;;  %4200 = vmatprep.subr.bf16.mxu1 %v4406_v57  ;;  %v2547_v27 = vld [vmem:[#allocation3 + $0x30] sm:$0xf] }
 0x288   : > { %3425 = vrot.lane.b32.xlu0 %v3404_v16, %s4456_s17  ;;  %v2126_v51 = vmax.f32 %v2106_v7, 0.0  ;;  %v2107_v52 = vadd.f32 %v5194_v50, %v2080_v36  ;;  %v3281_v14 = vor.u32 %v3280_v40, %v3276_v33  ;;  %v3283_v0 = vshll.u32 %v5322_v61, 16  ;;  %v2554_v16 = vld [vmem:[#allocation3 + $0x3c] sm:$0xf]  ;;  %4201 = vmatpush3.bf16.msra.mxu1 %v4406_v57 }
 0x289   : > { %v2209_v54 = vsel %vm5360_vm4, %v2128_v41, 0.0  ;;  %v2129_v56 = vmax.f32 %v2109_v47, 0.0  ;;  %v3148_v62 = vsel %vm1505_vm9, %v3146_v26, %v3147_v43  ;;  %v3401_v3 = vsel %vm1505_vm9, %v3399_v2, %v3400_v53  ;;  %4202 = vmatprep.subr.bf16.mxu1 %v4407_v5  ;;  %v2594_v38 = vld [vmem:[#allocation3 + $0x1c] sm:$0xf] }
 0x28a   : > { %v4134_v1 = vpack.c.bf16 %v2209_v54, %v2209_v54  ;;  %v2207_v42 = vsel %vm5373_vm7, %v2126_v51, 0.0  ;;  %v2127_v46 = vmax.f32 %v2107_v52, 0.0  ;;  %v3285_v61 = vrot.slane %v3283_v0, 1  ;;  %v2558_v52 = vld [vmem:[#allocation3 + $0x44] sm:$0x1] }
 0x28b   : > { %v4132_v6 = vpack.c.bf16 %v2207_v42, %v2207_v42  ;;  %v2210_v34 = vsel %vm5360_vm4, %v2129_v56, 0.0  ;;  %3169 = vrot.lane.b32.xlu1 %v3148_v62, %s4463_s25  ;;  %v2788_v10 = vshrl.u32 %v5344_v17, 16  ;;  %v2790_v31 = vshll.u32 %v5344_v17, 16  ;;  %v2551_v0 = vld [vmem:[#allocation3 + $0x38] sm:$0x1] }
 0x28c   : > { %3171 = vrot.lane.b32.xlu0 %v3151_v49, %s4463_s25  ;;  %v2400_v2 = vshrl.u32 %v4134_v1, 16  ;;  %v2403_v12 = vshll.u32 %v4134_v1, 16  ;;  %v4135_v13 = vpack.c.bf16 %v2210_v34, %v2210_v34  ;;  %v2208_v15 = vsel %vm5373_vm7, %v2127_v46, 0.0  ;;  %v5409_v49 = vld [vmem:[#allocation3 + $0x20] ss:$0 sps:$4 sm:$0x11]   ;;  %4203 = vmatpush3.bf16.msra.mxu1 %v4407_v5  ;;  %vm5510_vm7 = vmand %vm2156_vm1, %vm2166_vm2 }
 0x28d   : > { %v2383_v20 = vshrl.u32 %v4132_v6, 16  ;;  %v2386_v22 = vshll.u32 %v4132_v6, 16  ;;  %v4133_v23 = vpack.c.bf16 %v2208_v15, %v2208_v15  ;;  %v3286_v25 = vsel %vm1364_vm10, %v3281_v14, %v3285_v61  ;;  %v2615_v1 = vld [vmem:[#allocation3 + $0x18] sm:$0xe] }
 0x28e   : > { %v2402_v26 = vrot.slane %v2400_v2, 7  ;;  %v2408_v28 = vshrl.u32 %v4135_v13, 16  ;;  %v2411_v30 = vshll.u32 %v4135_v13, 16  ;;  %v2795_v36 = vshll.u32 %v5336_v9, 16  ;;  %v2593_v61 = vld [vmem:[#allocation3 + $0x18] sm:$0xf] }
 0x28f   : > { %v2385_v33 = vrot.slane %v2383_v20, 7  ;;  %v2391_v35 = vshrl.u32 %v4133_v23, 16  ;;  %v2394_v7 = vshll.u32 %v4133_v23, 16  ;;  %3361 = vrot.lane.b32.xlu1 %v3286_v25, %s4465_s23  ;;  %v2792_v47 = vrot.slane %v2790_v31, 1 }
 0x290   : > { %3423 = vrot.lane.b32.xlu0 %v3401_v3, %s4456_s17  ;;  %v2405_v40 = vor.u32 %v2403_v12, %v2402_v26  ;;  %v2406_v41 = vrot.slane %v2402_v26, 4  ;;  %v2410_v19 = vrot.slane %v2408_v28, 7  ;;  %v2797_v14 = vrot.slane %v2795_v36, 1 }
 0x291   : > { %v2388_v43 = vor.u32 %v2386_v22, %v2385_v33  ;;  %v2389_v51 = vrot.slane %v2385_v33, 4  ;;  %v2393_v53 = vrot.slane %v2391_v35, 7  ;;  %v2793_v9 = vor.u32 %v2792_v47, %v2788_v10 }
 0x292   : > { %v2555_v54 = vsel %vm5207_vm8, %v2405_v40, %v2554_v16  ;;  %v2413_v56 = vor.u32 %v2411_v30, %v2410_v19  ;;  %v2415_v62 = vrot.slane %v2410_v19, 4  ;;  %v4052_v57 = vcombine.low %v2615_v1, %v2594_v38  ;;  %v4408_v16 = vld [vmem:[%s5938_s5 + $0x10] ss:$0 sps:$4 sm:$0x33]  }
 0x293   : > { %2556 = vst [vmem:[#allocation3 + $0x3c] sm:$0xf] %v2555_v54  ;;  %v2548_v42 = vsel %vm5207_vm8, %v2388_v43, %v2547_v27  ;;  %v2396_v46 = vor.u32 %v2394_v7, %v2393_v53  ;;  %v2398_v3 = vrot.slane %v2393_v53, 4  ;;  %v2798_v34 = vsel %vm1364_vm10, %v2793_v9, %v2797_v14  ;;  %4223 = vmatprep.subr.msk.bf16.mxu1 %vm3608_vm6, %v4408_v16 }
 0x294   : > { %2549 = vst [vmem:[#allocation3 + $0x30] sm:$0xf] %v2548_v42  ;;  %v2414_v6 = vsel %vm5212_vm11, %v2406_v41, %v2413_v56  ;;  %v2559_v5 = vsel %vm5218_vm0, %v2415_v62, %v2558_v52  ;;  %v2894_v10 = vrot.slane %v5409_v49, 1  ;;  %2853 = vrot.lane.b32.xlu1 %v2798_v34, %s4464_s26  ;;  %v2893_v13 = vrot.slane %v4052_v57, 1 }
 0x295   : > { %2557 = vst.msk [vmem:[#allocation3 + $0x40] sm:$0xf] %vm2219_vm5, %v2414_v6  ;;  %2560 = vst [vmem:[#allocation3 + $0x44] sm:$0x1] %v2559_v5  ;;  %v2397_v2 = vsel %vm5212_vm11, %v2389_v51, %v2396_v46  ;;  %v2552_v12 = vsel %vm5218_vm0, %v2398_v3, %v2551_v0  ;;  %v5427_v15 = vcombine.low %v2593_v61, %v2594_v38  ;;  %v3020_v20 = vshrl.u32 %v5320_v59, 16 }
 0x296   : > { %2550 = vst.msk [vmem:[#allocation3 + $0x34] sm:$0xf] %vm2219_vm5, %v2397_v2  ;;  %2553 = vst [vmem:[#allocation3 + $0x38] sm:$0x1] %v2552_v12  ;;  %v3024_v22 = vrot.slane %v3022_v4, 1  ;;  %v3027_v23 = vshll.u32 %v5353_v32, 16  ;;  %v2895_v27 = vsel %vm1505_vm9, %v2893_v13, %v2894_v10  ;;  %v3037_v28 = vor.u32 %v5334_v8, %v3032_v63 }
 0x297   : > { %v3039_v25 = vshll.u32 %v5346_v18, 16  ;;  %v3268_v26 = vrot.slane %v3266_v60, 1  ;;  %v5445_v30 = vadd.s32 6, %v5183_v44  ;;  %2915 = vrot.lane.b32.xlu0 %v2895_v27, %s4455_s16  ;;  %v3271_v32 = vshll.u32 %v5367_v39, 16 }
 0x298   : > { %v3025_v59 = vor.u32 %v3024_v22, %v3020_v20  ;;  %v3029_v4 = vrot.slane %v3027_v23, 1  ;;  %v2778_v18 = vshll.u32 %v5427_v15, 16  ;;  %v3264_v31 = vshrl.u32 %v5318_v55, 16 }
 0x299   : > { %v3041_v60 = vrot.slane %v3039_v25, 1  ;;  %v2783_v33 = vshll.u32 %v5409_v49, 16  ;;  %v2776_v63 = vshrl.u32 %v5427_v15, 16  ;;  %v5459_v55 = vadd.s32 9, %v5183_v44 }
 0x29a   : > { %v3030_v37 = vsel %vm1364_vm10, %v3025_v59, %v3029_v4  ;;  %v2780_v8 = vrot.slane %v2778_v18, 1  ;;  %v3269_v7 = vor.u32 %v3268_v26, %v3264_v31  ;;  %v3610_v39 = vsel %vm3608_vm6, %v4408_v16, 0  ;;  %v2661_v41 = vld [vmem:[#allocation3 + $0x3c] sm:$0xf] }
 0x29b   : > { %3105 = vrot.lane.b32.xlu1 %v3030_v37, %s4454_s27  ;;  %v3042_v35 = vsel %vm1364_vm10, %v3037_v28, %v3041_v60  ;;  %v3273_v36 = vrot.slane %v3271_v32, 1  ;;  %v2785_v40 = vrot.slane %v2783_v33, 1  ;;  %vm2155_vm3 = vcmp.ge.s32.totalorder %v5445_v30, 0  ;;  %4205 = vmatpush3.bf16.msra.mxu1 %v3610_v39  ;;  %v2630_v47 = vld [vmem:[#allocation3 + $0x3c] sm:$0xf] }
 0x29c   : > { %3107 = vrot.lane.b32.xlu0 %v3042_v35, %s4454_s27  ;;  %v2781_v38 = vor.u32 %v2780_v8, %v2776_v63  ;;  %v2662_v19 = vld [vmem:[#allocation3 + $0x40] sm:$0xf]  ;;  %vm2165_vm4 = vcmp.lt.s32.totalorder %v5445_v30, 16  ;;  %v2682_v51 = vld [vmem:[#allocation3 + $0x3c] sm:$0xe]  ;;  %v5470_v56 = vadd.s32 8, %v5183_v44 }
 0x29d   : > { %v2631_v49 = vld [vmem:[#allocation3 + $0x40] sm:$0xf]  ;;  %v5464_v43 = vld [vmem:[#allocation3 + $0x34] sm:$0xf]  ;;  %v4101_v54 = vcombine.low %v2682_v51, %v2662_v19  ;;  %v3274_v62 = vsel %vm1364_vm10, %v3269_v7, %v3273_v36  ;;  %v5474_v0 = vcombine.low %v2661_v41, %v2662_v19  ;;  %v2659_v9 = vld [vmem:[#allocation3 + $0x30] sm:$0xf] }
 0x29e   : > { %v2786_v52 = vsel %vm1364_vm10, %v2781_v38, %v2785_v40  ;;  %v2629_v53 = vld [vmem:[#allocation3 + $0x34] sm:$0xf]  ;;  %v5467_v14 = vld [vmem:[#allocation3 + $0x44] ss:$0 sps:$4 sm:$0x11]   ;;  %v5477_v46 = vcombine.low %v2630_v47, %v2631_v49  ;;  %v5483_v2 = vcombine.low %v2659_v9, %v5464_v43  ;;  %vm5526_vm6 = vmand %vm2155_vm3, %vm2165_vm4  ;;  %vm2158_vm1 = vcmp.ge.s32.totalorder %v5459_v55, 0 }
 0x29f   : > { %2851 = vrot.lane.b32.xlu1 %v2786_v52, %s4464_s26  ;;  %v2600_v1 = vld [vmem:[#allocation3 + $0x40] sm:$0xf]  ;;  %v2618_v42 = vld [vmem:[#allocation3 + $0x3c] sm:$0xe]  ;;  %v2628_v3 = vld [vmem:[#allocation3 + $0x30] sm:$0xf] }
 0x2a0   : > { %3359 = vrot.lane.b32.xlu0 %v3274_v62, %s4465_s23  ;;  %v3408_v57 = vrot.slane %v4101_v54, 1  ;;  %v3409_v6 = vrot.slane %v5467_v14, 1  ;;  %v2599_v5 = vld [vmem:[#allocation3 + $0x3c] sm:$0xf]  ;;  %v4055_v34 = vcombine.low %v2618_v42, %v2600_v1  ;;  %v5491_v23 = vcombine.low %v2628_v3, %v2629_v53  ;;  %v2649_v28 = vld [vmem:[#allocation3 + $0x30] sm:$0xe] }
 0x2a1   : > { %v5480_v44 = vld [vmem:[#allocation3 + $0x44] ss:$0 sps:$4 sm:$0x11]   ;;  %v2650_v61 = vld [vmem:[#allocation3 + $0x3c] sm:$0xe]  ;;  %v5494_v27 = vcombine.low %v2599_v5, %v2600_v1  ;;  %v4077_v8 = vcombine.low %v2649_v28, %v2629_v53  ;;  %v3300_v51 = vshrl.u32 %v5474_v0, 16 }
 0x2a2   : > { %v4194_v10 = vpop.f32.mrb[12].mxu0  ;;  %v2902_v12 = vrot.slane %v4055_v34, 1  ;;  %v2903_v13 = vrot.slane %v5480_v44, 1  ;;  %v5486_v16 = vld [vmem:[#allocation3 + $0x44] ss:$0 sps:$4 sm:$0x11]   ;;  %v4078_v20 = vcombine.low %v2650_v61, %v2631_v49  ;;  %v3410_v26 = vsel %vm1505_vm9, %v3408_v57, %v3409_v6 }
 0x2a3   : > { %3229 = vrot.lane.b32.xlu1 %v5474_v0, %s4453_s15  ;;  %v2085_v22 = vmul.f32 %v4194_v10, %v5189_v48  ;;  %v2033_v25 = vpop.f32.mrb[13].mxu0  ;;  %v5496_v59 = vld [vmem:[#allocation3 + $0x38] ss:$0 sps:$4 sm:$0x11]   ;;  %v3156_v60 = vrot.slane %v5486_v16, 1  ;;  %v3152_v49 = vrot.slane %v4077_v8, 1 }
 0x2a4   : > { %2975 = vrot.lane.b32.xlu0 %v5477_v46, %s4462_s12  ;;  %v2083_v4 = vmul.f32 %v5189_v48, %v2033_v25  ;;  %v4195_v32 = vpop.f32.mrb[14].mxu0  ;;  %v2904_v18 = vsel %vm1505_vm9, %v2902_v12, %v2903_v13  ;;  %v3155_v31 = vrot.slane %v4078_v20, 1  ;;  %v3153_v35 = vrot.slane %v5496_v59, 1  ;;  %v2681_v7 = vld [vmem:[#allocation3 + $0x30] sm:$0xe] }
 0x2a5   : > { %v2112_v33 = vadd.f32 %v5194_v50, %v2085_v22  ;;  %v2086_v37 = vmul.f32 %v4195_v32, %v5189_v48  ;;  %v2036_v63 = vpop.f32.mrb[15].mxu0  ;;  %v5517_v41 = vld [vmem:[#allocation3 + $0x38] ss:$0 sps:$4 sm:$0x11]   ;;  %v4100_v19 = vcombine.low %v2681_v7, %v5464_v43  ;;  %v3302_v1 = vshll.u32 %v5474_v0, 16 }
 0x2a6   : > { %v2110_v36 = vadd.f32 %v5194_v50, %v2083_v4  ;;  %v2084_v38 = vmul.f32 %v5189_v48, %v2036_v63  ;;  %v3157_v40 = vsel %vm1505_vm9, %v3155_v31, %v3156_v60  ;;  %v3406_v54 = vrot.slane %v5517_v41, 1  ;;  %v2568_v32 = vld [vmem:[#allocation3 + $0x54] sm:$0xf]  ;;  %v2572_v39 = vld [vmem:[#allocation3 + $0x5c] sm:$0x1] }
 0x2a7   : > { %v2132_v47 = vmax.f32 %v2112_v33, 0.0  ;;  %2973 = vrot.lane.b32.xlu1 %v5491_v23, %s4462_s12  ;;  %v2113_v48 = vadd.f32 %v5194_v50, %v2086_v37  ;;  %v3405_v53 = vrot.slane %v4100_v19, 1  ;;  %v3154_v9 = vsel %vm1505_vm9, %v3152_v49, %v3153_v35  ;;  %v2561_v37 = vld [vmem:[#allocation3 + $0x48] sm:$0xf] }
 0x2a8   : > { %3227 = vrot.lane.b32.xlu0 %v5483_v2, %s4453_s15  ;;  %v2130_v43 = vmax.f32 %v2110_v36, 0.0  ;;  %v2111_v52 = vadd.f32 %v5194_v50, %v2084_v38  ;;  %v3304_v34 = vrot.slane %v3302_v1, 1  ;;  %v3307_v61 = vshll.u32 %v5467_v14, 16  ;;  %v2598_v38 = vld [vmem:[#allocation3 + $0x34] sm:$0xf] }
 0x2a9   : > { %v2213_v30 = vsel %vm5510_vm7, %v2132_v47, 0.0  ;;  %v2133_v62 = vmax.f32 %v2113_v48, 0.0  ;;  %v3407_v6 = vsel %vm1505_vm9, %v3405_v53, %v3406_v54  ;;  %v2812_v8 = vshrl.u32 %v5494_v27, 16  ;;  %v5555_v49 = vld [vmem:[#allocation3 + $0x38] ss:$0 sps:$4 sm:$0x11]  }
 0x2aa   : > { %v4138_v42 = vpack.c.bf16 %v2213_v30, %v2213_v30  ;;  %v2211_v3 = vsel %vm5526_vm6, %v2130_v43, 0.0  ;;  %v2131_v57 = vmax.f32 %v2111_v52, 0.0  ;;  %v3305_v28 = vor.u32 %v3304_v34, %v3300_v51  ;;  %v2565_v53 = vld [vmem:[#allocation3 + $0x50] sm:$0x1]  ;;  %v2617_v1 = vld [vmem:[#allocation3 + $0x30] sm:$0xe] }
 0x2ab   : > { %v4136_v5 = vpack.c.bf16 %v2211_v3, %v2211_v3  ;;  %v2214_v50 = vsel %vm5510_vm7, %v2133_v62, 0.0  ;;  %2921 = vrot.lane.b32.xlu1 %v2904_v18, %s4455_s16  ;;  %v3309_v18 = vrot.slane %v3307_v61, 1  ;;  %v2814_v48 = vshll.u32 %v5494_v27, 16  ;;  %v2597_v61 = vld [vmem:[#allocation3 + $0x30] sm:$0xf] }
 0x2ac   : > { %v2434_v10 = vshrl.u32 %v4138_v42, 16  ;;  %v2437_v12 = vshll.u32 %v4138_v42, 16  ;;  %v4139_v13 = vpack.c.bf16 %v2214_v50, %v2214_v50  ;;  %v2212_v0 = vsel %vm5526_vm6, %v2131_v57, 0.0  ;;  %3429 = vrot.lane.b32.xlu0 %v3410_v26, %s4456_s17 }
 0x2ad   : > { %v2417_v20 = vshrl.u32 %v4136_v5, 16  ;;  %v2420_v22 = vshll.u32 %v4136_v5, 16  ;;  %v4137_v25 = vpack.c.bf16 %v2212_v0, %v2212_v0  ;;  %v3310_v36 = vsel %vm1364_vm10, %v3305_v28, %v3309_v18 }
 0x2ae   : > { %v2436_v4 = vrot.slane %v2434_v10, 7  ;;  %v2442_v31 = vshrl.u32 %v4139_v13, 16  ;;  %v2445_v60 = vshll.u32 %v4139_v13, 16  ;;  %v2819_v54 = vshll.u32 %v5480_v44, 16 }
 0x2af   : > { %v2419_v33 = vrot.slane %v2417_v20, 7  ;;  %v2425_v14 = vshrl.u32 %v4137_v25, 16  ;;  %v2428_v63 = vshll.u32 %v4137_v25, 16  ;;  %3173 = vrot.lane.b32.xlu1 %v3154_v9, %s4463_s25  ;;  %v2816_v9 = vrot.slane %v2814_v48, 1 }
 0x2b0   : > { %v2439_v35 = vor.u32 %v2437_v12, %v2436_v4  ;;  %v2440_v7 = vrot.slane %v2436_v4, 4  ;;  %v2444_v26 = vrot.slane %v2442_v31, 7  ;;  %3175 = vrot.lane.b32.xlu0 %v3157_v40, %s4463_s25  ;;  %v2821_v44 = vrot.slane %v2819_v54, 1 }
 0x2b1   : > { %v2422_v19 = vor.u32 %v2420_v22, %v2419_v33  ;;  %v2423_v47 = vrot.slane %v2419_v33, 4  ;;  %v2427_v29 = vrot.slane %v2425_v14, 7  ;;  %v4054_v57 = vcombine.low %v2617_v1, %v2598_v38 }
 0x2b2   : > { %v2569_v51 = vsel %vm5207_vm8, %v2439_v35, %v2568_v32  ;;  %v2447_v43 = vor.u32 %v2445_v60, %v2444_v26  ;;  %v2449_v52 = vrot.slane %v2444_v26, 4  ;;  %v2817_v34 = vor.u32 %v2816_v9, %v2812_v8 }
 0x2b3   : > { %2570 = vst [vmem:[#allocation3 + $0x54] sm:$0xf] %v2569_v51  ;;  %v2562_v40 = vsel %vm5207_vm8, %v2422_v19, %v2561_v37  ;;  %v2430_v30 = vor.u32 %v2428_v63, %v2427_v29  ;;  %v2432_v62 = vrot.slane %v2427_v29, 4  ;;  %3365 = vrot.lane.b32.xlu1 %v3310_v36, %s4465_s23  ;;  %v2900_v10 = vrot.slane %v5555_v49, 1 }
 0x2b4   : > { %2563 = vst [vmem:[#allocation3 + $0x48] sm:$0xf] %v2562_v40  ;;  %v2448_v42 = vsel %vm5212_vm11, %v2440_v7, %v2447_v43  ;;  %v2573_v3 = vsel %vm5218_vm0, %v2449_v52, %v2572_v39  ;;  %3427 = vrot.lane.b32.xlu0 %v3407_v6, %s4456_s17  ;;  %v2899_v12 = vrot.slane %v4054_v57, 1  ;;  %v5575_v6 = vcombine.low %v2597_v61, %v2598_v38  ;;  %v4409_v40 = vld [vmem:[%s5936_s3] ss:$0 sm:$0xff] }
 0x2b5   : > { %2571 = vst.msk [vmem:[#allocation3 + $0x58] sm:$0xf] %vm2219_vm5, %v2448_v42  ;;  %2574 = vst [vmem:[#allocation3 + $0x5c] sm:$0x1] %v2573_v3  ;;  %v2431_v5 = vsel %vm5212_vm11, %v2423_v47, %v2430_v30  ;;  %v2566_v50 = vsel %vm5218_vm0, %v2432_v62, %v2565_v53  ;;  %v3046_v13 = vshll.u32 %v5491_v23, 16  ;;  %v2822_v0 = vsel %vm1364_vm10, %v2817_v34, %v2821_v44 }
 0x2b6   : > { %2564 = vst.msk [vmem:[#allocation3 + $0x4c] sm:$0xf] %vm2219_vm5, %v2431_v5  ;;  %2567 = vst [vmem:[#allocation3 + $0x50] sm:$0x1] %v2566_v50  ;;  %v3051_v20 = vshll.u32 %v5496_v59, 16  ;;  %v3058_v22 = vshll.u32 %v5477_v46, 16  ;;  %v2901_v25 = vsel %vm1505_vm9, %v2899_v12, %v2900_v10 }
 0x2b7   : > { %vm2168_vm2 = vcmp.lt.s32.totalorder %v5459_v55, 16  ;;  %2857 = vrot.lane.b32.xlu1 %v2822_v0, %s4464_s26  ;;  %v3044_v28 = vshrl.u32 %v5491_v23, 16  ;;  %v3048_v4 = vrot.slane %v3046_v13, 1  ;;  %v3063_v32 = vshll.u32 %v5486_v16, 16  ;;  %v4410_v13 = vld [vmem:[%s5937_s4] ss:$0 sm:$0xff] }
 0x2b8   : > { %2919 = vrot.lane.b32.xlu0 %v2901_v25, %s4455_s16  ;;  %v3056_v31 = vshrl.u32 %v5477_v46, 16  ;;  %v3060_v59 = vrot.slane %v3058_v22, 1  ;;  %v3288_v60 = vshrl.u32 %v5483_v2, 16  ;;  %v3290_v18 = vshll.u32 %v5483_v2, 16  ;;  %vm5627_vm7 = vmand %vm2158_vm1, %vm2168_vm2 }
 0x2b9   : > { %vm2157_vm3 = vcmp.ge.s32.totalorder %v5470_v56, 0  ;;  %v3049_v33 = vor.u32 %v3048_v4, %v3044_v28  ;;  %v3053_v37 = vrot.slane %v3051_v20, 1  ;;  %v3295_v14 = vshll.u32 %v5517_v41, 16 }
 0x2ba   : > { %v2802_v23 = vshll.u32 %v5575_v6, 16  ;;  %v3061_v63 = vor.u32 %v3060_v59, %v3056_v31  ;;  %v3065_v8 = vrot.slane %v3063_v32, 1  ;;  %v3292_v16 = vrot.slane %v3290_v18, 1  ;;  %v2665_v41 = vld [vmem:[#allocation3 + $0x54] sm:$0xf] }
 0x2bb   : > { %v2807_v35 = vshll.u32 %v5555_v49, 16  ;;  %v3054_v46 = vsel %vm1364_vm10, %v3049_v33, %v3053_v37  ;;  %v2800_v7 = vshrl.u32 %v5575_v6, 16  ;;  %vm2167_vm4 = vcmp.lt.s32.totalorder %v5470_v56, 16  ;;  %v2634_v48 = vld [vmem:[#allocation3 + $0x54] sm:$0xf] }
 0x2bc   : > { %v2804_v26 = vrot.slane %v2802_v23, 1  ;;  %3109 = vrot.lane.b32.xlu1 %v3054_v46, %s4454_s27  ;;  %v3066_v2 = vsel %vm1364_vm10, %v3061_v63, %v3065_v8  ;;  %v3293_v39 = vor.u32 %v3292_v16, %v3288_v60  ;;  %v2666_v36 = vld [vmem:[#allocation3 + $0x58] sm:$0xf]  ;;  %v3297_v19 = vrot.slane %v3295_v14, 1  ;;  %v2684_v43 = vld [vmem:[#allocation3 + $0x54] sm:$0xe]  ;;  %vm5642_vm6 = vmand %vm2157_vm3, %vm2167_vm4 }
 0x2bd   : > { %v5600_v38 = vld [vmem:[#allocation3 + $0x58] sm:$0xf]  ;;  %3111 = vrot.lane.b32.xlu0 %v3066_v2, %s4454_s27  ;;  %v2809_v29 = vrot.slane %v2807_v35, 1  ;;  %v5603_v49 = vld [vmem:[#allocation3 + $0x4c] sm:$0xf]  ;;  %v5608_v54 = vcombine.low %v2665_v41, %v2666_v36  ;;  %v4103_v3 = vcombine.low %v2684_v43, %v2666_v36 }
 0x2be   : > { %v2805_v47 = vor.u32 %v2804_v26, %v2800_v7  ;;  %v5605_v52 = vld [vmem:[#allocation3 + $0x5c] ss:$0 sps:$4 sm:$0x11]   ;;  %v2663_v9 = vld [vmem:[#allocation3 + $0x48] sm:$0xf]  ;;  %v3298_v57 = vsel %vm1364_vm10, %v3293_v39, %v3297_v19  ;;  %v5616_v5 = vcombine.low %v2634_v48, %v5600_v38 }
 0x2bf   : > { %v4198_v51 = vpop.f32.mrb[16].mxu0  ;;  %v2632_v1 = vld [vmem:[#allocation3 + $0x48] sm:$0xf]  ;;  %v2633_v42 = vld [vmem:[#allocation3 + $0x4c] sm:$0xf]  ;;  %v3415_v61 = vrot.slane %v5605_v52, 1  ;;  %v5634_v60 = vcombine.low %v2663_v9, %v5603_v49 }
 0x2c0   : > { %v2810_v53 = vsel %vm1364_vm10, %v2805_v47, %v2809_v29  ;;  %v2089_v30 = vmul.f32 %v4409_v40, %v4198_v51  ;;  %v2049_v62 = vpop.f32.mrb[17].mxu0  ;;  %v2604_v44 = vld [vmem:[#allocation3 + $0x58] sm:$0xf]  ;;  %v2603_v10 = vld [vmem:[#allocation3 + $0x54] sm:$0xf]  ;;  %v3414_v28 = vrot.slane %v4103_v3, 1  ;;  %v5636_v18 = vcombine.low %v2632_v1, %v2633_v42 }
 0x2c1   : > { %2855 = vrot.lane.b32.xlu1 %v2810_v53, %s4464_s26  ;;  %v2087_v50 = vmul.f32 %v4409_v40, %v2049_v62  ;;  %v4199_v34 = vpop.f32.mrb[18].mxu0  ;;  %v2620_v12 = vld [vmem:[#allocation3 + $0x54] sm:$0xe]  ;;  %3363 = vrot.lane.b32.xlu0 %v3298_v57, %s4465_s23  ;;  %v5631_v4 = vld [vmem:[#allocation3 + $0x5c] ss:$0 sps:$4 sm:$0x11]   ;;  %v5646_v23 = vcombine.low %v2603_v10, %v2604_v44 }
 0x2c2   : > { %v2116_v0 = vadd.f32 %v4410_v13, %v2089_v30  ;;  %v2090_v22 = vmul.f32 %v4409_v40, %v4199_v34  ;;  %v2052_v25 = vpop.f32.mrb[19].mxu0  ;;  %v4057_v32 = vcombine.low %v2620_v12, %v2604_v44  ;;  %v2652_v33 = vld [vmem:[#allocation3 + $0x54] sm:$0xe]  ;;  %v5648_v8 = vld [vmem:[#allocation3 + $0x5c] ss:$0 sps:$4 sm:$0x11]   ;;  %v3416_v39 = vsel %vm1505_vm9, %v3414_v28, %v3415_v61 }
 0x2c3   : > { %v2114_v31 = vadd.f32 %v4410_v13, %v2087_v50  ;;  %v2088_v59 = vmul.f32 %v4409_v40, %v2052_v25  ;;  %v2909_v46 = vrot.slane %v5631_v4, 1  ;;  %v4080_v7 = vcombine.low %v2652_v33, %v5600_v38  ;;  %v2651_v56 = vld [vmem:[#allocation3 + $0x48] sm:$0xe]  ;;  %v5662_v48 = vld [vmem:[#allocation3 + $0x50] ss:$0 sps:$4 sm:$0x11]  }
 0x2c4   : > { %v2136_v37 = vmax.f32 %v2116_v0, 0.0  ;;  %v2117_v14 = vadd.f32 %v4410_v13, %v2090_v22  ;;  %v2908_v63 = vrot.slane %v4057_v32, 1  ;;  %v4079_v41 = vcombine.low %v2651_v56, %v2633_v42  ;;  %v5671_v1 = vld [vmem:[#allocation3 + $0x50] ss:$0 sps:$4 sm:$0x11]  }
 0x2c5   : > { %3233 = vrot.lane.b32.xlu1 %v5608_v54, %s4453_s15  ;;  %v2134_v16 = vmax.f32 %v2114_v31, 0.0  ;;  %v2115_v35 = vadd.f32 %v4410_v13, %v2088_v59  ;;  %2979 = vrot.lane.b32.xlu0 %v5616_v5, %s4462_s12  ;;  %v3162_v29 = vrot.slane %v5648_v8, 1  ;;  %v3161_v53 = vrot.slane %v4080_v7, 1  ;;  %v2683_v12 = vld [vmem:[#allocation3 + $0x48] sm:$0xe] }
 0x2c6   : > { %v2217_v26 = vsel %vm5627_vm7, %v2136_v37, 0.0  ;;  %v2137_v2 = vmax.f32 %v2117_v14, 0.0  ;;  %v2910_v43 = vsel %vm1505_vm9, %v2908_v63, %v2909_v46  ;;  %v3158_v9 = vrot.slane %v4079_v41, 1  ;;  %v2582_v13 = vld [vmem:[#allocation3 + $0x6c] sm:$0xf] }
 0x2c7   : > { %v4142_v36 = vpack.c.bf16 %v2217_v26, %v2217_v26  ;;  %v2215_v19 = vsel %vm5642_vm6, %v2134_v16, 0.0  ;;  %v2135_v47 = vmax.f32 %v2115_v35, 0.0  ;;  %v3159_v10 = vrot.slane %v5662_v48, 1  ;;  %v2575_v31 = vld [vmem:[#allocation3 + $0x60] sm:$0xf] }
 0x2c8   : > { %v4140_v38 = vpack.c.bf16 %v2215_v19, %v2215_v19  ;;  %v2218_v51 = vsel %vm5627_vm7, %v2137_v2, 0.0  ;;  %v4102_v25 = vcombine.low %v2683_v12, %v5603_v49  ;;  %v2586_v14 = vld [vmem:[#allocation3 + $0x74] sm:$0x1]  ;;  %v2579_v7 = vld [vmem:[#allocation3 + $0x68] sm:$0x1]  ;;  %v3412_v56 = vrot.slane %v5671_v1, 1 }
 0x2c9   : > { %v2468_v40 = vshrl.u32 %v4142_v36, 16  ;;  %v4143_v30 = vpack.c.bf16 %v2218_v51, %v2218_v51  ;;  %v2216_v62 = vsel %vm5642_vm6, %v2135_v47, 0.0  ;;  %2977 = vrot.lane.b32.xlu1 %v5636_v18, %s4462_s12  ;;  %v2471_v42 = vshll.u32 %v4142_v36, 16  ;;  %3231 = vrot.lane.b32.xlu0 %v5634_v60, %s4453_s15  ;;  %v2602_v19 = vld [vmem:[#allocation3 + $0x4c] sm:$0xf] }
 0x2ca   : > { %v2451_v3 = vshrl.u32 %v4140_v38, 16  ;;  %v2454_v44 = vshll.u32 %v4140_v38, 16  ;;  %v4141_v57 = vpack.c.bf16 %v2216_v62, %v2216_v62  ;;  %v3160_v33 = vsel %vm1505_vm9, %v3158_v9, %v3159_v10  ;;  %v5693_v11 = vld [vmem:[#allocation3 + $0x50] ss:$0 sps:$4 sm:$0x11]  }
 0x2cb   : > { %v2470_v50 = vrot.slane %v2468_v40, 7  ;;  %v2476_v34 = vshrl.u32 %v4143_v30, 16  ;;  %v2479_v61 = vshll.u32 %v4143_v30, 16  ;;  %v3411_v16 = vrot.slane %v4102_v25, 1 }
 0x2cc   : > { %v2453_v0 = vrot.slane %v2451_v3, 7  ;;  %v2459_v20 = vshrl.u32 %v4141_v57, 16  ;;  %v2462_v22 = vshll.u32 %v4141_v57, 16  ;;  %v3326_v36 = vshll.u32 %v5608_v54, 16 }
 0x2cd   : > { %v2473_v28 = vor.u32 %v2471_v42, %v2470_v50  ;;  %v2474_v32 = vrot.slane %v2470_v50, 4  ;;  %v2478_v59 = vrot.slane %v2476_v34, 7  ;;  %2925 = vrot.lane.b32.xlu1 %v2910_v43, %s4455_s16  ;;  %3433 = vrot.lane.b32.xlu0 %v3416_v39, %s4456_s17  ;;  %v3163_v38 = vsel %vm1505_vm9, %v3161_v53, %v3162_v29  ;;  %v2619_v53 = vld [vmem:[#allocation3 + $0x48] sm:$0xe] }
 0x2ce   : > { %v2456_v37 = vor.u32 %v2454_v44, %v2453_v0  ;;  %v2457_v55 = vrot.slane %v2453_v0, 4  ;;  %v2461_v63 = vrot.slane %v2459_v20, 7  ;;  %v3331_v51 = vshll.u32 %v5605_v52, 16 }
 0x2cf   : > { %v2583_v35 = vsel %vm5207_vm8, %v2473_v28, %v2582_v13  ;;  %v2481_v46 = vor.u32 %v2479_v61, %v2478_v59  ;;  %v2483_v49 = vrot.slane %v2478_v59, 4  ;;  %v3324_v30 = vshrl.u32 %v5608_v54, 16  ;;  %v2601_v54 = vld [vmem:[#allocation3 + $0x48] sm:$0xf] }
 0x2d0   : > { %2584 = vst [vmem:[#allocation3 + $0x6c] sm:$0xf] %v2583_v35  ;;  %v2576_v26 = vsel %vm5207_vm8, %v2456_v37, %v2575_v31  ;;  %v2464_v2 = vor.u32 %v2462_v22, %v2461_v63  ;;  %v2466_v41 = vrot.slane %v2461_v63, 4  ;;  %v3328_v29 = vrot.slane %v3326_v36, 1 }
 0x2d1   : > { %2577 = vst [vmem:[#allocation3 + $0x60] sm:$0xf] %v2576_v26  ;;  %v2482_v39 = vsel %vm5212_vm11, %v2474_v32, %v2481_v46  ;;  %v2587_v47 = vsel %vm5218_vm0, %v2483_v49, %v2586_v14  ;;  %3177 = vrot.lane.b32.xlu1 %v3160_v33, %s4463_s25  ;;  %3179 = vrot.lane.b32.xlu0 %v3163_v38, %s4463_s25  ;;  %v2838_v52 = vshll.u32 %v5646_v23, 16  ;;  %v2843_v62 = vshll.u32 %v5631_v4, 16  ;;  %v5707_v44 = vpop.permute.xlu0 %2967 }
 0x2d2   : > { %2585 = vst.msk [vmem:[#allocation3 + $0x70] sm:$0xf] %vm2219_vm5, %v2482_v39  ;;  %2588 = vst [vmem:[#allocation3 + $0x74] sm:$0x1] %v2587_v47  ;;  %v2465_v43 = vsel %vm5212_vm11, %v2457_v55, %v2464_v2  ;;  %v2580_v40 = vsel %vm5218_vm0, %v2466_v41, %v2579_v7  ;;  %v4056_v9 = vcombine.low %v2619_v53, %v2602_v19  ;;  %v3333_v3 = vrot.slane %v3331_v51, 1 }
 0x2d3   : > { %2578 = vst.msk [vmem:[#allocation3 + $0x64] sm:$0xf] %vm2219_vm5, %v2465_v43  ;;  %2581 = vst [vmem:[#allocation3 + $0x68] sm:$0x1] %v2580_v40  ;;  %v3413_v21 = vsel %vm1505_vm9, %v3411_v16, %v3412_v56  ;;  %v3329_v42 = vor.u32 %v3328_v29, %v3324_v30  ;;  %v2836_v24 = vshrl.u32 %v5646_v23, 16  ;;  %v2840_v57 = vrot.slane %v2838_v52, 1 }
 0x2d4   : > { %v2905_v50 = vrot.slane %v4056_v9, 1  ;;  %v2906_v34 = vrot.slane %v5693_v11, 1  ;;  %v3070_v61 = vshll.u32 %v5636_v18, 16  ;;  %v5713_v10 = vcombine.low %v2601_v54, %v2602_v19 }
 0x2d5   : > { %3431 = vrot.lane.b32.xlu0 %v3413_v21, %s4456_s17  ;;  %v3334_v4 = vsel %vm1364_vm10, %v3329_v42, %v3333_v3  ;;  %v3068_v12 = vshrl.u32 %v5636_v18, 16  ;;  %v3082_v13 = vshll.u32 %v5616_v5, 16  ;;  %v2841_v0 = vor.u32 %v2840_v57, %v2836_v24 }
 0x2d6   : > { %3369 = vrot.lane.b32.xlu1 %v3334_v4, %s4465_s23  ;;  %v2845_v20 = vrot.slane %v2843_v62, 1  ;;  %v3072_v22 = vrot.slane %v3070_v61, 1  ;;  %v3087_v25 = vshll.u32 %v5648_v8, 16  ;;  %v3075_v28 = vshll.u32 %v5662_v48, 16  ;;  %v5726_v8 = vpop.permute.xlu0 %3167 }
 0x2d7   : > { %v3080_v32 = vshrl.u32 %v5616_v5, 16  ;;  %v3084_v31 = vrot.slane %v3082_v13, 1  ;;  %v3314_v59 = vshll.u32 %v5634_v60, 16  ;;  %v2907_v33 = vsel %vm1505_vm9, %v2905_v50, %v2906_v34  ;;  %v2669_v30 = vld [vmem:[#allocation3 + $0x6c] sm:$0xf] }
 0x2d8   : > { %v2846_v18 = vsel %vm1364_vm10, %v2841_v0, %v2845_v20  ;;  %v3073_v37 = vor.u32 %v3072_v22, %v3068_v12  ;;  %v2667_v63 = vld [vmem:[#allocation3 + $0x60] sm:$0xf]  ;;  %v3089_v48 = vrot.slane %v3087_v25, 1  ;;  %v3312_v5 = vshrl.u32 %v5634_v60, 16  ;;  %v2914_v12 = vpop.permute.xlu1 %2913 }
 0x2d9   : > { %2923 = vrot.lane.b32.xlu0 %v2907_v33, %s4455_s16  ;;  %v3085_v55 = vor.u32 %v3084_v31, %v3080_v32  ;;  %v3316_v14 = vrot.slane %v3314_v59, 1  ;;  %v3319_v35 = vshll.u32 %v5671_v1, 16  ;;  %v2826_v46 = vshll.u32 %v5713_v10, 16  ;;  %v2670_v38 = vld [vmem:[#allocation3 + $0x70] sm:$0xf] }
 0x2da   : > { %v2668_v16 = vld [vmem:[#allocation3 + $0x64] sm:$0xf]  ;;  %2861 = vrot.lane.b32.xlu1 %v2846_v18, %s4464_s26  ;;  %v3077_v49 = vrot.slane %v3075_v28, 1  ;;  %v2831_v7 = vshll.u32 %v5693_v11, 16  ;;  %v2824_v41 = vshrl.u32 %v5713_v10, 16  ;;  %v5737_v43 = vpop.permute.xlu0 %2911  ;;  %v4089_v62 = vcombine.low %v2669_v30, %v2670_v38 }
 0x2db   : > { %v4088_v56 = vcombine.low %v2667_v63, %v2668_v16  ;;  %v3090_v26 = vsel %vm1364_vm10, %v3085_v55, %v3089_v48  ;;  %v3317_v2 = vor.u32 %v3316_v14, %v3312_v5  ;;  %v2828_v36 = vrot.slane %v2826_v46, 1  ;;  %v4400_v19 = vld [vmem:[#allocation3 + $0x68] ss:$0 sps:$4 sm:$0x11]   ;;  %v2637_v9 = vld [vmem:[#allocation3 + $0x64] sm:$0xf] }
 0x2dc   : > { %v3078_v39 = vsel %vm1364_vm10, %v3073_v37, %v3077_v49  ;;  %v3321_v1 = vrot.slane %v3319_v35, 1  ;;  %v2833_v51 = vrot.slane %v2831_v7, 1  ;;  %v3343_v53 = vshll.u32 %v4400_v19, 16  ;;  %v2685_v42 = vld [vmem:[#allocation3 + $0x60] sm:$0xe]  ;;  %v2850_v37 = vpop.permute.xlu1 %2849 }
 0x2dd   : > { %3115 = vrot.lane.b32.xlu0 %v3090_v26, %s4454_s27  ;;  %v3338_v60 = vshll.u32 %v4088_v56, 16  ;;  %v2829_v47 = vor.u32 %v2828_v36, %v2824_v41  ;;  %v3336_v29 = vshrl.u32 %v4088_v56, 16  ;;  %v2636_v3 = vld [vmem:[#allocation3 + $0x60] sm:$0xf]  ;;  %v4104_v54 = vcombine.low %v2685_v42, %v2668_v16 }
 0x2de   : > { %3113 = vrot.lane.b32.xlu1 %v3078_v39, %s4454_s27  ;;  %v3322_v40 = vsel %vm1364_vm10, %v3317_v2, %v3321_v1  ;;  %v3345_v24 = vrot.slane %v3343_v53, 1  ;;  %v2653_v57 = vld [vmem:[#allocation3 + $0x60] sm:$0xe]  ;;  %v4065_v50 = vcombine.low %v2636_v3, %v2637_v9  ;;  %v4401_v34 = vld [vmem:[#allocation3 + $0x68] ss:$0 sps:$4 sm:$0x11]   ;;  %v3104_v13 = vpop.permute.xlu0 %3103 }
 0x2df   : > { %v3340_v11 = vrot.slane %v3338_v60, 1  ;;  %v2834_v52 = vsel %vm1364_vm10, %v2829_v47, %v2833_v51  ;;  %v4081_v61 = vcombine.low %v2653_v57, %v2637_v9  ;;  %v3350_v4 = vshll.u32 %v4089_v62, 16  ;;  %v4404_v20 = vld [vmem:[#allocation3 + $0x74] ss:$0 sps:$4 sm:$0x11]  }
 0x2e0   : > { %v3417_v22 = vrot.slane %v4104_v54, 1  ;;  %v3418_v25 = vrot.slane %v4400_v19, 1  ;;  %v3165_v32 = vrot.slane %v4401_v34, 1  ;;  %v3094_v59 = vshll.u32 %v4065_v50, 16 }
 0x2e1   : > { %3367 = vrot.lane.b32.xlu0 %v3322_v40, %s4465_s23  ;;  %v3341_v21 = vor.u32 %v3340_v11, %v3336_v29  ;;  %v3164_v28 = vrot.slane %v4081_v61, 1  ;;  %v3352_v31 = vrot.slane %v3350_v4, 1  ;;  %v3348_v33 = vshrl.u32 %v4089_v62, 16 }
 0x2e2   : > { %2859 = vrot.lane.b32.xlu1 %v2834_v52, %s4464_s26  ;;  %v3355_v18 = vshll.u32 %v4404_v20, 16  ;;  %v2848_v55 = vpop.permute.xlu0 %2847  ;;  %v3419_v14 = vsel %vm1505_vm9, %v3417_v22, %v3418_v25  ;;  %v3096_v48 = vrot.slane %v3094_v59, 1  ;;  %v3092_v35 = vshrl.u32 %v4065_v50, 16 }
 0x2e3   : > { %v3346_v0 = vsel %vm1364_vm10, %v3341_v21, %v3345_v24  ;;  %v3166_v63 = vsel %vm1505_vm9, %v3164_v28, %v3165_v32  ;;  %v3353_v16 = vor.u32 %v3352_v31, %v3348_v33  ;;  %v3099_v46 = vshll.u32 %v4401_v34, 16 }
 0x2e4   : > { %v3357_v5 = vrot.slane %v3355_v18, 1  ;;  %v3097_v2 = vor.u32 %v3096_v48, %v3092_v35  ;;  %v3421_v47 = vrot.slane %v4404_v20, 1  ;;  %vm3439_vm5 = vcmask 31744  }
 0x2e5   : > { %3235 = vrot.lane.b32.xlu0 %v4088_v56, %s4453_s15  ;;  %v2686_v56 = vld [vmem:[#allocation3 + $0x6c] sm:$0xe]  ;;  %v3101_v36 = vrot.slane %v3099_v46, 1  ;;  %v3441_v52 = vsel %vm3439_vm5, %v5244_v45, %v2848_v55  ;;  %v3443_v21 = vsel %vm3439_vm5, %v5238_v58, %v2850_v37  ;;  %vm3538_vm8 = vcmask 228352  }
 0x2e6   : > { %3237 = vrot.lane.b32.xlu1 %v4089_v62, %s4453_s15  ;;  %v3358_v26 = vsel %vm1364_vm10, %v3353_v16, %v3357_v5  ;;  %v4105_v41 = vcombine.low %v2686_v56, %v2670_v38  ;;  %v3457_v9 = vsel %vm1722_vm12, %v3441_v52, %v5737_v43  ;;  %v3459_v24 = vsel %vm1722_vm12, %v3443_v21, %v2914_v12 }
 0x2e7   : > { %v3102_v60 = vsel %vm1364_vm10, %v3097_v2, %v3101_v36  ;;  %vm3472_vm10 = vcmask 97280   ;;  %vm3591_vm11 = vcmask 293888  }
 0x2e8   : > { %v3420_v1 = vrot.slane %v4105_v41, 1  ;;  %v3474_v3 = vsel %vm3472_vm10, %v3457_v9, %v5707_v44 }
 0x2e9   : > { %3371 = vrot.lane.b32.xlu0 %v3346_v0, %s4465_s23 }
 0x2ea   : > { %2981 = vrot.lane.b32.xlu1 %v4065_v50, %s4462_s12  ;;  %v3422_v40 = vsel %vm1505_vm9, %v3420_v1, %v3421_v47  ;;  %v3490_v50 = vsel %vm1743_vm13, %v3474_v3, %v3104_v13  ;;  %vm3505_vm9 = vcmask 162816  }
 0x2eb   : > { %v3507_v61 = vsel %vm3505_vm9, %v3490_v50, %v5726_v8 }
 0x2ed   : > { %3435 = vrot.lane.b32.xlu0 %v3419_v14, %s4456_s17 }
 0x2ee   : > { %3181 = vrot.lane.b32.xlu1 %v3166_v63, %s4463_s25 }
 0x2f1   : > { %v3226_v49 = vpop.permute.xlu1 %3225 }
 0x2f2   : > { %v5752_v7 = vpop.permute.xlu0 %2971  ;;  %3373 = vrot.lane.b32.xlu1 %v3358_v26, %s4465_s23 }
 0x2f5   : > { %v2970_v19 = vpop.permute.xlu1 %2969 }
 0x2f6   : > { %v3224_v39 = vpop.permute.xlu0 %3223  ;;  %3117 = vrot.lane.b32.xlu1 %v3102_v60, %s4454_s27  ;;  %v3476_v57 = vsel %vm3472_vm10, %v3459_v24, %v2970_v19 }
 0x2f7   : > { %v3523_v4 = vsel %vm1764_vm14, %v3507_v61, %v3224_v39 }
 0x2f9   : > { %v2918_v51 = vpop.permute.xlu1 %2917 }
 0x2fa   : > { %v3426_v11 = vpop.permute.xlu0 %3425  ;;  %3437 = vrot.lane.b32.xlu1 %v3422_v40, %s4456_s17 }
 0x2fd   : > { %v3170_v30 = vpop.permute.xlu1 %3169 }
 0x2fe   : > { %v3172_v29 = vpop.permute.xlu0 %3171 }
 0x301   : > { %v3362_v38 = vpop.permute.xlu1 %3361 }
 0x302   : > { %v3424_v53 = vpop.permute.xlu0 %3423 }
 0x306   : > { %v2854_v62 = vpop.permute.xlu1 %2853 }
 0x307   : > { %v3447_v48 = vsel %vm3439_vm5, %v5344_v17, %v2854_v62 }
 0x308   : > { %v3463_v46 = vsel %vm1722_vm12, %v3447_v48, %v2918_v51 }
 0x309   : > { %v2916_v42 = vpop.permute.xlu0 %2915 }
 0x30d   : > { %v3106_v54 = vpop.permute.xlu1 %3105 }
 0x30e   : > { %v3492_v45 = vsel %vm1743_vm13, %v3476_v57, %v3106_v54  ;;  %v3108_v34 = vpop.permute.xlu0 %3107 }
 0x30f   : > { %v3509_v43 = vsel %vm3505_vm9, %v3492_v45, %v3170_v30 }
 0x310   : > { %v3525_v58 = vsel %vm1764_vm14, %v3509_v43, %v3226_v49 }
 0x311   : > { %v2852_v44 = vpop.permute.xlu1 %2851  ;;  %v3542_v0 = vsel %vm3538_vm8, %v3525_v58, %v3362_v38 }
 0x312   : > { %v3360_v12 = vpop.permute.xlu0 %3359  ;;  %v3558_v25 = vsel %vm1785_vm15, %v3542_v0, %v3426_v11  ;;  %v3445_v14 = vsel %vm3439_vm5, %v5427_v15, %v2852_v44 }
 0x313   : > { %v3540_v13 = vsel %vm3538_vm8, %v3523_v4, %v3360_v12  ;;  %v3461_v63 = vsel %vm1722_vm12, %v3445_v14, %v2916_v42 }
 0x314   : > { %v3556_v20 = vsel %vm1785_vm15, %v3540_v13, %v3424_v53  ;;  %v3478_v35 = vsel %vm3472_vm10, %v3461_v63, %v5752_v7 }
 0x315   : > { %4206 = vmatprep.mubr.msk.bf16.mxu1 %vm3591_vm11, %v3556_v20  ;;  %v3230_v22 = vpop.permute.xlu1 %3229  ;;  %v3494_v26 = vsel %vm1743_vm13, %v3478_v35, %v3108_v34 }
 0x316   : > { %4207 = vmatmul.mubr.msk.bf16.vlgmr.msra.gmra.mrb[0].mxu1 %vm3591_vm11, %v3558_v25  ;;  %v2976_v28 = vpop.permute.xlu0 %2975  ;;  %v3511_v17 = vsel %vm3505_vm9, %v3494_v26, %v3172_v29 }
 0x319   : > { %v2974_v8 = vpop.permute.xlu1 %2973 }
 0x31a   : > { %v3228_v32 = vpop.permute.xlu0 %3227  ;;  %v3480_v49 = vsel %vm3472_vm10, %v3463_v46, %v2974_v8 }
 0x31b   : > { %v3527_v39 = vsel %vm1764_vm14, %v3511_v17, %v3228_v32 }
 0x31d   : > { %v2922_v31 = vpop.permute.xlu1 %2921 }
 0x31e   : > { %v3430_v59 = vpop.permute.xlu0 %3429 }
 0x321   : > { %v3174_v33 = vpop.permute.xlu1 %3173 }
 0x322   : > { %v3176_v18 = vpop.permute.xlu0 %3175 }
 0x325   : > { %v3366_v37 = vpop.permute.xlu1 %3365 }
 0x326   : > { %v3428_v55 = vpop.permute.xlu0 %3427 }
 0x329   : > { %v2858_v16 = vpop.permute.xlu1 %2857 }
 0x32a   : > { %v2920_v5 = vpop.permute.xlu0 %2919  ;;  %v3451_v57 = vsel %vm3439_vm5, %v5494_v27, %v2858_v16 }
 0x32b   : > { %v3467_v45 = vsel %vm1722_vm12, %v3451_v57, %v2922_v31 }
 0x32e   : > { %v3110_v56 = vpop.permute.xlu1 %3109 }
 0x32f   : > { %v3496_v2 = vsel %vm1743_vm13, %v3480_v49, %v3110_v56  ;;  %v3112_v15 = vpop.permute.xlu0 %3111 }
 0x330   : > { %v3513_v41 = vsel %vm3505_vm9, %v3496_v2, %v3174_v33 }
 0x331   : > { %v3529_v36 = vsel %vm1764_vm14, %v3513_v41, %v3230_v22 }
 0x332   : > { %v3546_v60 = vsel %vm3538_vm8, %v3529_v36, %v3366_v37 }
 0x333   : > { %v2856_v19 = vpop.permute.xlu1 %2855  ;;  %v3364_v7 = vpop.permute.xlu0 %3363  ;;  %v3562_v11 = vsel %vm1785_vm15, %v3546_v60, %v3430_v59 }
 0x334   : > { %v3544_v1 = vsel %vm3538_vm8, %v3527_v39, %v3364_v7  ;;  %v3449_v9 = vsel %vm3439_vm5, %v5575_v6, %v2856_v19  ;;  %v5852_v7 = vld [vmem:[%s5940_s7] ss:$0 sm:$0xff] }
 0x335   : > { %v3560_v47 = vsel %vm1785_vm15, %v3544_v1, %v3428_v55  ;;  %v3465_v3 = vsel %vm1722_vm12, %v3449_v9, %v2920_v5 }
 0x336   : > { %4210 = vmatprep.mubr.msk.bf16.mxu1 %vm3591_vm11, %v3560_v47  ;;  %v3482_v54 = vsel %vm3472_vm10, %v3465_v3, %v2976_v28 }
 0x337   : > { %v3234_v51 = vpop.permute.xlu1 %3233  ;;  %4211 = vmatmul.mubr.msk.bf16.gmra.mrb[4].mxu1 %vm3591_vm11, %v3562_v11  ;;  %v2980_v40 = vpop.permute.xlu0 %2979  ;;  %v3498_v34 = vsel %vm1743_vm13, %v3482_v54, %v3112_v15 }
 0x338   : > { %v3515_v44 = vsel %vm3505_vm9, %v3498_v34, %v3176_v18 }
 0x33b   : > { %v2978_v30 = vpop.permute.xlu1 %2977  ;;  %v3232_v29 = vpop.permute.xlu0 %3231 }
 0x33c   : > { %v3484_v58 = vsel %vm3472_vm10, %v3467_v45, %v2978_v30  ;;  %v3531_v12 = vsel %vm1764_vm14, %v3515_v44, %v3232_v29 }
 0x33f   : > { %v2926_v38 = vpop.permute.xlu1 %2925  ;;  %v3434_v53 = vpop.permute.xlu0 %3433 }
 0x343   : > { %v3178_v52 = vpop.permute.xlu1 %3177  ;;  %v3180_v62 = vpop.permute.xlu0 %3179 }
 0x347   : > { %v3432_v21 = vpop.permute.xlu0 %3431 }
 0x348   : > { %v3370_v42 = vpop.permute.xlu1 %3369 }
 0x34b   : > { %v2924_v24 = vpop.permute.xlu0 %2923 }
 0x34c   : > { %v2862_v50 = vpop.permute.xlu1 %2861 }
 0x34d   : > { %v3455_v35 = vsel %vm3439_vm5, %v5646_v23, %v2862_v50  ;;  %v5847_v23 = vld [vmem:[%s5939_s6] ss:$0 sm:$0xff] }
 0x34e   : > { %v3471_v49 = vsel %vm1722_vm12, %v3455_v35, %v2926_v38 }
 0x34f   : > { %v3116_v43 = vpop.permute.xlu0 %3115 }
 0x350   : > { %v3114_v61 = vpop.permute.xlu1 %3113 }
 0x351   : > { %v3500_v6 = vsel %vm1743_vm13, %v3484_v58, %v3114_v61 }
 0x352   : > { %v3517_v4 = vsel %vm3505_vm9, %v3500_v6, %v3178_v52 }
 0x353   : > { %v3533_v27 = vsel %vm1764_vm14, %v3517_v4, %v3234_v51  ;;  %v3368_v0 = vpop.permute.xlu0 %3367 }
 0x354   : > { %v2860_v13 = vpop.permute.xlu1 %2859  ;;  %v3548_v20 = vsel %vm3538_vm8, %v3531_v12, %v3368_v0  ;;  %v3550_v22 = vsel %vm3538_vm8, %v3533_v27, %v3370_v42 }
 0x355   : > { %v3453_v25 = vsel %vm3439_vm5, %v5713_v10, %v2860_v13  ;;  %v3564_v28 = vsel %vm1785_vm15, %v3548_v20, %v3432_v21  ;;  %v3566_v32 = vsel %vm1785_vm15, %v3550_v22, %v3434_v53 }
 0x356   : > { %v3469_v8 = vsel %vm1722_vm12, %v3453_v25, %v2924_v24  ;;  %4214 = vmatprep.mubr.msk.bf16.mxu1 %vm3591_vm11, %v3564_v28 }
 0x357   : > { %v3486_v31 = vsel %vm3472_vm10, %v3469_v8, %v2980_v40  ;;  %4215 = vmatmul.mubr.msk.bf16.gmra.mrb[8].mxu1 %vm3591_vm11, %v3566_v32  ;;  %v3236_v59 = vpop.permute.xlu0 %3235 }
 0x358   : > { %v3238_v33 = vpop.permute.xlu1 %3237  ;;  %v3502_v18 = vsel %vm1743_vm13, %v3486_v31, %v3116_v43 }
 0x359   : > { %v3519_v37 = vsel %vm3505_vm9, %v3502_v18, %v3180_v62 }
 0x35a   : > { %v3535_v14 = vsel %vm1764_vm14, %v3519_v37, %v3236_v59 }
 0x35b   : > { %v3372_v55 = vpop.permute.xlu0 %3371 }
 0x35c   : > { %v2982_v10 = vpop.permute.xlu1 %2981  ;;  %v3552_v63 = vsel %vm3538_vm8, %v3535_v14, %v3372_v55 }
 0x35d   : > { %v3488_v56 = vsel %vm3472_vm10, %v3471_v49, %v2982_v10 }
 0x35f   : > { %v3436_v16 = vpop.permute.xlu0 %3435 }
 0x360   : > { %v3182_v48 = vpop.permute.xlu1 %3181  ;;  %v3568_v5 = vsel %vm1785_vm15, %v3552_v63, %v3436_v16 }
 0x361   : > { %4218 = vmatprep.mubr.msk.bf16.mxu1 %vm3591_vm11, %v3568_v5 }
 0x364   : > { %v3374_v46 = vpop.permute.xlu1 %3373 }
 0x368   : > { %v3118_v26 = vpop.permute.xlu1 %3117 }
 0x369   : > { %v3504_v2 = vsel %vm1743_vm13, %v3488_v56, %v3118_v26 }
 0x36a   : > { %v3521_v15 = vsel %vm3505_vm9, %v3504_v2, %v3182_v48 }
 0x36b   : > { %v3537_v41 = vsel %vm1764_vm14, %v3521_v15, %v3238_v33 }
 0x36c   : > { %v3554_v36 = vsel %vm3538_vm8, %v3537_v41, %v3374_v46  ;;  %v3438_v17 = vpop.permute.xlu1 %3437 }
 0x36d   : > { %v3570_v19 = vsel %vm1785_vm15, %v3554_v36, %v3438_v17 }
 0x36e   : > { %4219 = vmatmul.mubr.msk.bf16.gmra.mrb[12].mxu1 %vm3591_vm11, %v3570_v19 }
 0x3e9   : > { %v4208_v39 = vpop.f32.mrb[0].mxu1 }
 0x3ea   : > { %v3718_v60 = vmul.f32 %v4208_v39, %v5847_v23  ;;  %v3646_v1 = vpop.f32.mrb[1].mxu1 }
 0x3eb   : > { %v3716_v47 = vmul.f32 %v5847_v23, %v3646_v1  ;;  %v4209_v51 = vpop.f32.mrb[2].mxu1 }
 0x3ec   : > { %v3741_v11 = vadd.f32 %v5852_v7, %v3718_v60  ;;  %v3719_v40 = vmul.f32 %v4209_v51, %v5847_v23  ;;  %v3649_v30 = vpop.f32.mrb[3].mxu1 }
 0x3ed   : > { %v3739_v29 = vadd.f32 %v5852_v7, %v3716_v47  ;;  %v3717_v38 = vmul.f32 %v5847_v23, %v3649_v30 }
 0x3ee   : > { %v3757_v53 = vmax.f32 %v3741_v11, 0.0  ;;  %v3742_v52 = vadd.f32 %v5852_v7, %v3719_v40 }
 0x3ef   : > { %v3755_v62 = vmax.f32 %v3739_v29, 0.0  ;;  %v3740_v9 = vadd.f32 %v5852_v7, %v3717_v38 }
 0x3f0   : > { %3773 = vst.msk [vmem:[%s4561_s11 + $0x10] sm:$0xff] %vm1722_vm12, %v3757_v53  ;;  %v3758_v21 = vmax.f32 %v3742_v52, 0.0 }
 0x3f1   : > { %3771 = vst.msk [vmem:[%s4561_s11] sm:$0xff] %vm1722_vm12, %v3755_v62  ;;  %v3756_v42 = vmax.f32 %v3740_v9, 0.0 }
 0x3f2   : > { %3774 = vst.msk [vmem:[%s4561_s11 + $0x18] sm:$0xff] %vm1722_vm12, %v3758_v21 }
 0x3f3   : > { %3772 = vst.msk [vmem:[%s4561_s11 + $0x8] sm:$0xff] %vm1722_vm12, %v3756_v42 }
 0x40a   : > { %v4212_v3 = vpop.f32.mrb[4].mxu1 }
 0x40b   : > { %v3722_v24 = vmul.f32 %v4212_v3, %v5847_v23  ;;  %v3662_v57 = vpop.f32.mrb[5].mxu1 }
 0x40c   : > { %v3720_v54 = vmul.f32 %v5847_v23, %v3662_v57  ;;  %v4213_v50 = vpop.f32.mrb[6].mxu1 }
 0x40d   : > { %v3745_v45 = vadd.f32 %v5852_v7, %v3722_v24  ;;  %v3723_v34 = vmul.f32 %v4213_v50, %v5847_v23  ;;  %v3665_v43 = vpop.f32.mrb[7].mxu1 }
 0x40e   : > { %v3743_v58 = vadd.f32 %v5852_v7, %v3720_v54  ;;  %v3721_v61 = vmul.f32 %v5847_v23, %v3665_v43 }
 0x40f   : > { %v3761_v6 = vmax.f32 %v3745_v45, 0.0  ;;  %v3746_v44 = vadd.f32 %v5852_v7, %v3723_v34 }
 0x410   : > { %v3759_v4 = vmax.f32 %v3743_v58, 0.0  ;;  %v3744_v12 = vadd.f32 %v5852_v7, %v3721_v61 }
 0x411   : > { %3777 = vst.msk [vmem:[%s4561_s11 + $0x30] sm:$0xff] %vm1722_vm12, %v3761_v6  ;;  %v3762_v27 = vmax.f32 %v3746_v44, 0.0 }
 0x412   : > { %3775 = vst.msk [vmem:[%s4561_s11 + $0x20] sm:$0xff] %vm1722_vm12, %v3759_v4  ;;  %v3760_v0 = vmax.f32 %v3744_v12, 0.0 }
 0x413   : > { %3778 = vst.msk [vmem:[%s4561_s11 + $0x38] sm:$0xff] %vm1722_vm12, %v3762_v27 }
 0x414   : > { %3776 = vst.msk [vmem:[%s4561_s11 + $0x28] sm:$0xff] %vm1722_vm12, %v3760_v0 }
 0x42a   : > { %v4216_v13 = vpop.f32.mrb[8].mxu1 }
 0x42b   : > { %v3726_v20 = vmul.f32 %v4216_v13, %v5847_v23  ;;  %v3678_v22 = vpop.f32.mrb[9].mxu1 }
 0x42c   : > { %v3724_v25 = vmul.f32 %v5847_v23, %v3678_v22  ;;  %v4217_v28 = vpop.f32.mrb[10].mxu1 }
 0x42d   : > { %v3749_v8 = vadd.f32 %v5852_v7, %v3726_v20  ;;  %v3727_v32 = vmul.f32 %v4217_v28, %v5847_v23  ;;  %v3681_v31 = vpop.f32.mrb[11].mxu1 }
 0x42e   : > { %v3747_v59 = vadd.f32 %v5852_v7, %v3724_v25  ;;  %v3725_v33 = vmul.f32 %v5847_v23, %v3681_v31 }
 0x42f   : > { %v3765_v18 = vmax.f32 %v3749_v8, 0.0  ;;  %v3750_v37 = vadd.f32 %v5852_v7, %v3727_v32 }
 0x430   : > { %v3763_v55 = vmax.f32 %v3747_v59, 0.0  ;;  %v3748_v10 = vadd.f32 %v5852_v7, %v3725_v33 }
 0x431   : > { %3781 = vst.msk [vmem:[%s4561_s11 + $0x50] sm:$0xff] %vm1722_vm12, %v3765_v18  ;;  %v3766_v14 = vmax.f32 %v3750_v37, 0.0 }
 0x432   : > { %3779 = vst.msk [vmem:[%s4561_s11 + $0x40] sm:$0xff] %vm1722_vm12, %v3763_v55  ;;  %v3764_v63 = vmax.f32 %v3748_v10, 0.0 }
 0x433   : > { %3782 = vst.msk [vmem:[%s4561_s11 + $0x58] sm:$0xff] %vm1722_vm12, %v3766_v14 }
 0x434   : > { %3780 = vst.msk [vmem:[%s4561_s11 + $0x48] sm:$0xff] %vm1722_vm12, %v3764_v63 }
 0x441   : > { %v4220_v16 = vpop.f32.mrb[12].mxu1 }
 0x442   : > { %v3730_v48 = vmul.f32 %v4220_v16, %v5847_v23  ;;  %v3694_v5 = vpop.f32.mrb[13].mxu1 }
 0x443   : > { %v3728_v35 = vmul.f32 %v5847_v23, %v3694_v5  ;;  %v4221_v46 = vpop.f32.mrb[14].mxu1 }
 0x444   : > { %v3753_v49 = vadd.f32 %v5852_v7, %v3730_v48  ;;  %v3731_v56 = vmul.f32 %v4221_v46, %v5847_v23  ;;  %v3697_v26 = vpop.f32.mrb[15].mxu1 }
 0x445   : > { %v3751_v2 = vadd.f32 %v5852_v7, %v3728_v35  ;;  %v3729_v15 = vmul.f32 %v5847_v23, %v3697_v26 }
 0x446   : > { %v3769_v41 = vmax.f32 %v3753_v49, 0.0  ;;  %v3754_v36 = vadd.f32 %v5852_v7, %v3731_v56 }
 0x447   : > { %v3767_v17 = vmax.f32 %v3751_v2, 0.0  ;;  %v3752_v19 = vadd.f32 %v5852_v7, %v3729_v15 }
 0x448   : > { %3785 = vst.msk [vmem:[%s4561_s11 + $0x70] sm:$0xff] %vm1722_vm12, %v3769_v41  ;;  %v3770_v39 = vmax.f32 %v3754_v36, 0.0 }
 0x449   : > { %3783 = vst.msk [vmem:[%s4561_s11 + $0x60] sm:$0xff] %vm1722_vm12, %v3767_v17  ;;  %v3768_v60 = vmax.f32 %v3752_v19, 0.0 }
 0x44a   : > { %3786 = vst.msk [vmem:[%s4561_s11 + $0x78] sm:$0xff] %vm1722_vm12, %v3770_v39 }
 0x44b   : > { %3784 = vst.msk [vmem:[%s4561_s11 + $0x68] sm:$0xff] %vm1722_vm12, %v3768_v60 }
 0x44c PF: > { %s18_s9 = sadd.s32 1, %s4449_s9   ;;  %s5971_s12 = sld [smem:[#allocation4_spill]] }
 0x44d   : > { %p15_p8 = scmp.ge.s32.totalorder %s18_s9, 6   ;;  %s5972_s27 = smov %s4441_s29 }
 0x44e   : > { %s5973_s28 = smov %s4445_s30  ;;  %s5974_s29 = smov %s5977_s10 }
 0x44f   :  { %17 = sbr.rel (!%p15_p8) target bundleno = 3 (0x3), region = 93 }
 0x452   : > { %s5975_s30 = smov %s5971_s12 }

</bundles_post_ra>
